<compile_context>
chip_gen: v6e
topology: v6e:2x2x1
jax: 0.10.0
libtpu: 0.0.40
codegen_flags: <defaults>
</compile_context>

<pallas_src>
import functools
import math

import jax
import jax.numpy as jnp
from jax.experimental import pallas as pl
from jax.experimental.pallas import tpu as pltpu


def _round_up(x, m):
    return ((x + m - 1) // m) * m


def gru_kernel(xp_ref, w_rz_ref, w_n_ref, b_hn_ref, out_ref, h_scratch, *, hp, tb):
    """Recurrent part only. One grid step == one (batch tile, time chunk).

    xp_ref   : (Tb, Bb, 3*Hp) f32   x @ W_i + b_i (+ b_hr/b_hz folded), time-major
    w_rz_ref : (Hp, 2*Hp)    bf16   fused hidden->hidden weights for r,z gates
    w_n_ref  : (Hp, Hp)      bf16   hidden->hidden weights for n gate
    b_hn_ref : (1, Hp)       f32    hidden bias of the n gate (stays inside r*(...))
    out_ref  : (Tb, Bb, Hp)
    h_scratch: (Bb, Hp)      f32    hidden state, persists across time chunks
    """
    @pl.when(pl.program_id(1) == 0)      # first time-chunk of this batch tile
    def _():
        h_scratch[...] = jnp.zeros_like(h_scratch)

    w_rz = w_rz_ref[...]                                   # (Hp, 2Hp) bf16
    w_n = w_n_ref[...]                                     # (Hp, Hp)  bf16
    # Hoisted broadcast (JAX does not CSE broadcast_in_dim inside the loop).
    b_hn = jnp.broadcast_to(b_hn_ref[...].astype(jnp.float32), h_scratch.shape)

    def step(tt, h):
        xg = xp_ref[tt].astype(jnp.float32)                # (Bb, 3Hp)
        h_bf = h.astype(jnp.bfloat16)
        # r/z matmul first, then n matmul: r/z sigmoids (EUP) overlap n drain.
        hg_rz = jnp.dot(h_bf, w_rz, preferred_element_type=jnp.float32)
        hg_n = jnp.dot(h_bf, w_n, preferred_element_type=jnp.float32)
        # PyTorch GRU cell, gate order r, z, n; b_hr/b_hz already folded into xg.
        r = jax.nn.sigmoid(xg[:, 0:hp] + hg_rz[:, 0:hp])
        z = jax.nn.sigmoid(xg[:, hp:2 * hp] + hg_rz[:, hp:2 * hp])
        n = jnp.tanh(xg[:, 2 * hp:3 * hp] + r * (hg_n + b_hn))
        h_new = (1.0 - z) * n + z * h
        out_ref[tt] = h_new.astype(out_ref.dtype)
        return h_new                                       # carried in vregs

    h_final = jax.lax.fori_loop(0, tb, step, h_scratch[...], unroll=min(tb, 8))
    h_scratch[...] = h_final                               # single write-back per chunk


def gru_forward(x, p):
    """x: (B, T, I) batch_first, returns (B, T, H) — matches nn.GRU output[0]."""
    B, T, I = x.shape
    H = p["w_hr"].shape[0]

    Hp = max(128, _round_up(H, 128))              # lane-dense padded hidden size
    Bb = max(8, min(_round_up(B, 8), 128))        # sublane-aligned batch tile
    Bp = _round_up(B, Bb)

    # --- time-chunk size: big chunks amortize the ~0.35 us/step grid overhead ---
    if T <= 256:
        Tb = T
    else:
        Tb = 256
        for cand in range(512, 127, -1):          # prefer a divisor of T (no tail)
            if T % cand == 0:
                Tb = cand
                break

    def _block_bytes(tb):
        return (tb * Bb * 3 * Hp * 4 * 2          # x_proj blocks (double-buffered)
                + tb * Bb * Hp * 4 * 2            # out blocks
                + Hp * 3 * Hp * 2 * 2             # bf16 resident weights
                + Bb * Hp * 4)                    # h scratch

    while Tb > 8 and _block_bytes(Tb) > 40 * 1024 * 1024:   # v7x headroom
        Tb = max(8, Tb // 2)
    T_pad = _round_up(T, Tb)

    def pad_cols(w):   # (rows, H) -> (rows, Hp)
        return jnp.pad(w, ((0, 0), (0, Hp - H)))

    def pad_both(w):   # (H, H) -> (Hp, Hp)
        return jnp.pad(w, ((0, Hp - H), (0, Hp - H)))

    # Fused + per-gate-padded weights / biases (gate order r, z, n).
    w_i = jnp.concatenate([pad_cols(p["w_ir"]), pad_cols(p["w_iz"]),
                           pad_cols(p["w_in"])], axis=1)              # (I, 3Hp)
    # Fold step-invariant b_hr / b_hz into the input-projection bias.
    b_fold = jnp.concatenate([pad_cols(p["b_ir"] + p["b_hr"]),
                              pad_cols(p["b_iz"] + p["b_hz"]),
                              pad_cols(p["b_in"])], axis=1)            # (1, 3Hp)
    w_h_rz = jnp.concatenate([pad_both(p["w_hr"]),
                              pad_both(p["w_hz"])], axis=1).astype(jnp.bfloat16)
    w_h_n = pad_both(p["w_hn"]).astype(jnp.bfloat16)                   # (Hp, Hp)
    b_hn = pad_cols(p["b_hn"])                                         # (1, Hp) f32

    # Hoisted input projection: one big matmul outside the serial loop,
    # produced directly time-major so the kernel needs no transposes.
    x_proj = jnp.einsum("bti,ig->tbg", x.astype(jnp.float32), w_i) + b_fold
    x_proj = jnp.pad(x_proj, ((0, T_pad - T), (0, Bp - B), (0, 0)))    # (T_pad, Bp, 3Hp)

    n_b = Bp // Bb
    n_t = T_pad // Tb

    kernel = functools.partial(gru_kernel, hp=Hp, tb=Tb)

    compiler_kwargs = dict(dimension_semantics=("parallel", "arbitrary"))
    blk_bytes = _block_bytes(Tb)
    if blk_bytes > 24 * 1024 * 1024:
        # Explicit scoped-VMEM limit for big chunks (stay under v7x 64 MiB physical).
        compiler_kwargs["vmem_limit_bytes"] = min(int(blk_bytes * 1.25),
                                                  56 * 1024 * 1024)

    out_tm = pl.pallas_call(
        kernel,
        out_shape=jax.ShapeDtypeStruct((T_pad, Bp, Hp), x.dtype),
        grid_spec=pltpu.PrefetchScalarGridSpec(
            num_scalar_prefetch=0,
            grid=(n_b, n_t),
            in_specs=[
                pl.BlockSpec((Tb, Bb, 3 * Hp), lambda b, t: (t, b, 0)),
                pl.BlockSpec((Hp, 2 * Hp), lambda b, t: (0, 0)),   # resident W_h (r,z)
                pl.BlockSpec((Hp, Hp), lambda b, t: (0, 0)),       # resident W_h (n)
                pl.BlockSpec((1, Hp), lambda b, t: (0, 0)),        # resident b_hn
            ],
            out_specs=pl.BlockSpec((Tb, Bb, Hp), lambda b, t: (t, b, 0)),
            scratch_shapes=[pltpu.VMEM((Bb, Hp), jnp.float32)],
        ),
        compiler_params=pltpu.CompilerParams(**compiler_kwargs),
    )(x_proj, w_h_rz, w_h_n, b_hn)

    # back to batch_first and strip padding
    return jnp.transpose(out_tm, (1, 0, 2))[:B, :T, :H]


def init_gru_params(key, input_size, hidden_size):
    """Deterministic init mimicking nn.GRU: U(-1/sqrt(H), 1/sqrt(H))."""
    bound = 1.0 / math.sqrt(hidden_size)
    ks = jax.random.split(key, 12)
    u = lambda kk, shape: jax.random.uniform(kk, shape, jnp.float32, -bound, bound)
    return {
        # weight_ih_l0 (3H, I) split per gate and transposed -> (I, H)
        "w_ir": u(ks[0], (input_size, hidden_size)),
        "w_iz": u(ks[1], (input_size, hidden_size)),
        "w_in": u(ks[2], (input_size, hidden_size)),
        # weight_hh_l0 (3H, H) split per gate and transposed -> (H, H)
        "w_hr": u(ks[3], (hidden_size, hidden_size)),
        "w_hz": u(ks[4], (hidden_size, hidden_size)),
        "w_hn": u(ks[5], (hidden_size, hidden_size)),
        # bias_ih_l0 / bias_hh_l0, per gate, kept 2D (1, H) for lane layout
        "b_ir": u(ks[6], (1, hidden_size)),
        "b_iz": u(ks[7], (1, hidden_size)),
        "b_in": u(ks[8], (1, hidden_size)),
        "b_hr": u(ks[9], (1, hidden_size)),
        "b_hz": u(ks[10], (1, hidden_size)),
        "b_hn": u(ks[11], (1, hidden_size)),
    }


def gru_reference(x, p):
    """Pure-JAX f32 GRU (matches torch.nn.GRU forward with h0 = 0)."""
    B, T, I = x.shape
    H = p["w_hr"].shape[0]

    def step(h, x_t):
        r = jax.nn.sigmoid(x_t @ p["w_ir"] + p["b_ir"] + h @ p["w_hr"] + p["b_hr"])
        z = jax.nn.sigmoid(x_t @ p["w_iz"] + p["b_iz"] + h @ p["w_hz"] + p["b_hz"])
        n = jnp.tanh(x_t @ p["w_in"] + p["b_in"] + r * (h @ p["w_hn"] + p["b_hn"]))
        h_new = (1.0 - z) * n + z * h
        return h_new, h_new

    h0 = jnp.zeros((B, H), jnp.float32)
    _, ys = jax.lax.scan(step, h0, jnp.transpose(x, (1, 0, 2)))
    return jnp.transpose(ys, (1, 0, 2))


if __name__ == "__main__":
    input_size = 100
    hidden_size = 150
    batch = 2
    seq = 8

    key = jax.random.PRNGKey(0)
    k_x, k_p = jax.random.split(key)
    x = jax.random.normal(k_x, (batch, seq, input_size), dtype=jnp.float32)
    params = init_gru_params(k_p, input_size, hidden_size)

    out = gru_forward(x, params)
    out = jax.block_until_ready(out)
    assert out.shape == (batch, seq, hidden_size)

    ref = jax.block_until_ready(gru_reference(x, params))
    # bf16 MXU operands for the recurrent matmul -> ~1e-2 agreement vs f32 ref.
    assert jnp.allclose(out, ref, atol=2e-2, rtol=2e-2), "mismatch vs JAX reference"

    print("KERNEL_OK")
</pallas_src>

<mosaic_0001>
module attributes {stable_mosaic.version = 11 : i64} {
  func.func @gru_kernel(%arg0: i32, %arg1: i32, %arg2: memref<8x8x768xf32, #tpu.memory_space<vmem>>, %arg3: memref<256x512xbf16, #tpu.memory_space<vmem>>, %arg4: memref<256x256xbf16, #tpu.memory_space<vmem>>, %arg5: memref<1x256xf32, #tpu.memory_space<vmem>>, %arg6: memref<8x8x256xf32, #tpu.memory_space<vmem>>, %arg7: memref<8x256xf32, #tpu.memory_space<vmem>>) attributes {dimension_semantics = [#tpu.dimension_semantics<parallel>, #tpu.dimension_semantics<arbitrary>], iteration_bounds = array<i64: 1, 1>, scalar_prefetch = 0 : i64, scratch_operands = 1 : i64, tpu.core_type = #tpu.core_type<tc>, window_params = [{transform_indices = @transform_0, window_bounds = array<i64: 8, 8, 768>}, {pipeline_mode = #tpu.pipeline_mode<synchronous>, transform_indices = @transform_1, window_bounds = array<i64: 256, 512>}, {pipeline_mode = #tpu.pipeline_mode<synchronous>, transform_indices = @transform_2, window_bounds = array<i64: 256, 256>}, {pipeline_mode = #tpu.pipeline_mode<synchronous>, transform_indices = @transform_3, window_bounds = array<i64: 1, 256>}, {transform_indices = @transform_4, window_bounds = array<i64: 8, 8, 256>}]} {
    %c0_i32 = arith.constant 0 : i32
    %0 = arith.cmpi eq, %arg1, %c0_i32 : i32
    %1 = arith.extui %0 : i1 to i32
    %c0_i32_0 = arith.constant 0 : i32
    %2 = arith.cmpi ne, %1, %c0_i32_0 : i32
    scf.if %2 {
      %cst_82 = arith.constant 0.000000e+00 : f32
      %298 = vector.broadcast %cst_82 : f32 to vector<8x256xf32>
      %c0_83 = arith.constant 0 : index
      %c0_84 = arith.constant 0 : index
      %299 = vector.load %arg7[%c0_83, %c0_84] : memref<8x256xf32, #tpu.memory_space<vmem>>, vector<8x256xf32>
      tpu.vector_store %arg7[%c0_83, %c0_84], %298 {strides = array<i32>} : memref<8x256xf32, #tpu.memory_space<vmem>>, vector<8x256xf32>,
    } else {
    }
    %c0 = arith.constant 0 : index
    %c0_1 = arith.constant 0 : index
    %3 = vector.load %arg3[%c0, %c0_1] : memref<256x512xbf16, #tpu.memory_space<vmem>>, vector<256x512xbf16>
    %c0_2 = arith.constant 0 : index
    %c0_3 = arith.constant 0 : index
    %4 = vector.load %arg4[%c0_2, %c0_3] : memref<256x256xbf16, #tpu.memory_space<vmem>>, vector<256x256xbf16>
    %c0_4 = arith.constant 0 : index
    %c0_5 = arith.constant 0 : index
    %5 = vector.load %arg5[%c0_4, %c0_5] : memref<1x256xf32, #tpu.memory_space<vmem>>, vector<1x256xf32>
    %6 = vector.shape_cast %5 : vector<1x256xf32> to vector<1x256xf32>
    %7 = vector.broadcast %6 : vector<1x256xf32> to vector<8x256xf32>
    %c0_6 = arith.constant 0 : index
    %c0_7 = arith.constant 0 : index
    %8 = vector.load %arg7[%c0_6, %c0_7] : memref<8x256xf32, #tpu.memory_space<vmem>>, vector<8x256xf32>
    %c0_i32_8 = arith.constant 0 : i32
    %9 = arith.index_cast %c0_i32_8 : i32 to index
    %c0_9 = arith.constant 0 : index
    %c0_10 = arith.constant 0 : index
    %10 = vector.load %arg2[%9, %c0_9, %c0_10] : memref<8x8x768xf32, #tpu.memory_space<vmem>>, vector<1x8x768xf32>
    %11 = vector.shape_cast %10 : vector<1x8x768xf32> to vector<8x768xf32>
    %12 = arith.truncf %8 : vector<8x256xf32> to vector<8x256xbf16>
    %cst = arith.constant dense<0.000000e+00> : vector<8x512xf32>
    %13 = tpu.matmul %12, %3, %cst {dimension_numbers = #tpu.dot_dimension_numbers<[1], [0], [0], [1], [0, 0, 1, 1], [], []>} : vector<8x256xbf16>, vector<256x512xbf16>, vector<8x512xf32> -> vector<8x512xf32>
    %cst_11 = arith.constant dense<0.000000e+00> : vector<8x256xf32>
    %14 = tpu.matmul %12, %4, %cst_11 {dimension_numbers = #tpu.dot_dimension_numbers<[1], [0], [0], [1], [0, 0, 1, 1], [], []>} : vector<8x256xbf16>, vector<256x256xbf16>, vector<8x256xf32> -> vector<8x256xf32>
    %15 = vector.extract_strided_slice %11 {offsets = [0, 0], sizes = [8, 256], strides = [1, 1]} : vector<8x768xf32> to vector<8x256xf32>
    %16 = vector.extract_strided_slice %13 {offsets = [0, 0], sizes = [8, 256], strides = [1, 1]} : vector<8x512xf32> to vector<8x256xf32>
    %17 = arith.addf %15, %16 : vector<8x256xf32>
    %18 = arith.negf %17 : vector<8x256xf32>
    %19 = math.exp %18 : vector<8x256xf32>
    %cst_12 = arith.constant 1.000000e+00 : f32
    %20 = vector.broadcast %cst_12 : f32 to vector<8x256xf32>
    %21 = arith.addf %20, %19 : vector<8x256xf32>
    %22 = arith.divf %20, %21 : vector<8x256xf32>
    %23 = vector.extract_strided_slice %11 {offsets = [0, 256], sizes = [8, 256], strides = [1, 1]} : vector<8x768xf32> to vector<8x256xf32>
    %24 = vector.extract_strided_slice %13 {offsets = [0, 256], sizes = [8, 256], strides = [1, 1]} : vector<8x512xf32> to vector<8x256xf32>
    %25 = arith.addf %23, %24 : vector<8x256xf32>
    %26 = arith.negf %25 : vector<8x256xf32>
    %27 = math.exp %26 : vector<8x256xf32>
    %cst_13 = arith.constant 1.000000e+00 : f32
    %28 = vector.broadcast %cst_13 : f32 to vector<8x256xf32>
    %29 = arith.addf %28, %27 : vector<8x256xf32>
    %30 = arith.divf %28, %29 : vector<8x256xf32>
    %31 = vector.extract_strided_slice %11 {offsets = [0, 512], sizes = [8, 256], strides = [1, 1]} : vector<8x768xf32> to vector<8x256xf32>
    %32 = arith.addf %14, %7 : vector<8x256xf32>
    %33 = arith.mulf %22, %32 : vector<8x256xf32>
    %34 = arith.addf %31, %33 : vector<8x256xf32>
    %35 = math.tanh %34 : vector<8x256xf32>
    %cst_14 = arith.constant 1.000000e+00 : f32
    %36 = vector.broadcast %cst_14 : f32 to vector<8x256xf32>
    %37 = arith.subf %36, %30 : vector<8x256xf32>
    %38 = arith.mulf %37, %35 : vector<8x256xf32>
    %39 = arith.mulf %30, %8 : vector<8x256xf32>
    %40 = arith.addf %38, %39 : vector<8x256xf32>
    %41 = arith.index_cast %c0_i32_8 : i32 to index
    %c0_15 = arith.constant 0 : index
    %c0_16 = arith.constant 0 : index
    %42 = vector.load %arg6[%41, %c0_15, %c0_16] : memref<8x8x256xf32, #tpu.memory_space<vmem>>, vector<1x8x256xf32>
    %43 = vector.shape_cast %42 : vector<1x8x256xf32> to vector<8x256xf32>
    %44 = vector.shape_cast %40 : vector<8x256xf32> to vector<1x8x256xf32>
    tpu.vector_store %arg6[%41, %c0_15, %c0_16], %44 {strides = array<i32>} : memref<8x8x256xf32, #tpu.memory_space<vmem>>, vector<1x8x256xf32>,
    %c1_i32 = arith.constant 1 : i32
    %45 = arith.index_cast %c1_i32 : i32 to index
    %c0_17 = arith.constant 0 : index
    %c0_18 = arith.constant 0 : index
    %46 = vector.load %arg2[%45, %c0_17, %c0_18] : memref<8x8x768xf32, #tpu.memory_space<vmem>>, vector<1x8x768xf32>
    %47 = vector.shape_cast %46 : vector<1x8x768xf32> to vector<8x768xf32>
    %48 = arith.truncf %40 : vector<8x256xf32> to vector<8x256xbf16>
    %cst_19 = arith.constant dense<0.000000e+00> : vector<8x512xf32>
    %49 = tpu.matmul %48, %3, %cst_19 {dimension_numbers = #tpu.dot_dimension_numbers<[1], [0], [0], [1], [0, 0, 1, 1], [], []>} : vector<8x256xbf16>, vector<256x512xbf16>, vector<8x512xf32> -> vector<8x512xf32>
    %cst_20 = arith.constant dense<0.000000e+00> : vector<8x256xf32>
    %50 = tpu.matmul %48, %4, %cst_20 {dimension_numbers = #tpu.dot_dimension_numbers<[1], [0], [0], [1], [0, 0, 1, 1], [], []>} : vector<8x256xbf16>, vector<256x256xbf16>, vector<8x256xf32> -> vector<8x256xf32>
    %51 = vector.extract_strided_slice %47 {offsets = [0, 0], sizes = [8, 256], strides = [1, 1]} : vector<8x768xf32> to vector<8x256xf32>
    %52 = vector.extract_strided_slice %49 {offsets = [0, 0], sizes = [8, 256], strides = [1, 1]} : vector<8x512xf32> to vector<8x256xf32>
    %53 = arith.addf %51, %52 : vector<8x256xf32>
    %54 = arith.negf %53 : vector<8x256xf32>
    %55 = math.exp %54 : vector<8x256xf32>
    %cst_21 = arith.constant 1.000000e+00 : f32
    %56 = vector.broadcast %cst_21 : f32 to vector<8x256xf32>
    %57 = arith.addf %56, %55 : vector<8x256xf32>
    %58 = arith.divf %56, %57 : vector<8x256xf32>
    %59 = vector.extract_strided_slice %47 {offsets = [0, 256], sizes = [8, 256], strides = [1, 1]} : vector<8x768xf32> to vector<8x256xf32>
    %60 = vector.extract_strided_slice %49 {offsets = [0, 256], sizes = [8, 256], strides = [1, 1]} : vector<8x512xf32> to vector<8x256xf32>
    %61 = arith.addf %59, %60 : vector<8x256xf32>
    %62 = arith.negf %61 : vector<8x256xf32>
    %63 = math.exp %62 : vector<8x256xf32>
    %cst_22 = arith.constant 1.000000e+00 : f32
    %64 = vector.broadcast %cst_22 : f32 to vector<8x256xf32>
    %65 = arith.addf %64, %63 : vector<8x256xf32>
    %66 = arith.divf %64, %65 : vector<8x256xf32>
    %67 = vector.extract_strided_slice %47 {offsets = [0, 512], sizes = [8, 256], strides = [1, 1]} : vector<8x768xf32> to vector<8x256xf32>
    %68 = arith.addf %50, %7 : vector<8x256xf32>
    %69 = arith.mulf %58, %68 : vector<8x256xf32>
    %70 = arith.addf %67, %69 : vector<8x256xf32>
    %71 = math.tanh %70 : vector<8x256xf32>
    %cst_23 = arith.constant 1.000000e+00 : f32
    %72 = vector.broadcast %cst_23 : f32 to vector<8x256xf32>
    %73 = arith.subf %72, %66 : vector<8x256xf32>
    %74 = arith.mulf %73, %71 : vector<8x256xf32>
    %75 = arith.mulf %66, %40 : vector<8x256xf32>
    %76 = arith.addf %74, %75 : vector<8x256xf32>
    %77 = arith.index_cast %c1_i32 : i32 to index
    %c0_24 = arith.constant 0 : index
    %c0_25 = arith.constant 0 : index
    %78 = vector.load %arg6[%77, %c0_24, %c0_25] : memref<8x8x256xf32, #tpu.memory_space<vmem>>, vector<1x8x256xf32>
    %79 = vector.shape_cast %78 : vector<1x8x256xf32> to vector<8x256xf32>
    %80 = vector.shape_cast %76 : vector<8x256xf32> to vector<1x8x256xf32>
    tpu.vector_store %arg6[%77, %c0_24, %c0_25], %80 {strides = array<i32>} : memref<8x8x256xf32, #tpu.memory_space<vmem>>, vector<1x8x256xf32>,
    %c2_i32 = arith.constant 2 : i32
    %81 = arith.index_cast %c2_i32 : i32 to index
    %c0_26 = arith.constant 0 : index
    %c0_27 = arith.constant 0 : index
    %82 = vector.load %arg2[%81, %c0_26, %c0_27] : memref<8x8x768xf32, #tpu.memory_space<vmem>>, vector<1x8x768xf32>
    %83 = vector.shape_cast %82 : vector<1x8x768xf32> to vector<8x768xf32>
    %84 = arith.truncf %76 : vector<8x256xf32> to vector<8x256xbf16>
    %cst_28 = arith.constant dense<0.000000e+00> : vector<8x512xf32>
    %85 = tpu.matmul %84, %3, %cst_28 {dimension_numbers = #tpu.dot_dimension_numbers<[1], [0], [0], [1], [0, 0, 1, 1], [], []>} : vector<8x256xbf16>, vector<256x512xbf16>, vector<8x512xf32> -> vector<8x512xf32>
    %cst_29 = arith.constant dense<0.000000e+00> : vector<8x256xf32>
    %86 = tpu.matmul %84, %4, %cst_29 {dimension_numbers = #tpu.dot_dimension_numbers<[1], [0], [0], [1], [0, 0, 1, 1], [], []>} : vector<8x256xbf16>, vector<256x256xbf16>, vector<8x256xf32> -> vector<8x256xf32>
    %87 = vector.extract_strided_slice %83 {offsets = [0, 0], sizes = [8, 256], strides = [1, 1]} : vector<8x768xf32> to vector<8x256xf32>
    %88 = vector.extract_strided_slice %85 {offsets = [0, 0], sizes = [8, 256], strides = [1, 1]} : vector<8x512xf32> to vector<8x256xf32>
    %89 = arith.addf %87, %88 : vector<8x256xf32>
    %90 = arith.negf %89 : vector<8x256xf32>
    %91 = math.exp %90 : vector<8x256xf32>
    %cst_30 = arith.constant 1.000000e+00 : f32
    %92 = vector.broadcast %cst_30 : f32 to vector<8x256xf32>
    %93 = arith.addf %92, %91 : vector<8x256xf32>
    %94 = arith.divf %92, %93 : vector<8x256xf32>
    %95 = vector.extract_strided_slice %83 {offsets = [0, 256], sizes = [8, 256], strides = [1, 1]} : vector<8x768xf32> to vector<8x256xf32>
    %96 = vector.extract_strided_slice %85 {offsets = [0, 256], sizes = [8, 256], strides = [1, 1]} : vector<8x512xf32> to vector<8x256xf32>
    %97 = arith.addf %95, %96 : vector<8x256xf32>
    %98 = arith.negf %97 : vector<8x256xf32>
    %99 = math.exp %98 : vector<8x256xf32>
    %cst_31 = arith.constant 1.000000e+00 : f32
    %100 = vector.broadcast %cst_31 : f32 to vector<8x256xf32>
    %101 = arith.addf %100, %99 : vector<8x256xf32>
    %102 = arith.divf %100, %101 : vector<8x256xf32>
    %103 = vector.extract_strided_slice %83 {offsets = [0, 512], sizes = [8, 256], strides = [1, 1]} : vector<8x768xf32> to vector<8x256xf32>
    %104 = arith.addf %86, %7 : vector<8x256xf32>
    %105 = arith.mulf %94, %104 : vector<8x256xf32>
    %106 = arith.addf %103, %105 : vector<8x256xf32>
    %107 = math.tanh %106 : vector<8x256xf32>
    %cst_32 = arith.constant 1.000000e+00 : f32
    %108 = vector.broadcast %cst_32 : f32 to vector<8x256xf32>
    %109 = arith.subf %108, %102 : vector<8x256xf32>
    %110 = arith.mulf %109, %107 : vector<8x256xf32>
    %111 = arith.mulf %102, %76 : vector<8x256xf32>
    %112 = arith.addf %110, %111 : vector<8x256xf32>
    %113 = arith.index_cast %c2_i32 : i32 to index
    %c0_33 = arith.constant 0 : index
    %c0_34 = arith.constant 0 : index
    %114 = vector.load %arg6[%113, %c0_33, %c0_34] : memref<8x8x256xf32, #tpu.memory_space<vmem>>, vector<1x8x256xf32>
    %115 = vector.shape_cast %114 : vector<1x8x256xf32> to vector<8x256xf32>
    %116 = vector.shape_cast %112 : vector<8x256xf32> to vector<1x8x256xf32>
    tpu.vector_store %arg6[%113, %c0_33, %c0_34], %116 {strides = array<i32>} : memref<8x8x256xf32, #tpu.memory_space<vmem>>, vector<1x8x256xf32>,
    %c3_i32 = arith.constant 3 : i32
    %117 = arith.index_cast %c3_i32 : i32 to index
    %c0_35 = arith.constant 0 : index
    %c0_36 = arith.constant 0 : index
    %118 = vector.load %arg2[%117, %c0_35, %c0_36] : memref<8x8x768xf32, #tpu.memory_space<vmem>>, vector<1x8x768xf32>
    %119 = vector.shape_cast %118 : vector<1x8x768xf32> to vector<8x768xf32>
    %120 = arith.truncf %112 : vector<8x256xf32> to vector<8x256xbf16>
    %cst_37 = arith.constant dense<0.000000e+00> : vector<8x512xf32>
    %121 = tpu.matmul %120, %3, %cst_37 {dimension_numbers = #tpu.dot_dimension_numbers<[1], [0], [0], [1], [0, 0, 1, 1], [], []>} : vector<8x256xbf16>, vector<256x512xbf16>, vector<8x512xf32> -> vector<8x512xf32>
    %cst_38 = arith.constant dense<0.000000e+00> : vector<8x256xf32>
    %122 = tpu.matmul %120, %4, %cst_38 {dimension_numbers = #tpu.dot_dimension_numbers<[1], [0], [0], [1], [0, 0, 1, 1], [], []>} : vector<8x256xbf16>, vector<256x256xbf16>, vector<8x256xf32> -> vector<8x256xf32>
    %123 = vector.extract_strided_slice %119 {offsets = [0, 0], sizes = [8, 256], strides = [1, 1]} : vector<8x768xf32> to vector<8x256xf32>
    %124 = vector.extract_strided_slice %121 {offsets = [0, 0], sizes = [8, 256], strides = [1, 1]} : vector<8x512xf32> to vector<8x256xf32>
    %125 = arith.addf %123, %124 : vector<8x256xf32>
    %126 = arith.negf %125 : vector<8x256xf32>
    %127 = math.exp %126 : vector<8x256xf32>
    %cst_39 = arith.constant 1.000000e+00 : f32
    %128 = vector.broadcast %cst_39 : f32 to vector<8x256xf32>
    %129 = arith.addf %128, %127 : vector<8x256xf32>
    %130 = arith.divf %128, %129 : vector<8x256xf32>
    %131 = vector.extract_strided_slice %119 {offsets = [0, 256], sizes = [8, 256], strides = [1, 1]} : vector<8x768xf32> to vector<8x256xf32>
    %132 = vector.extract_strided_slice %121 {offsets = [0, 256], sizes = [8, 256], strides = [1, 1]} : vector<8x512xf32> to vector<8x256xf32>
    %133 = arith.addf %131, %132 : vector<8x256xf32>
    %134 = arith.negf %133 : vector<8x256xf32>
    %135 = math.exp %134 : vector<8x256xf32>
    %cst_40 = arith.constant 1.000000e+00 : f32
    %136 = vector.broadcast %cst_40 : f32 to vector<8x256xf32>
    %137 = arith.addf %136, %135 : vector<8x256xf32>
    %138 = arith.divf %136, %137 : vector<8x256xf32>
    %139 = vector.extract_strided_slice %119 {offsets = [0, 512], sizes = [8, 256], strides = [1, 1]} : vector<8x768xf32> to vector<8x256xf32>
    %140 = arith.addf %122, %7 : vector<8x256xf32>
    %141 = arith.mulf %130, %140 : vector<8x256xf32>
    %142 = arith.addf %139, %141 : vector<8x256xf32>
    %143 = math.tanh %142 : vector<8x256xf32>
    %cst_41 = arith.constant 1.000000e+00 : f32
    %144 = vector.broadcast %cst_41 : f32 to vector<8x256xf32>
    %145 = arith.subf %144, %138 : vector<8x256xf32>
    %146 = arith.mulf %145, %143 : vector<8x256xf32>
    %147 = arith.mulf %138, %112 : vector<8x256xf32>
    %148 = arith.addf %146, %147 : vector<8x256xf32>
    %149 = arith.index_cast %c3_i32 : i32 to index
    %c0_42 = arith.constant 0 : index
    %c0_43 = arith.constant 0 : index
    %150 = vector.load %arg6[%149, %c0_42, %c0_43] : memref<8x8x256xf32, #tpu.memory_space<vmem>>, vector<1x8x256xf32>
    %151 = vector.shape_cast %150 : vector<1x8x256xf32> to vector<8x256xf32>
    %152 = vector.shape_cast %148 : vector<8x256xf32> to vector<1x8x256xf32>
    tpu.vector_store %arg6[%149, %c0_42, %c0_43], %152 {strides = array<i32>} : memref<8x8x256xf32, #tpu.memory_space<vmem>>, vector<1x8x256xf32>,
    %c4_i32 = arith.constant 4 : i32
    %153 = arith.index_cast %c4_i32 : i32 to index
    %c0_44 = arith.constant 0 : index
    %c0_45 = arith.constant 0 : index
    %154 = vector.load %arg2[%153, %c0_44, %c0_45] : memref<8x8x768xf32, #tpu.memory_space<vmem>>, vector<1x8x768xf32>
    %155 = vector.shape_cast %154 : vector<1x8x768xf32> to vector<8x768xf32>
    %156 = arith.truncf %148 : vector<8x256xf32> to vector<8x256xbf16>
    %cst_46 = arith.constant dense<0.000000e+00> : vector<8x512xf32>
    %157 = tpu.matmul %156, %3, %cst_46 {dimension_numbers = #tpu.dot_dimension_numbers<[1], [0], [0], [1], [0, 0, 1, 1], [], []>} : vector<8x256xbf16>, vector<256x512xbf16>, vector<8x512xf32> -> vector<8x512xf32>
    %cst_47 = arith.constant dense<0.000000e+00> : vector<8x256xf32>
    %158 = tpu.matmul %156, %4, %cst_47 {dimension_numbers = #tpu.dot_dimension_numbers<[1], [0], [0], [1], [0, 0, 1, 1], [], []>} : vector<8x256xbf16>, vector<256x256xbf16>, vector<8x256xf32> -> vector<8x256xf32>
    %159 = vector.extract_strided_slice %155 {offsets = [0, 0], sizes = [8, 256], strides = [1, 1]} : vector<8x768xf32> to vector<8x256xf32>
    %160 = vector.extract_strided_slice %157 {offsets = [0, 0], sizes = [8, 256], strides = [1, 1]} : vector<8x512xf32> to vector<8x256xf32>
    %161 = arith.addf %159, %160 : vector<8x256xf32>
    %162 = arith.negf %161 : vector<8x256xf32>
    %163 = math.exp %162 : vector<8x256xf32>
    %cst_48 = arith.constant 1.000000e+00 : f32
    %164 = vector.broadcast %cst_48 : f32 to vector<8x256xf32>
    %165 = arith.addf %164, %163 : vector<8x256xf32>
    %166 = arith.divf %164, %165 : vector<8x256xf32>
    %167 = vector.extract_strided_slice %155 {offsets = [0, 256], sizes = [8, 256], strides = [1, 1]} : vector<8x768xf32> to vector<8x256xf32>
    %168 = vector.extract_strided_slice %157 {offsets = [0, 256], sizes = [8, 256], strides = [1, 1]} : vector<8x512xf32> to vector<8x256xf32>
    %169 = arith.addf %167, %168 : vector<8x256xf32>
    %170 = arith.negf %169 : vector<8x256xf32>
    %171 = math.exp %170 : vector<8x256xf32>
    %cst_49 = arith.constant 1.000000e+00 : f32
    %172 = vector.broadcast %cst_49 : f32 to vector<8x256xf32>
    %173 = arith.addf %172, %171 : vector<8x256xf32>
    %174 = arith.divf %172, %173 : vector<8x256xf32>
    %175 = vector.extract_strided_slice %155 {offsets = [0, 512], sizes = [8, 256], strides = [1, 1]} : vector<8x768xf32> to vector<8x256xf32>
    %176 = arith.addf %158, %7 : vector<8x256xf32>
    %177 = arith.mulf %166, %176 : vector<8x256xf32>
    %178 = arith.addf %175, %177 : vector<8x256xf32>
    %179 = math.tanh %178 : vector<8x256xf32>
    %cst_50 = arith.constant 1.000000e+00 : f32
    %180 = vector.broadcast %cst_50 : f32 to vector<8x256xf32>
    %181 = arith.subf %180, %174 : vector<8x256xf32>
    %182 = arith.mulf %181, %179 : vector<8x256xf32>
    %183 = arith.mulf %174, %148 : vector<8x256xf32>
    %184 = arith.addf %182, %183 : vector<8x256xf32>
    %185 = arith.index_cast %c4_i32 : i32 to index
    %c0_51 = arith.constant 0 : index
    %c0_52 = arith.constant 0 : index
    %186 = vector.load %arg6[%185, %c0_51, %c0_52] : memref<8x8x256xf32, #tpu.memory_space<vmem>>, vector<1x8x256xf32>
    %187 = vector.shape_cast %186 : vector<1x8x256xf32> to vector<8x256xf32>
    %188 = vector.shape_cast %184 : vector<8x256xf32> to vector<1x8x256xf32>
    tpu.vector_store %arg6[%185, %c0_51, %c0_52], %188 {strides = array<i32>} : memref<8x8x256xf32, #tpu.memory_space<vmem>>, vector<1x8x256xf32>,
    %c5_i32 = arith.constant 5 : i32
    %189 = arith.index_cast %c5_i32 : i32 to index
    %c0_53 = arith.constant 0 : index
    %c0_54 = arith.constant 0 : index
    %190 = vector.load %arg2[%189, %c0_53, %c0_54] : memref<8x8x768xf32, #tpu.memory_space<vmem>>, vector<1x8x768xf32>
    %191 = vector.shape_cast %190 : vector<1x8x768xf32> to vector<8x768xf32>
    %192 = arith.truncf %184 : vector<8x256xf32> to vector<8x256xbf16>
    %cst_55 = arith.constant dense<0.000000e+00> : vector<8x512xf32>
    %193 = tpu.matmul %192, %3, %cst_55 {dimension_numbers = #tpu.dot_dimension_numbers<[1], [0], [0], [1], [0, 0, 1, 1], [], []>} : vector<8x256xbf16>, vector<256x512xbf16>, vector<8x512xf32> -> vector<8x512xf32>
    %cst_56 = arith.constant dense<0.000000e+00> : vector<8x256xf32>
    %194 = tpu.matmul %192, %4, %cst_56 {dimension_numbers = #tpu.dot_dimension_numbers<[1], [0], [0], [1], [0, 0, 1, 1], [], []>} : vector<8x256xbf16>, vector<256x256xbf16>, vector<8x256xf32> -> vector<8x256xf32>
    %195 = vector.extract_strided_slice %191 {offsets = [0, 0], sizes = [8, 256], strides = [1, 1]} : vector<8x768xf32> to vector<8x256xf32>
    %196 = vector.extract_strided_slice %193 {offsets = [0, 0], sizes = [8, 256], strides = [1, 1]} : vector<8x512xf32> to vector<8x256xf32>
    %197 = arith.addf %195, %196 : vector<8x256xf32>
    %198 = arith.negf %197 : vector<8x256xf32>
    %199 = math.exp %198 : vector<8x256xf32>
    %cst_57 = arith.constant 1.000000e+00 : f32
    %200 = vector.broadcast %cst_57 : f32 to vector<8x256xf32>
    %201 = arith.addf %200, %199 : vector<8x256xf32>
    %202 = arith.divf %200, %201 : vector<8x256xf32>
    %203 = vector.extract_strided_slice %191 {offsets = [0, 256], sizes = [8, 256], strides = [1, 1]} : vector<8x768xf32> to vector<8x256xf32>
    %204 = vector.extract_strided_slice %193 {offsets = [0, 256], sizes = [8, 256], strides = [1, 1]} : vector<8x512xf32> to vector<8x256xf32>
    %205 = arith.addf %203, %204 : vector<8x256xf32>
    %206 = arith.negf %205 : vector<8x256xf32>
    %207 = math.exp %206 : vector<8x256xf32>
    %cst_58 = arith.constant 1.000000e+00 : f32
    %208 = vector.broadcast %cst_58 : f32 to vector<8x256xf32>
    %209 = arith.addf %208, %207 : vector<8x256xf32>
    %210 = arith.divf %208, %209 : vector<8x256xf32>
    %211 = vector.extract_strided_slice %191 {offsets = [0, 512], sizes = [8, 256], strides = [1, 1]} : vector<8x768xf32> to vector<8x256xf32>
    %212 = arith.addf %194, %7 : vector<8x256xf32>
    %213 = arith.mulf %202, %212 : vector<8x256xf32>
    %214 = arith.addf %211, %213 : vector<8x256xf32>
    %215 = math.tanh %214 : vector<8x256xf32>
    %cst_59 = arith.constant 1.000000e+00 : f32
    %216 = vector.broadcast %cst_59 : f32 to vector<8x256xf32>
    %217 = arith.subf %216, %210 : vector<8x256xf32>
    %218 = arith.mulf %217, %215 : vector<8x256xf32>
    %219 = arith.mulf %210, %184 : vector<8x256xf32>
    %220 = arith.addf %218, %219 : vector<8x256xf32>
    %221 = arith.index_cast %c5_i32 : i32 to index
    %c0_60 = arith.constant 0 : index
    %c0_61 = arith.constant 0 : index
    %222 = vector.load %arg6[%221, %c0_60, %c0_61] : memref<8x8x256xf32, #tpu.memory_space<vmem>>, vector<1x8x256xf32>
    %223 = vector.shape_cast %222 : vector<1x8x256xf32> to vector<8x256xf32>
    %224 = vector.shape_cast %220 : vector<8x256xf32> to vector<1x8x256xf32>
    tpu.vector_store %arg6[%221, %c0_60, %c0_61], %224 {strides = array<i32>} : memref<8x8x256xf32, #tpu.memory_space<vmem>>, vector<1x8x256xf32>,
    %c6_i32 = arith.constant 6 : i32
    %225 = arith.index_cast %c6_i32 : i32 to index
    %c0_62 = arith.constant 0 : index
    %c0_63 = arith.constant 0 : index
    %226 = vector.load %arg2[%225, %c0_62, %c0_63] : memref<8x8x768xf32, #tpu.memory_space<vmem>>, vector<1x8x768xf32>
    %227 = vector.shape_cast %226 : vector<1x8x768xf32> to vector<8x768xf32>
    %228 = arith.truncf %220 : vector<8x256xf32> to vector<8x256xbf16>
    %cst_64 = arith.constant dense<0.000000e+00> : vector<8x512xf32>
    %229 = tpu.matmul %228, %3, %cst_64 {dimension_numbers = #tpu.dot_dimension_numbers<[1], [0], [0], [1], [0, 0, 1, 1], [], []>} : vector<8x256xbf16>, vector<256x512xbf16>, vector<8x512xf32> -> vector<8x512xf32>
    %cst_65 = arith.constant dense<0.000000e+00> : vector<8x256xf32>
    %230 = tpu.matmul %228, %4, %cst_65 {dimension_numbers = #tpu.dot_dimension_numbers<[1], [0], [0], [1], [0, 0, 1, 1], [], []>} : vector<8x256xbf16>, vector<256x256xbf16>, vector<8x256xf32> -> vector<8x256xf32>
    %231 = vector.extract_strided_slice %227 {offsets = [0, 0], sizes = [8, 256], strides = [1, 1]} : vector<8x768xf32> to vector<8x256xf32>
    %232 = vector.extract_strided_slice %229 {offsets = [0, 0], sizes = [8, 256], strides = [1, 1]} : vector<8x512xf32> to vector<8x256xf32>
    %233 = arith.addf %231, %232 : vector<8x256xf32>
    %234 = arith.negf %233 : vector<8x256xf32>
    %235 = math.exp %234 : vector<8x256xf32>
    %cst_66 = arith.constant 1.000000e+00 : f32
    %236 = vector.broadcast %cst_66 : f32 to vector<8x256xf32>
    %237 = arith.addf %236, %235 : vector<8x256xf32>
    %238 = arith.divf %236, %237 : vector<8x256xf32>
    %239 = vector.extract_strided_slice %227 {offsets = [0, 256], sizes = [8, 256], strides = [1, 1]} : vector<8x768xf32> to vector<8x256xf32>
    %240 = vector.extract_strided_slice %229 {offsets = [0, 256], sizes = [8, 256], strides = [1, 1]} : vector<8x512xf32> to vector<8x256xf32>
    %241 = arith.addf %239, %240 : vector<8x256xf32>
    %242 = arith.negf %241 : vector<8x256xf32>
    %243 = math.exp %242 : vector<8x256xf32>
    %cst_67 = arith.constant 1.000000e+00 : f32
    %244 = vector.broadcast %cst_67 : f32 to vector<8x256xf32>
    %245 = arith.addf %244, %243 : vector<8x256xf32>
    %246 = arith.divf %244, %245 : vector<8x256xf32>
    %247 = vector.extract_strided_slice %227 {offsets = [0, 512], sizes = [8, 256], strides = [1, 1]} : vector<8x768xf32> to vector<8x256xf32>
    %248 = arith.addf %230, %7 : vector<8x256xf32>
    %249 = arith.mulf %238, %248 : vector<8x256xf32>
    %250 = arith.addf %247, %249 : vector<8x256xf32>
    %251 = math.tanh %250 : vector<8x256xf32>
    %cst_68 = arith.constant 1.000000e+00 : f32
    %252 = vector.broadcast %cst_68 : f32 to vector<8x256xf32>
    %253 = arith.subf %252, %246 : vector<8x256xf32>
    %254 = arith.mulf %253, %251 : vector<8x256xf32>
    %255 = arith.mulf %246, %220 : vector<8x256xf32>
    %256 = arith.addf %254, %255 : vector<8x256xf32>
    %257 = arith.index_cast %c6_i32 : i32 to index
    %c0_69 = arith.constant 0 : index
    %c0_70 = arith.constant 0 : index
    %258 = vector.load %arg6[%257, %c0_69, %c0_70] : memref<8x8x256xf32, #tpu.memory_space<vmem>>, vector<1x8x256xf32>
    %259 = vector.shape_cast %258 : vector<1x8x256xf32> to vector<8x256xf32>
    %260 = vector.shape_cast %256 : vector<8x256xf32> to vector<1x8x256xf32>
    tpu.vector_store %arg6[%257, %c0_69, %c0_70], %260 {strides = array<i32>} : memref<8x8x256xf32, #tpu.memory_space<vmem>>, vector<1x8x256xf32>,
    %c7_i32 = arith.constant 7 : i32
    %261 = arith.index_cast %c7_i32 : i32 to index
    %c0_71 = arith.constant 0 : index
    %c0_72 = arith.constant 0 : index
    %262 = vector.load %arg2[%261, %c0_71, %c0_72] : memref<8x8x768xf32, #tpu.memory_space<vmem>>, vector<1x8x768xf32>
    %263 = vector.shape_cast %262 : vector<1x8x768xf32> to vector<8x768xf32>
    %264 = arith.truncf %256 : vector<8x256xf32> to vector<8x256xbf16>
    %cst_73 = arith.constant dense<0.000000e+00> : vector<8x512xf32>
    %265 = tpu.matmul %264, %3, %cst_73 {dimension_numbers = #tpu.dot_dimension_numbers<[1], [0], [0], [1], [0, 0, 1, 1], [], []>} : vector<8x256xbf16>, vector<256x512xbf16>, vector<8x512xf32> -> vector<8x512xf32>
    %cst_74 = arith.constant dense<0.000000e+00> : vector<8x256xf32>
    %266 = tpu.matmul %264, %4, %cst_74 {dimension_numbers = #tpu.dot_dimension_numbers<[1], [0], [0], [1], [0, 0, 1, 1], [], []>} : vector<8x256xbf16>, vector<256x256xbf16>, vector<8x256xf32> -> vector<8x256xf32>
    %267 = vector.extract_strided_slice %263 {offsets = [0, 0], sizes = [8, 256], strides = [1, 1]} : vector<8x768xf32> to vector<8x256xf32>
    %268 = vector.extract_strided_slice %265 {offsets = [0, 0], sizes = [8, 256], strides = [1, 1]} : vector<8x512xf32> to vector<8x256xf32>
    %269 = arith.addf %267, %268 : vector<8x256xf32>
    %270 = arith.negf %269 : vector<8x256xf32>
    %271 = math.exp %270 : vector<8x256xf32>
    %cst_75 = arith.constant 1.000000e+00 : f32
    %272 = vector.broadcast %cst_75 : f32 to vector<8x256xf32>
    %273 = arith.addf %272, %271 : vector<8x256xf32>
    %274 = arith.divf %272, %273 : vector<8x256xf32>
    %275 = vector.extract_strided_slice %263 {offsets = [0, 256], sizes = [8, 256], strides = [1, 1]} : vector<8x768xf32> to vector<8x256xf32>
    %276 = vector.extract_strided_slice %265 {offsets = [0, 256], sizes = [8, 256], strides = [1, 1]} : vector<8x512xf32> to vector<8x256xf32>
    %277 = arith.addf %275, %276 : vector<8x256xf32>
    %278 = arith.negf %277 : vector<8x256xf32>
    %279 = math.exp %278 : vector<8x256xf32>
    %cst_76 = arith.constant 1.000000e+00 : f32
    %280 = vector.broadcast %cst_76 : f32 to vector<8x256xf32>
    %281 = arith.addf %280, %279 : vector<8x256xf32>
    %282 = arith.divf %280, %281 : vector<8x256xf32>
    %283 = vector.extract_strided_slice %263 {offsets = [0, 512], sizes = [8, 256], strides = [1, 1]} : vector<8x768xf32> to vector<8x256xf32>
    %284 = arith.addf %266, %7 : vector<8x256xf32>
    %285 = arith.mulf %274, %284 : vector<8x256xf32>
    %286 = arith.addf %283, %285 : vector<8x256xf32>
    %287 = math.tanh %286 : vector<8x256xf32>
    %cst_77 = arith.constant 1.000000e+00 : f32
    %288 = vector.broadcast %cst_77 : f32 to vector<8x256xf32>
    %289 = arith.subf %288, %282 : vector<8x256xf32>
    %290 = arith.mulf %289, %287 : vector<8x256xf32>
    %291 = arith.mulf %282, %256 : vector<8x256xf32>
    %292 = arith.addf %290, %291 : vector<8x256xf32>
    %293 = arith.index_cast %c7_i32 : i32 to index
    %c0_78 = arith.constant 0 : index
    %c0_79 = arith.constant 0 : index
    %294 = vector.load %arg6[%293, %c0_78, %c0_79] : memref<8x8x256xf32, #tpu.memory_space<vmem>>, vector<1x8x256xf32>
    %295 = vector.shape_cast %294 : vector<1x8x256xf32> to vector<8x256xf32>
    %296 = vector.shape_cast %292 : vector<8x256xf32> to vector<1x8x256xf32>
    tpu.vector_store %arg6[%293, %c0_78, %c0_79], %296 {strides = array<i32>} : memref<8x8x256xf32, #tpu.memory_space<vmem>>, vector<1x8x256xf32>,
    %c8_i32 = arith.constant 8 : i32
    %c0_80 = arith.constant 0 : index
    %c0_81 = arith.constant 0 : index
    %297 = vector.load %arg7[%c0_80, %c0_81] : memref<8x256xf32, #tpu.memory_space<vmem>>, vector<8x256xf32>
    tpu.vector_store %arg7[%c0_80, %c0_81], %292 {strides = array<i32>} : memref<8x256xf32, #tpu.memory_space<vmem>>, vector<8x256xf32>,
    return
  }
  func.func @transform_0(%arg0: i32, %arg1: i32) -> (i32, i32, i32) {
    %c0_i32 = arith.constant 0 : i32
    %c0_i32_0 = arith.constant 0 : i32
    return %arg1, %arg0, %c0_i32 : i32, i32, i32
  }
  func.func @transform_1(%arg0: i32, %arg1: i32) -> (i32, i32) {
    %c0_i32 = arith.constant 0 : i32
    %c0_i32_0 = arith.constant 0 : i32
    %c0_i32_1 = arith.constant 0 : i32
    return %c0_i32, %c0_i32_0 : i32, i32
  }
  func.func @transform_2(%arg0: i32, %arg1: i32) -> (i32, i32) {
    %c0_i32 = arith.constant 0 : i32
    %c0_i32_0 = arith.constant 0 : i32
    %c0_i32_1 = arith.constant 0 : i32
    return %c0_i32, %c0_i32_0 : i32, i32
  }
  func.func @transform_3(%arg0: i32, %arg1: i32) -> (i32, i32) {
    %c0_i32 = arith.constant 0 : i32
    %c0_i32_0 = arith.constant 0 : i32
    %c0_i32_1 = arith.constant 0 : i32
    return %c0_i32, %c0_i32_0 : i32, i32
  }
  func.func @transform_4(%arg0: i32, %arg1: i32) -> (i32, i32, i32) {
    %c0_i32 = arith.constant 0 : i32
    %c0_i32_0 = arith.constant 0 : i32
    return %arg1, %arg0, %c0_i32 : i32, i32, i32
  }
}

</mosaic_0001>

<bundles_post_ra>
// kernel: tpu_custom_call.1
= control target key start
LH: loop header
LB: loop body
LE: loop exit
PB: predicated region body
PF: predicated region fallthrough
CT: control target
= control target key end

     0   :  { %9 = vsyncpa [#allocation4], 0  ;;  %s4068_s0 = inlined_call_operand.hbm [shape: f32[8,8,768], index: 0, kind: input, shape index: {}]   ;;  %s4069_s1 = inlined_call_operand.hbm [shape: bf16[256,512], index: 1, kind: input, shape index: {}]   ;;  %s4070_s2 = inlined_call_operand.hbm [shape: bf16[256,256], index: 2, kind: input, shape index: {}]   ;;  %s4071_s3 = inlined_call_operand.vmem [shape: f32[1,256], index: 3, kind: input, shape index: {}]   ;;  %s4072_s4 = inlined_call_operand.hbm [shape: f32[8,8,256], index: 4, kind: output, shape index: {}]  }
   0x1   :  { %10 = vsyncpa [#allocation7], 0 }
   0x2   :  { %11 = vsyncpa [#allocation5], 0  ;;  %s2791_s15 = smov [#allocation6]  }
   0x3   :  { %s29_s16 = sshll.u32 %s2791_s15, 4  ;;  %s30_s16 = int_to_ptr.vmem [resolvable:$true] %s29_s16 }
   0x4   :  { %s2713_s17 = scalar_lea.vmem %s30_s16, 8192  ;;  %p2718_p1 = scmp.lt.s32.totalorder %s30_s16, %s30_s16 }
   0x5   :  { %p2714_p0 = scmp.ne.s32.totalorder %s30_s16, %s2713_s17  ;;  %p2719_p2 = scmp.lt.s32.totalorder %s2713_s17, %s2713_s17 }
   0x7   :  { %p2720_p3 = por %p2719_p2, %p2718_p1 }
   0x9   :  { %p2721_p4 = pnand %p2720_p3, %p2714_p0 }
   0xb   :  { %2724 = shalt.err (!%p2721_p4)
}
   0xc   :  { %s2792_s18 = smov 256   ;;  %s2793_s19 = smov 16  }
   0xd   :  { %35 = dma.hbm_to_vmem [thread:$0]  %s4069_s1, 8192, %s30_s16, [#allocation7], %s2792_s18, %s2792_s18, %s2793_s19  }
   0xe   :  { %s2794_s22 = smov [#allocation3]  }
   0xf   :  { %s17_s23 = sshll.u32 %s2794_s22, 4  ;;  %s18_s23 = int_to_ptr.vmem [resolvable:$true] %s17_s23 }
  0x10   :  { %s2733_s24 = scalar_lea.vmem %s18_s23, 6144  ;;  %p2738_p6 = scmp.lt.s32.totalorder %s18_s23, %s18_s23 }
  0x11   :  { %p2734_p5 = scmp.ne.s32.totalorder %s18_s23, %s2733_s24  ;;  %p2739_p7 = scmp.lt.s32.totalorder %s2733_s24, %s2733_s24 }
  0x13   :  { %p2740_p8 = por %p2739_p7, %p2738_p6 }
  0x15   :  { %p2741_p9 = pnand %p2740_p8, %p2734_p5 }
  0x17   :  { %2744 = shalt.err (!%p2741_p9)
}
  0x18   :  { %s2795_s25 = smov 768   ;;  %s2796_s26 = smov 48  }
  0x19   :  { %23 = dma.hbm_to_vmem [thread:$0]  %s4068_s0, 6144, %s18_s23, [#allocation4], %s2795_s25, %s2795_s25, %s2796_s26  }
  0x1a   :  { %s2797_s29 = smov [#allocation8]  }
  0x1b   :  { %s41_s30 = sshll.u32 %s2797_s29, 4  ;;  %s42_s30 = int_to_ptr.vmem [resolvable:$true] %s41_s30 }
  0x1c   :  { %s2753_s1 = scalar_lea.vmem %s42_s30, 4096  ;;  %p2758_p11 = scmp.lt.s32.totalorder %s42_s30, %s42_s30 }
  0x1d   :  { %p2754_p10 = scmp.ne.s32.totalorder %s42_s30, %s2753_s1  ;;  %p2759_p12 = scmp.lt.s32.totalorder %s2753_s1, %s2753_s1 }
  0x1f   :  { %p2760_p13 = por %p2759_p12, %p2758_p11 }
  0x21   :  { %p2761_p0 = pnand %p2760_p13, %p2754_p10 }
  0x23   :  { %2764 = shalt.err (!%p2761_p0)
}
  0x24   :  { %s2798_s5 = smov 128   ;;  %s2799_s6 = smov 8  }
  0x25   :  { %47 = dma.hbm_to_vmem [thread:$0]  %s4070_s2, 4096, %s42_s30, [#allocation7], %s2798_s5, %s2798_s5, %s2799_s6  }
  0x26   :  { %2785 = dma.done.wait [#allocation4], 6144  }
  0x27   :  { %2786 = vsyncadd [#allocation4], 4294961152 }
  0x28   :  { %2787 = dma.done.wait [#allocation7], 12288  }
  0x29   :  { %2788 = vsyncadd [#allocation7], 4294955008  ;;  %v4089_v0 = vmov 0.0|0.0   ;;  %v2841_v1 = vld [vmem:[#allocation6 + $0xe4] ss:$16 sps:$4 sm:$0xff]  }
  0x2a   :  { %535 = vmatprep.mubr.bf16.mxu0 %v4089_v0  ;;  %576 = vmatprep.mubr.bf16.mxu1 %v4089_v0  ;;  %v2843_v2 = vld [vmem:[#allocation6 + $0xe0] ss:$16 sps:$4 sm:$0xff]   ;;  %v2846_v3 = vld [vmem:[#allocation6 + $0xc4] ss:$16 sps:$4 sm:$0xff]   ;;  %v2869_v11 = vld [vmem:[#allocation6 + $0xec] ss:$16 sps:$4 sm:$0xff]  }
  0x2b   :  { %4290 = vst [vmem:[#allocation13_spill] sm:$0xff] %v2843_v2  ;;  %503 = vmatprep.subr.bf16.mxu0 %v2841_v1  ;;  %v2849_v4 = vld [vmem:[#allocation6 + $0xc0] ss:$16 sps:$4 sm:$0xff]   ;;  %v2852_v5 = vld [vmem:[#allocation6 + $0xa4] ss:$16 sps:$4 sm:$0xff]   ;;  %544 = vmatprep.subr.bf16.mxu1 %v2869_v11 }
  0x2c   :  { %504 = vmatpush1.bf16.msra.mxu0 %v2843_v2  ;;  %v2855_v6 = vld [vmem:[#allocation6 + $0xa0] ss:$16 sps:$4 sm:$0xff]   ;;  %v2858_v7 = vld [vmem:[#allocation6 + $0x84] ss:$16 sps:$4 sm:$0xff]   ;;  %v2871_v12 = vld [vmem:[#allocation6 + $0xe8] ss:$16 sps:$4 sm:$0xff]  }
  0x2d   :  { %505 = vmatprep.subr.bf16.mxu0 %v2846_v3  ;;  %v2861_v8 = vld [vmem:[#allocation6 + $0x80] ss:$16 sps:$4 sm:$0xff]   ;;  %v2864_v9 = vld [vmem:[#allocation6 + $0x64] ss:$16 sps:$4 sm:$0xff]   ;;  %545 = vmatpush1.bf16.msra.mxu1 %v2871_v12  ;;  %v2878_v14 = vld [vmem:[#allocation6 + $0xcc] ss:$16 sps:$4 sm:$0xff]  }
  0x2e   :  { %v2866_v10 = vld [vmem:[#allocation6 + $0x60] ss:$16 sps:$4 sm:$0xff]   ;;  %v2874_v13 = vld [vmem:[#allocation6 + $0x44] ss:$16 sps:$4 sm:$0xff]   ;;  %v2880_v15 = vld [vmem:[#allocation6 + $0xc8] ss:$16 sps:$4 sm:$0xff]   ;;  %546 = vmatprep.subr.bf16.mxu1 %v2878_v14 }
  0x2f   :  { %v2883_v16 = vld [vmem:[#allocation6 + $0x40] ss:$16 sps:$4 sm:$0xff]   ;;  %v2885_v17 = vld [vmem:[#allocation6 + $0x24] ss:$16 sps:$4 sm:$0xff]   ;;  %v2889_v18 = vld [vmem:[#allocation6 + $0xac] ss:$16 sps:$4 sm:$0xff]  }
  0x30   :  { %506 = vmatpush1.bf16.msra.mxu0 %v2849_v4  ;;  %v2892_v19 = vld [vmem:[#allocation6 + $0xa8] ss:$16 sps:$4 sm:$0xff]   ;;  %v2895_v20 = vld [vmem:[#allocation6 + $0x20] ss:$16 sps:$4 sm:$0xff]   ;;  %v2898_v21 = vld [vmem:[#allocation6 + $0x8c] ss:$16 sps:$4 sm:$0xff]  }
  0x31   :  { %507 = vmatprep.subr.bf16.mxu0 %v2852_v5  ;;  %547 = vmatpush1.bf16.msra.mxu1 %v2880_v15  ;;  %4291 = vst [vmem:[#allocation14_spill] sm:$0xff] %v2892_v19  ;;  %4292 = vst [vmem:[#allocation15_spill] sm:$0xff] %v2898_v21  ;;  %v2901_v22 = vld [vmem:[#allocation6 + $0x4] ss:$16 sps:$4 sm:$0xff]   ;;  %v2904_v23 = vld [vmem:[#allocation6 + $0x88] ss:$16 sps:$4 sm:$0xff]  }
  0x32   :  { %548 = vmatprep.subr.bf16.mxu1 %v2889_v18  ;;  %4293 = vst [vmem:[#allocation16_spill] sm:$0xff] %v2904_v23  ;;  %v2907_v24 = vld [vmem:[#allocation6] ss:$16 sps:$4 sm:$0xff]   ;;  %v2910_v25 = vld [vmem:[#allocation6 + $0x6c] ss:$16 sps:$4 sm:$0xff]  }
  0x33   :  { %4294 = vst [vmem:[#allocation17_spill] sm:$0xff] %v2910_v25  ;;  %v2913_v26 = vld [vmem:[#allocation6 + $0x1e4] ss:$16 sps:$4 sm:$0xff]   ;;  %v2916_v27 = vld [vmem:[#allocation6 + $0x68] ss:$16 sps:$4 sm:$0xff]  }
  0x34   :  { %508 = vmatpush1.bf16.msra.mxu0 %v2855_v6  ;;  %4295 = vst [vmem:[#allocation18_spill] sm:$0xff] %v2916_v27  ;;  %v2919_v28 = vld [vmem:[#allocation6 + $0x1e0] ss:$16 sps:$4 sm:$0xff]   ;;  %v2922_v29 = vld [vmem:[#allocation6 + $0x4c] ss:$16 sps:$4 sm:$0xff]  }
  0x35   :  { %509 = vmatprep.subr.bf16.mxu0 %v2858_v7  ;;  %549 = vmatpush1.bf16.msra.mxu1 %v2892_v19  ;;  %4296 = vst [vmem:[#allocation19_spill] sm:$0xff] %v2922_v29  ;;  %v2925_v30 = vld [vmem:[#allocation6 + $0x1c4] ss:$16 sps:$4 sm:$0xff]   ;;  %v2928_v31 = vld [vmem:[#allocation6 + $0x48] ss:$16 sps:$4 sm:$0xff]  }
  0x36   :  { %550 = vmatprep.subr.bf16.mxu1 %v2898_v21  ;;  %4297 = vst [vmem:[#allocation20_spill] sm:$0xff] %v2928_v31  ;;  %v2931_v32 = vld [vmem:[#allocation6 + $0x1c0] ss:$16 sps:$4 sm:$0xff]   ;;  %v2934_v33 = vld [vmem:[#allocation6 + $0x2c] ss:$16 sps:$4 sm:$0xff]  }
  0x37   :  { %4298 = vst [vmem:[#allocation21_spill] sm:$0xff] %v2934_v33  ;;  %v2937_v34 = vld [vmem:[#allocation6 + $0x1a4] ss:$16 sps:$4 sm:$0xff]   ;;  %v2940_v35 = vld [vmem:[#allocation6 + $0x28] ss:$16 sps:$4 sm:$0xff]  }
  0x38   :  { %510 = vmatpush1.bf16.msra.mxu0 %v2861_v8  ;;  %4299 = vst [vmem:[#allocation22_spill] sm:$0xff] %v2940_v35  ;;  %v2943_v36 = vld [vmem:[#allocation6 + $0x1a0] ss:$16 sps:$4 sm:$0xff]   ;;  %v2946_v37 = vld [vmem:[#allocation6 + $0xc] ss:$16 sps:$4 sm:$0xff]  }
  0x39   :  { %511 = vmatprep.subr.bf16.mxu0 %v2864_v9  ;;  %551 = vmatpush1.bf16.msra.mxu1 %v2904_v23  ;;  %4300 = vst [vmem:[#allocation23_spill] sm:$0xff] %v2946_v37  ;;  %v2949_v38 = vld [vmem:[#allocation6 + $0x184] ss:$16 sps:$4 sm:$0xff]   ;;  %v2952_v39 = vld [vmem:[#allocation6 + $0x8] ss:$16 sps:$4 sm:$0xff]  }
  0x3a   :  { %552 = vmatprep.subr.bf16.mxu1 %v2910_v25  ;;  %4301 = vst [vmem:[#allocation24_spill] sm:$0xff] %v2952_v39  ;;  %v2955_v40 = vld [vmem:[#allocation6 + $0x180] ss:$16 sps:$4 sm:$0xff]   ;;  %v2958_v41 = vld [vmem:[#allocation6 + $0x1ec] ss:$16 sps:$4 sm:$0xff]  }
  0x3b   :  { %4302 = vst [vmem:[#allocation25_spill] sm:$0xff] %v2958_v41  ;;  %v2961_v42 = vld [vmem:[#allocation6 + $0x164] ss:$16 sps:$4 sm:$0xff]   ;;  %v2964_v43 = vld [vmem:[#allocation6 + $0x1e8] ss:$16 sps:$4 sm:$0xff]  }
  0x3c   :  { %512 = vmatpush1.bf16.msra.mxu0 %v2866_v10  ;;  %4303 = vst [vmem:[#allocation26_spill] sm:$0xff] %v2964_v43  ;;  %v2967_v44 = vld [vmem:[#allocation6 + $0x160] ss:$16 sps:$4 sm:$0xff]   ;;  %v2970_v45 = vld [vmem:[#allocation6 + $0x1cc] ss:$16 sps:$4 sm:$0xff]  }
  0x3d   :  { %513 = vmatprep.subr.bf16.mxu0 %v2874_v13  ;;  %553 = vmatpush1.bf16.msra.mxu1 %v2916_v27  ;;  %4304 = vst [vmem:[#allocation27_spill] sm:$0xff] %v2970_v45  ;;  %v2973_v46 = vld [vmem:[#allocation6 + $0x144] ss:$16 sps:$4 sm:$0xff]   ;;  %v2976_v47 = vld [vmem:[#allocation6 + $0x1c8] ss:$16 sps:$4 sm:$0xff]  }
  0x3e   :  { %554 = vmatprep.subr.bf16.mxu1 %v2922_v29  ;;  %4305 = vst [vmem:[#allocation28_spill] sm:$0xff] %v2976_v47  ;;  %v2979_v48 = vld [vmem:[#allocation6 + $0x140] ss:$16 sps:$4 sm:$0xff]   ;;  %v2982_v49 = vld [vmem:[#allocation6 + $0x1ac] ss:$16 sps:$4 sm:$0xff]  }
  0x3f   :  { %4306 = vst [vmem:[#allocation29_spill] sm:$0xff] %v2982_v49  ;;  %v2985_v50 = vld [vmem:[#allocation6 + $0x124] ss:$16 sps:$4 sm:$0xff]   ;;  %v2988_v51 = vld [vmem:[#allocation6 + $0x1a8] ss:$16 sps:$4 sm:$0xff]  }
  0x40   :  { %514 = vmatpush1.bf16.msra.mxu0 %v2883_v16  ;;  %4307 = vst [vmem:[#allocation30_spill] sm:$0xff] %v2988_v51  ;;  %v2991_v52 = vld [vmem:[#allocation6 + $0x120] ss:$16 sps:$4 sm:$0xff]   ;;  %v2994_v53 = vld [vmem:[#allocation6 + $0x18c] ss:$16 sps:$4 sm:$0xff]  }
  0x41   :  { %515 = vmatprep.subr.bf16.mxu0 %v2885_v17  ;;  %555 = vmatpush1.bf16.msra.mxu1 %v2928_v31  ;;  %4308 = vst [vmem:[#allocation31_spill] sm:$0xff] %v2994_v53  ;;  %v2997_v54 = vld [vmem:[#allocation6 + $0x104] ss:$16 sps:$4 sm:$0xff]   ;;  %v3000_v55 = vld [vmem:[#allocation6 + $0x188] ss:$16 sps:$4 sm:$0xff]  }
  0x42   :  { %556 = vmatprep.subr.bf16.mxu1 %v2934_v33  ;;  %4309 = vst [vmem:[#allocation32_spill] sm:$0xff] %v3000_v55  ;;  %v3003_v56 = vld [vmem:[#allocation6 + $0x100] ss:$16 sps:$4 sm:$0xff]   ;;  %v3006_v57 = vld [vmem:[#allocation6 + $0x16c] ss:$16 sps:$4 sm:$0xff]  }
  0x43   :  { %4310 = vst [vmem:[#allocation33_spill] sm:$0xff] %v3006_v57  ;;  %v3009_v58 = vld [vmem:[#allocation8 + $0x74] ss:$8 sps:$4 sm:$0xff]   ;;  %v3012_v59 = vld [vmem:[#allocation6 + $0x168] ss:$16 sps:$4 sm:$0xff]  }
  0x44   :  { %516 = vmatpush1.bf16.msra.mxu0 %v2895_v20  ;;  %4311 = vst [vmem:[#allocation34_spill] sm:$0xff] %v3012_v59  ;;  %v3015_v60 = vld [vmem:[#allocation8 + $0x70] ss:$8 sps:$4 sm:$0xff]   ;;  %v3018_v61 = vld [vmem:[#allocation6 + $0x14c] ss:$16 sps:$4 sm:$0xff]  }
  0x45   :  { %517 = vmatprep.subr.bf16.mxu0 %v2901_v22  ;;  %557 = vmatpush1.bf16.msra.mxu1 %v2940_v35  ;;  %4312 = vst [vmem:[#allocation35_spill] sm:$0xff] %v3015_v60  ;;  %4313 = vst [vmem:[#allocation36_spill] sm:$0xff] %v3018_v61  ;;  %v3021_v62 = vld [vmem:[#allocation8 + $0x64] ss:$8 sps:$4 sm:$0xff]   ;;  %v3025_v63 = vld [vmem:[#allocation6 + $0x148] ss:$16 sps:$4 sm:$0xff]  }
  0x46   :  { %558 = vmatprep.subr.bf16.mxu1 %v2946_v37  ;;  %4314 = vst [vmem:[#allocation37_spill] sm:$0xff] %v3021_v62  ;;  %4315 = vst [vmem:[#allocation38_spill] sm:$0xff] %v3025_v63 }
  0x48   :  { %518 = vmatpush1.bf16.msra.mxu0 %v2907_v24 }
  0x49   :  { %519 = vmatprep.subr.bf16.mxu0 %v2913_v26  ;;  %559 = vmatpush1.bf16.msra.mxu1 %v2952_v39 }
  0x4a   :  { %560 = vmatprep.subr.bf16.mxu1 %v2958_v41 }
  0x4c   :  { %520 = vmatpush2.bf16.msra.mxu0 %v2919_v28 }
  0x4d   :  { %521 = vmatprep.subr.bf16.mxu0 %v2925_v30  ;;  %561 = vmatpush2.bf16.msra.mxu1 %v2964_v43 }
  0x4e   :  { %562 = vmatprep.subr.bf16.mxu1 %v2970_v45 }
  0x50   :  { %522 = vmatpush2.bf16.msra.mxu0 %v2931_v32 }
  0x51   :  { %523 = vmatprep.subr.bf16.mxu0 %v2937_v34  ;;  %563 = vmatpush2.bf16.msra.mxu1 %v2976_v47 }
  0x52   :  { %564 = vmatprep.subr.bf16.mxu1 %v2982_v49 }
  0x54   :  { %524 = vmatpush2.bf16.msra.mxu0 %v2943_v36 }
  0x55   :  { %525 = vmatprep.subr.bf16.mxu0 %v2949_v38  ;;  %565 = vmatpush2.bf16.msra.mxu1 %v2988_v51  ;;  %v3038_v51 = vld [vmem:[#allocation6 + $0x128] ss:$16 sps:$4 sm:$0xff]  }
  0x56   :  { %566 = vmatprep.subr.bf16.mxu1 %v2994_v53  ;;  %v3031_v53 = vld [vmem:[#allocation6 + $0x12c] ss:$16 sps:$4 sm:$0xff]   ;;  %4319 = vst [vmem:[#allocation42_spill] sm:$0xff] %v3038_v51 }
  0x57   :  { %4317 = vst [vmem:[#allocation40_spill] sm:$0xff] %v3031_v53 }
  0x58   :  { %526 = vmatpush2.bf16.msra.mxu0 %v2955_v40 }
  0x59   :  { %527 = vmatprep.subr.bf16.mxu0 %v2961_v42  ;;  %567 = vmatpush2.bf16.msra.mxu1 %v3000_v55  ;;  %v3028_v55 = vld [vmem:[#allocation8 + $0x60] ss:$8 sps:$4 sm:$0xff]  }
  0x5a   :  { %568 = vmatprep.subr.bf16.mxu1 %v3006_v57  ;;  %4316 = vst [vmem:[#allocation39_spill] sm:$0xff] %v3028_v55  ;;  %v3034_v57 = vld [vmem:[#allocation8 + $0x54] ss:$8 sps:$4 sm:$0xff]  }
  0x5b   :  { %4318 = vst [vmem:[#allocation41_spill] sm:$0xff] %v3034_v57 }
  0x5c   :  { %528 = vmatpush2.bf16.msra.mxu0 %v2967_v44 }
  0x5d   :  { %529 = vmatprep.subr.bf16.mxu0 %v2973_v46  ;;  %569 = vmatpush2.bf16.msra.mxu1 %v3012_v59  ;;  %v3041_v59 = vld [vmem:[#allocation8 + $0x50] ss:$8 sps:$4 sm:$0xff]  }
  0x5e   :  { %570 = vmatprep.subr.bf16.mxu1 %v3018_v61  ;;  %4320 = vst [vmem:[#allocation43_spill] sm:$0xff] %v3041_v59  ;;  %v3047_v61 = vld [vmem:[#allocation8 + $0x44] ss:$8 sps:$4 sm:$0xff]  }
  0x5f   :  { %4322 = vst [vmem:[#allocation45_spill] sm:$0xff] %v3047_v61 }
  0x60   :  { %530 = vmatpush2.bf16.msra.mxu0 %v2979_v48 }
  0x61   :  { %531 = vmatprep.subr.bf16.mxu0 %v2985_v50  ;;  %571 = vmatpush2.bf16.msra.mxu1 %v3025_v63 }
  0x62   :  { %572 = vmatprep.subr.bf16.mxu1 %v3031_v53 }
  0x64   :  { %532 = vmatpush2.bf16.msra.mxu0 %v2991_v52 }
  0x65   :  { %533 = vmatprep.subr.bf16.mxu0 %v2997_v54  ;;  %573 = vmatpush2.bf16.msra.mxu1 %v3038_v51  ;;  %v3065_v51 = vld [vmem:[#allocation8 + $0x24] ss:$8 sps:$4 sm:$0xff]  }
  0x66   :  { %4327 = vst [vmem:[#allocation50_spill] sm:$0xff] %v3065_v51 }
  0x68   :  { %534 = vmatpush2.bf16.msra.mxu0 %v3003_v56 }
  0x69   :  { %773 = vmatprep.subr.bf16.mxu0 %v3009_v58 }
  0x6b   :  { %536 = vmatmul.mubr.bf16.vlgmr.msra.gmra.mxu0 %v4089_v0 }
  0x6c   :  { %774 = vmatpush1.bf16.msra.mxu0 %v3015_v60  ;;  %805 = vmatprep.mubr.bf16.mxu0 %v4089_v0  ;;  %v3044_v60 = vld [vmem:[#allocation6 + $0x10c] ss:$16 sps:$4 sm:$0xff]   ;;  %v3053_v0 = vld [vmem:[#allocation8 + $0x40] ss:$8 sps:$4 sm:$0xff]  }
  0x6d   :  { %775 = vmatprep.subr.bf16.mxu0 %v3021_v62  ;;  %4321 = vst [vmem:[#allocation44_spill] sm:$0xff] %v3044_v60  ;;  %v3050_v62 = vld [vmem:[#allocation6 + $0x108] ss:$16 sps:$4 sm:$0xff]   ;;  %4324 = vst [vmem:[#allocation47_spill] sm:$0xff] %v3053_v0  ;;  %574 = vmatprep.subr.bf16.mxu1 %v3044_v60 }
  0x6e   :  { %4323 = vst [vmem:[#allocation46_spill] sm:$0xff] %v3050_v62  ;;  %575 = vmatpush2.bf16.msra.mxu1 %v3050_v62 }
  0x6f   :  { %839 = vmatprep.subr.bf16.mxu1 %v2841_v1 }
  0x70   :  { %776 = vmatpush1.bf16.msra.mxu0 %v3028_v55  ;;  %v3057_v55 = vld [vmem:[#allocation8 + $0x34] ss:$8 sps:$4 sm:$0xff]  }
  0x71   :  { %777 = vmatprep.subr.bf16.mxu0 %v3034_v57  ;;  %4325 = vst [vmem:[#allocation48_spill] sm:$0xff] %v3057_v55  ;;  %v3061_v57 = vld [vmem:[#allocation8 + $0x30] ss:$8 sps:$4 sm:$0xff]  }
  0x72   :  { %4326 = vst [vmem:[#allocation49_spill] sm:$0xff] %v3061_v57 }
  0x74   :  { %778 = vmatpush1.bf16.msra.mxu0 %v3041_v59  ;;  %v4328_v59 = vmov 0.0|0.0  }
  0x75   :  { %779 = vmatprep.subr.bf16.mxu0 %v3047_v61  ;;  %577 = vmatmul.mubr.bf16.vlgmr.msra.gmra.mxu1 %v4328_v59  ;;  %v3070_v61 = vld [vmem:[#allocation8 + $0x20] ss:$8 sps:$4 sm:$0xff]  }
  0x76   :  { %840 = vmatpush1.bf16.msra.mxu1 %v2843_v2  ;;  %4329 = vst [vmem:[#allocation51_spill] sm:$0xff] %v3070_v61  ;;  %v3082_v2 = vld [vmem:[#allocation8 + $0x4] ss:$8 sps:$4 sm:$0xff]  }
  0x77   :  { %841 = vmatprep.subr.bf16.mxu1 %v2846_v3  ;;  %4332 = vst [vmem:[#allocation54_spill] sm:$0xff] %v3082_v2 }
  0x78   :  { %780 = vmatpush1.bf16.msra.mxu0 %v3053_v0  ;;  %v3074_v0 = vld [vmem:[#allocation8 + $0x14] ss:$8 sps:$4 sm:$0xff]  }
  0x79   :  { %781 = vmatprep.subr.bf16.mxu0 %v3057_v55  ;;  %4330 = vst [vmem:[#allocation52_spill] sm:$0xff] %v3074_v0  ;;  %v3078_v55 = vld [vmem:[#allocation8 + $0x10] ss:$8 sps:$4 sm:$0xff]  }
  0x7a   :  { %842 = vmatpush1.bf16.msra.mxu1 %v2849_v4  ;;  %4331 = vst [vmem:[#allocation53_spill] sm:$0xff] %v3078_v55 }
  0x7b   :  { %843 = vmatprep.subr.bf16.mxu1 %v2852_v5 }
  0x7c   :  { %782 = vmatpush1.bf16.msra.mxu0 %v3061_v57  ;;  %v3086_v57 = vld [vmem:[#allocation8] ss:$8 sps:$4 sm:$0xff]  }
  0x7d   :  { %783 = vmatprep.subr.bf16.mxu0 %v3065_v51  ;;  %4333 = vst [vmem:[#allocation55_spill] sm:$0xff] %v3086_v57  ;;  %v3090_v51 = vld [vmem:[#allocation8 + $0xf4] ss:$8 sps:$4 sm:$0xff]  }
  0x7e   :  { %844 = vmatpush1.bf16.msra.mxu1 %v2855_v6  ;;  %4334 = vst [vmem:[#allocation56_spill] sm:$0xff] %v3090_v51 }
  0x7f   :  { %845 = vmatprep.subr.bf16.mxu1 %v2858_v7 }
  0x80   :  { %784 = vmatpush1.bf16.msra.mxu0 %v3070_v61  ;;  %v3094_v61 = vld [vmem:[#allocation8 + $0xf0] ss:$8 sps:$4 sm:$0xff]  }
  0x81   :  { %785 = vmatprep.subr.bf16.mxu0 %v3074_v0  ;;  %4335 = vst [vmem:[#allocation57_spill] sm:$0xff] %v3094_v61  ;;  %v3098_v0 = vld [vmem:[#allocation8 + $0xe4] ss:$8 sps:$4 sm:$0xff]  }
  0x82   :  { %846 = vmatpush1.bf16.msra.mxu1 %v2861_v8  ;;  %4336 = vst [vmem:[#allocation58_spill] sm:$0xff] %v3098_v0 }
  0x83   :  { %847 = vmatprep.subr.bf16.mxu1 %v2864_v9 }
  0x84   :  { %786 = vmatpush1.bf16.msra.mxu0 %v3078_v55  ;;  %v3102_v55 = vld [vmem:[#allocation8 + $0xe0] ss:$8 sps:$4 sm:$0xff]  }
  0x85   :  { %787 = vmatprep.subr.bf16.mxu0 %v3082_v2  ;;  %4337 = vst [vmem:[#allocation59_spill] sm:$0xff] %v3102_v55  ;;  %v3106_v2 = vld [vmem:[#allocation8 + $0xd4] ss:$8 sps:$4 sm:$0xff]  }
  0x86   :  { %848 = vmatpush1.bf16.msra.mxu1 %v2866_v10  ;;  %4338 = vst [vmem:[#allocation60_spill] sm:$0xff] %v3106_v2 }
  0x87   :  { %849 = vmatprep.subr.bf16.mxu1 %v2874_v13 }
  0x88   :  { %788 = vmatpush1.bf16.msra.mxu0 %v3086_v57  ;;  %v3110_v57 = vld [vmem:[#allocation8 + $0xd0] ss:$8 sps:$4 sm:$0xff]  }
  0x89   :  { %789 = vmatprep.subr.bf16.mxu0 %v3090_v51  ;;  %4339 = vst [vmem:[#allocation61_spill] sm:$0xff] %v3110_v57  ;;  %v3114_v51 = vld [vmem:[#allocation8 + $0xc4] ss:$8 sps:$4 sm:$0xff]  }
  0x8a   :  { %850 = vmatpush1.bf16.msra.mxu1 %v2883_v16  ;;  %4340 = vst [vmem:[#allocation62_spill] sm:$0xff] %v3114_v51 }
  0x8b   :  { %851 = vmatprep.subr.bf16.mxu1 %v2885_v17 }
  0x8c   :  { %790 = vmatpush2.bf16.msra.mxu0 %v3094_v61  ;;  %v3118_v61 = vld [vmem:[#allocation8 + $0xc0] ss:$8 sps:$4 sm:$0xff]  }
  0x8d   :  { %791 = vmatprep.subr.bf16.mxu0 %v3098_v0  ;;  %4341 = vst [vmem:[#allocation63_spill] sm:$0xff] %v3118_v61  ;;  %v3122_v0 = vld [vmem:[#allocation8 + $0xb4] ss:$8 sps:$4 sm:$0xff]  }
  0x8e   :  { %852 = vmatpush1.bf16.msra.mxu1 %v2895_v20  ;;  %4342 = vst [vmem:[#allocation64_spill] sm:$0xff] %v3122_v0 }
  0x8f   :  { %853 = vmatprep.subr.bf16.mxu1 %v2901_v22 }
  0x90   :  { %792 = vmatpush2.bf16.msra.mxu0 %v3102_v55  ;;  %v3126_v55 = vld [vmem:[#allocation8 + $0xb0] ss:$8 sps:$4 sm:$0xff]  }
  0x91   :  { %793 = vmatprep.subr.bf16.mxu0 %v3106_v2  ;;  %4343 = vst [vmem:[#allocation65_spill] sm:$0xff] %v3126_v55  ;;  %v3130_v2 = vld [vmem:[#allocation8 + $0xa4] ss:$8 sps:$4 sm:$0xff]  }
  0x92   :  { %854 = vmatpush1.bf16.msra.mxu1 %v2907_v24 }
  0x93   :  { %855 = vmatprep.subr.bf16.mxu1 %v2913_v26 }
  0x94   :  { %794 = vmatpush2.bf16.msra.mxu0 %v3110_v57  ;;  %v3134_v57 = vld [vmem:[#allocation8 + $0xa0] ss:$8 sps:$4 sm:$0xff]  }
  0x95   :  { %795 = vmatprep.subr.bf16.mxu0 %v3114_v51  ;;  %v3138_v51 = vld [vmem:[#allocation8 + $0x94] ss:$8 sps:$4 sm:$0xff]  }
  0x96   :  { %856 = vmatpush2.bf16.msra.mxu1 %v2919_v28 }
  0x97   :  { %857 = vmatprep.subr.bf16.mxu1 %v2925_v30 }
  0x98   :  { %796 = vmatpush2.bf16.msra.mxu0 %v3118_v61  ;;  %v3142_v61 = vld [vmem:[#allocation8 + $0x90] ss:$8 sps:$4 sm:$0xff]  }
  0x99   :  { %797 = vmatprep.subr.bf16.mxu0 %v3122_v0  ;;  %v3146_v0 = vld [vmem:[#allocation8 + $0x84] ss:$8 sps:$4 sm:$0xff]  }
  0x9a   :  { %858 = vmatpush2.bf16.msra.mxu1 %v2931_v32 }
  0x9b   :  { %859 = vmatprep.subr.bf16.mxu1 %v2937_v34 }
  0x9c   :  { %798 = vmatpush2.bf16.msra.mxu0 %v3126_v55  ;;  %v3150_v55 = vld [vmem:[#allocation8 + $0x80] ss:$8 sps:$4 sm:$0xff]  }
  0x9d   :  { %799 = vmatprep.subr.bf16.mxu0 %v3130_v2 }
  0x9e   :  { %860 = vmatpush2.bf16.msra.mxu1 %v2943_v36 }
  0x9f   :  { %861 = vmatprep.subr.bf16.mxu1 %v2949_v38 }
  0xa0   :  { %800 = vmatpush2.bf16.msra.mxu0 %v3134_v57 }
  0xa1   :  { %801 = vmatprep.subr.bf16.mxu0 %v3138_v51 }
  0xa2   :  { %862 = vmatpush2.bf16.msra.mxu1 %v2955_v40 }
  0xa3   :  { %863 = vmatprep.subr.bf16.mxu1 %v2961_v42 }
  0xa4   :  { %802 = vmatpush2.bf16.msra.mxu0 %v3142_v61 }
  0xa5   :  { %803 = vmatprep.subr.bf16.mxu0 %v3146_v0 }
  0xa6   :  { %864 = vmatpush2.bf16.msra.mxu1 %v2967_v44 }
  0xa7   :  { %865 = vmatprep.subr.bf16.mxu1 %v2973_v46 }
  0xa8   :  { %804 = vmatpush2.bf16.msra.mxu0 %v3150_v55 }
  0xa9   :  { %880 = vmatprep.subr.bf16.mxu0 %v2869_v11 }
  0xaa   :  { %866 = vmatpush2.bf16.msra.mxu1 %v2979_v48 }
  0xab   :  { %806 = vmatmul.mubr.bf16.vlgmr.msra.gmra.mxu0 %v4328_v59  ;;  %867 = vmatprep.subr.bf16.mxu1 %v2985_v50  ;;  %v4344_v59 = vld [vmem:[#allocation30_spill] sm:$0xff] }
  0xac   :  { %881 = vmatpush1.bf16.msra.mxu0 %v2871_v12 }
  0xad   :  { %882 = vmatprep.subr.bf16.mxu0 %v2878_v14 }
  0xae   :  { %868 = vmatpush2.bf16.msra.mxu1 %v2991_v52 }
  0xaf   :  { %869 = vmatprep.subr.bf16.mxu1 %v2997_v54 }
  0xb0   :  { %883 = vmatpush1.bf16.msra.mxu0 %v2880_v15 }
  0xb1   :  { %884 = vmatprep.subr.bf16.mxu0 %v2889_v18 }
  0xb2   :  { %870 = vmatpush2.bf16.msra.mxu1 %v3003_v56 }
  0xb3   :  { %949 = vmatprep.subr.bf16.mxu1 %v3009_v58 }
  0xb4   :  { %885 = vmatpush1.bf16.msra.mxu0 %v2892_v19 }
  0xb5   :  { %886 = vmatprep.subr.bf16.mxu0 %v2898_v21 }
  0xb8   :  { %887 = vmatpush1.bf16.msra.mxu0 %v2904_v23 }
  0xb9   :  { %888 = vmatprep.subr.bf16.mxu0 %v2910_v25 }
  0xbc   :  { %889 = vmatpush1.bf16.msra.mxu0 %v2916_v27  ;;  %v178_v27 = vld [vmem:[#allocation3 + $0x18] sm:$0xff] }
  0xbd   :  { %890 = vmatprep.subr.bf16.mxu0 %v2922_v29 }
  0xc0   :  { %891 = vmatpush1.bf16.msra.mxu0 %v2928_v31  ;;  %v4345_v31 = vld [vmem:[#allocation31_spill] sm:$0xff] }
  0xc1   :  { %892 = vmatprep.subr.bf16.mxu0 %v2934_v33  ;;  %v4346_v33 = vld [vmem:[#allocation32_spill] sm:$0xff] }
  0xc4   :  { %893 = vmatpush1.bf16.msra.mxu0 %v2940_v35  ;;  %v4347_v35 = vld [vmem:[#allocation33_spill] sm:$0xff] }
  0xc5   :  { %894 = vmatprep.subr.bf16.mxu0 %v2946_v37  ;;  %v4348_v37 = vld [vmem:[#allocation34_spill] sm:$0xff] }
  0xc8   :  { %895 = vmatpush1.bf16.msra.mxu0 %v2952_v39  ;;  %v4349_v39 = vld [vmem:[#allocation36_spill] sm:$0xff] }
  0xc9   :  { %896 = vmatprep.subr.bf16.mxu0 %v2958_v41 }
  0xcc   :  { %897 = vmatpush2.bf16.msra.mxu0 %v2964_v43  ;;  %v175_v43 = vld [vmem:[#allocation3] sm:$0xff] }
  0xcd   :  { %898 = vmatprep.subr.bf16.mxu0 %v2970_v45  ;;  %v4350_v45 = vld [vmem:[#allocation42_spill] sm:$0xff] }
  0xd0   :  { %899 = vmatpush2.bf16.msra.mxu0 %v2976_v47 }
  0xd1   :  { %900 = vmatprep.subr.bf16.mxu0 %v2982_v49 }
  0xd4   :  { %901 = vmatpush2.bf16.msra.mxu0 %v4344_v59 }
  0xd5   :  { %902 = vmatprep.subr.bf16.mxu0 %v4345_v31 }
  0xd8   :  { %903 = vmatpush2.bf16.msra.mxu0 %v4346_v33 }
  0xd9   :  { %904 = vmatprep.subr.bf16.mxu0 %v4347_v35 }
  0xdc   :  { %905 = vmatpush2.bf16.msra.mxu0 %v4348_v37 }
  0xdd   :  { %906 = vmatprep.subr.bf16.mxu0 %v4349_v39 }
  0xe0   :  { %907 = vmatpush2.bf16.msra.mxu0 %v3025_v63  ;;  %v176_v63 = vld [vmem:[#allocation3 + $0x8] sm:$0xff] }
  0xe1   :  { %908 = vmatprep.subr.bf16.mxu0 %v3031_v53 }
  0xe4   :  { %909 = vmatpush2.bf16.msra.mxu0 %v4350_v45 }
  0xe5   :  { %910 = vmatprep.subr.bf16.mxu0 %v3044_v60  ;;  %v177_v60 = vld [vmem:[#allocation3 + $0x10] sm:$0xff] }
  0xe8   :  { %911 = vmatpush2.bf16.msra.mxu0 %v3050_v62 }
  0xe9   :  { %1016 = vmatprep.subr.bf16.mxu0 %v2841_v1 }
 0x12b   :  { %v537_v31 = vpop.f32.mrf.mxu0 }
 0x12c   :  { %v585_v41 = vadd.f32 %v537_v31, %v175_v43 }
 0x12d   :  { %v539_v33 = vpop.f32.mrf.mxu0 }
 0x12e   :  { %v586_v53 = vadd.f32 %v539_v33, %v176_v63  ;;  %v2153_v29 = vmul.f32 -1.442695, %v585_v41 }
 0x12f   :  { %v541_v59 = vpop.f32.mrf.mxu0 }
 0x130   :  { %v2154_v45 = vmul.f32 -1.442695, %v586_v53  ;;  %2372 = vpow2.f32 %v2153_v29  ;;  %v161_v29 = vld [vmem:[%s4071_s3] sm:$0x3]  ;;  %s2801_s3 = smov [#allocation9]  }
 0x131   :  { %v542_v35 = vpop.f32.mrf.mxu0  ;;  %s2076_s9 = sshll.u32 %s2801_s3, 4  ;;  %s2077_s9 = int_to_ptr.vmem [resolvable:$true] %s2076_s9 }
 0x132   :  { %2374 = vpow2.f32 %v2154_v45  ;;  %s2765_s10 = scalar_lea.vmem %s2077_s9, 2048  ;;  %p2770_p2 = scmp.lt.s32.totalorder %s2077_s9, %s2077_s9 }
 0x133   :  { %p2766_p1 = scmp.ne.s32.totalorder %s2077_s9, %s2765_s10  ;;  %p2771_p3 = scmp.lt.s32.totalorder %s2765_s10, %s2765_s10 }
 0x135   :  { %v578_v49 = vpop.f32.mrf.mxu1  ;;  %p2772_p4 = por %p2771_p3, %p2770_p2 }
 0x136   :  { %v599_v62 = vadd.f32 %v578_v49, %v177_v60  ;;  %v179_v60 = vld [vmem:[#allocation3 + $0x20] sm:$0xff] }
 0x137   :  { %v580_v37 = vpop.f32.mrf.mxu1  ;;  %p2773_p5 = pnand %p2772_p4, %p2766_p1 }
 0x138   :  { %v2155_v1 = vmul.f32 -1.442695, %v599_v62  ;;  %v600_v25 = vadd.f32 %v580_v37, %v178_v27 }
 0x139   :  { %v582_v47 = vpop.f32.mrf.mxu1 }
 0x13a   :  { %2376 = vpow2.f32 %v2155_v1  ;;  %v2156_v59 = vmul.f32 -1.442695, %v600_v25 }
 0x13b   :  { %v583_v39 = vpop.f32.mrf.mxu1 }
 0x13c   :  { %2378 = vpow2.f32 %v2156_v59  ;;  %v163_v39 = vlaneseq }
 0x13d   :  { %v2373_v35 = vpop.eup %2372 }
 0x13e   :  { %v593_v21 = vadd.f32 1.0, %v2373_v35  ;;  %v164_v31 = vshrl.u32 %v163_v39, 7  ;;  %v180_v35 = vld [vmem:[#allocation3 + $0x28] sm:$0xff] }
 0x13f   :  { %v2375_v23 = vpop.eup %2374 }
 0x140   :  { %v594_v47 = vadd.f32 1.0, %v2375_v23  ;;  %2380 = vrcp.f32 %v593_v21  ;;  %v165_v33 = vsub.s32 0, %v164_v31  ;;  %v169_v43 = vsub.s32 1, %v164_v31 }
 0x142   :  { %2382 = vrcp.f32 %v594_v47  ;;  %v3202_v27 = vrot.slane %v161_v29, %v165_v33  ;;  %v3204_v37 = vrot.slane %v161_v29, %v169_v43 }
 0x144   :  { %4351 = vst [vmem:[#allocation66_spill] sm:$0xff] %v3202_v27  ;;  %4352 = vst [vmem:[#allocation67_spill] sm:$0xff] %v3204_v37 }
 0x147   :  { %v2377_v41 = vpop.eup %2376 }
 0x148   :  { %v607_v45 = vadd.f32 1.0, %v2377_v41 }
 0x149   :  { %v2379_v25 = vpop.eup %2378 }
 0x14a   :  { %2384 = vrcp.f32 %v607_v45  ;;  %v608_v53 = vadd.f32 1.0, %v2379_v25 }
 0x14c   :  { %2386 = vrcp.f32 %v608_v53 }
 0x14d   :  { %v2381_v23 = vpop.eup %2380 }
 0x14f   :  { %v2383_v59 = vpop.eup %2382 }
 0x157   :  { %v2385_v29 = vpop.eup %2384 }
 0x158   :  { %v820_v43 = vsub.f32 1.0, %v2385_v29  ;;  %v824_v19 = vmul.f32 0.0, %v2385_v29  ;;  %v4390_v29 = vld [vmem:[#allocation25_spill] sm:$0xff] }
 0x159   :  { %v2387_v45 = vpop.eup %2386 }
 0x16b   :  { %v807_v49 = vpop.f32.mrf.mxu0 }
 0x16c   :  { %v808_v21 = vadd.f32 %v807_v49, %v3202_v27  ;;  %v821_v49 = vsub.f32 1.0, %v2387_v45 }
 0x16d   :  { %v809_v62 = vpop.f32.mrf.mxu0 }
 0x16e   :  { %v814_v63 = vmul.f32 %v2381_v23, %v808_v21  ;;  %v810_v1 = vadd.f32 %v809_v62, %v3204_v37  ;;  %v825_v62 = vmul.f32 0.0, %v2387_v45  ;;  %v4392_v45 = vld [vmem:[#allocation27_spill] sm:$0xff] }
 0x16f   :  { %v811_v39 = vpop.f32.mrf.mxu0 }
 0x170   :  { %v816_v47 = vadd.f32 %v814_v63, %v179_v60  ;;  %v815_v31 = vmul.f32 %v2383_v59, %v810_v1  ;;  %v4355_v63 = vld [vmem:[#allocation13_spill] sm:$0xff]  ;;  %v4356_v1 = vld [vmem:[#allocation39_spill] sm:$0xff] }
 0x171   :  { %v812_v33 = vpop.f32.mrf.mxu0  ;;  %v4357_v59 = vld [vmem:[#allocation41_spill] sm:$0xff] }
 0x172   :  { %2388 = vtanh.f32 %v816_v47  ;;  %v817_v41 = vadd.f32 %v815_v31, %v180_v35  ;;  %v4358_v35 = vld [vmem:[#allocation43_spill] sm:$0xff]  ;;  %v4359_v47 = vld [vmem:[#allocation45_spill] sm:$0xff]  ;;  %v4361_v33 = vld [vmem:[#allocation48_spill] sm:$0xff] }
 0x173   :  { %v4360_v31 = vld [vmem:[#allocation47_spill] sm:$0xff] }
 0x174   :  { %2390 = vtanh.f32 %v817_v41  ;;  %v4385_v41 = vld [vmem:[#allocation20_spill] sm:$0xff] }
 0x17f   :  { %v2389_v25 = vpop.eup %2388 }
 0x180   :  { %v822_v27 = vmul.f32 %v2389_v25, %v820_v43  ;;  %v4391_v43 = vld [vmem:[#allocation26_spill] sm:$0xff]  ;;  %v4393_v25 = vld [vmem:[#allocation28_spill] sm:$0xff] }
 0x181   :  { %v2391_v21 = vpop.eup %2390 }
 0x182   :  { %v823_v23 = vmul.f32 %v2391_v21, %v821_v49  ;;  %v3208_v37 = vadd.f32 %v824_v19, %v822_v27  ;;  %v4353_v19 = vld [vmem:[#allocation35_spill] sm:$0xff]  ;;  %v4354_v27 = vld [vmem:[#allocation37_spill] sm:$0xff]  ;;  %v4395_v21 = vld [vmem:[#allocation30_spill] sm:$0xff] }
 0x183   :  { %v4394_v49 = vld [vmem:[#allocation29_spill] sm:$0xff] }
 0x184   :  { %v3210_v39 = vadd.f32 %v825_v62, %v823_v23  ;;  %828 = vst [vmem:[#allocation9] sm:$0xff] %v3208_v37  ;;  %v3218_v60 = vpack.c.bf16 %v3208_v37, %v3208_v37  ;;  %v4396_v23 = vld [vmem:[#allocation31_spill] sm:$0xff]  ;;  %v4397_v62 = vld [vmem:[#allocation32_spill] sm:$0xff] }
 0x186   :  { %829 = vst [vmem:[#allocation9 + $0x8] sm:$0xff] %v3210_v39  ;;  %v838_v53 = vpack.c.bf16 %v3210_v39, %v3210_v39 }
 0x188   :  { %871 = vmatprep.mubr.bf16.mxu1 %v838_v53  ;;  %912 = vmatprep.mubr.bf16.mxu0 %v838_v53 }
 0x189   :  { %872 = vmatmul.mubr.bf16.vlgmr.msra.gmra.mxu1 %v3218_v60  ;;  %913 = vmatmul.mubr.bf16.vlgmr.msra.gmra.mxu0 %v3218_v60 }
 0x18a   :  { %950 = vmatpush1.bf16.msra.mxu1 %v4353_v19  ;;  %981 = vmatprep.mubr.bf16.mxu1 %v838_v53  ;;  %v4398_v53 = vld [vmem:[#allocation33_spill] sm:$0xff] }
 0x18b   :  { %951 = vmatprep.subr.bf16.mxu1 %v4354_v27  ;;  %1017 = vmatpush1.bf16.msra.mxu0 %v4355_v63  ;;  %v4400_v63 = vld [vmem:[#allocation36_spill] sm:$0xff] }
 0x18c   :  { %1018 = vmatprep.subr.bf16.mxu0 %v2846_v3  ;;  %v4362_v3 = vld [vmem:[#allocation49_spill] sm:$0xff] }
 0x18e   :  { %952 = vmatpush1.bf16.msra.mxu1 %v4356_v1 }
 0x18f   :  { %953 = vmatprep.subr.bf16.mxu1 %v4357_v59  ;;  %1019 = vmatpush1.bf16.msra.mxu0 %v2849_v4  ;;  %v4363_v4 = vld [vmem:[#allocation50_spill] sm:$0xff] }
 0x190   :  { %1020 = vmatprep.subr.bf16.mxu0 %v2852_v5  ;;  %v4364_v5 = vld [vmem:[#allocation51_spill] sm:$0xff] }
 0x192   :  { %954 = vmatpush1.bf16.msra.mxu1 %v4358_v35 }
 0x193   :  { %955 = vmatprep.subr.bf16.mxu1 %v4359_v47  ;;  %1021 = vmatpush1.bf16.msra.mxu0 %v2855_v6  ;;  %v4365_v6 = vld [vmem:[#allocation52_spill] sm:$0xff] }
 0x194   :  { %1022 = vmatprep.subr.bf16.mxu0 %v2858_v7  ;;  %v4366_v7 = vld [vmem:[#allocation53_spill] sm:$0xff] }
 0x196   :  { %956 = vmatpush1.bf16.msra.mxu1 %v4360_v31 }
 0x197   :  { %957 = vmatprep.subr.bf16.mxu1 %v4361_v33  ;;  %1023 = vmatpush1.bf16.msra.mxu0 %v2861_v8  ;;  %v4367_v8 = vld [vmem:[#allocation54_spill] sm:$0xff] }
 0x198   :  { %1024 = vmatprep.subr.bf16.mxu0 %v2864_v9  ;;  %v4368_v9 = vld [vmem:[#allocation55_spill] sm:$0xff] }
 0x19a   :  { %958 = vmatpush1.bf16.msra.mxu1 %v4362_v3 }
 0x19b   :  { %959 = vmatprep.subr.bf16.mxu1 %v4363_v4  ;;  %1025 = vmatpush1.bf16.msra.mxu0 %v2866_v10  ;;  %v4369_v10 = vld [vmem:[#allocation56_spill] sm:$0xff] }
 0x19c   :  { %1026 = vmatprep.subr.bf16.mxu0 %v2874_v13  ;;  %v4370_v13 = vld [vmem:[#allocation57_spill] sm:$0xff] }
 0x19e   :  { %960 = vmatpush1.bf16.msra.mxu1 %v4364_v5 }
 0x19f   :  { %961 = vmatprep.subr.bf16.mxu1 %v4365_v6  ;;  %1027 = vmatpush1.bf16.msra.mxu0 %v2883_v16  ;;  %v4371_v16 = vld [vmem:[#allocation58_spill] sm:$0xff] }
 0x1a0   :  { %1028 = vmatprep.subr.bf16.mxu0 %v2885_v17  ;;  %v4372_v17 = vld [vmem:[#allocation59_spill] sm:$0xff] }
 0x1a2   :  { %962 = vmatpush1.bf16.msra.mxu1 %v4366_v7 }
 0x1a3   :  { %963 = vmatprep.subr.bf16.mxu1 %v4367_v8  ;;  %1029 = vmatpush1.bf16.msra.mxu0 %v2895_v20  ;;  %v4373_v20 = vld [vmem:[#allocation60_spill] sm:$0xff] }
 0x1a4   :  { %1030 = vmatprep.subr.bf16.mxu0 %v2901_v22  ;;  %v4374_v22 = vld [vmem:[#allocation61_spill] sm:$0xff] }
 0x1a6   :  { %964 = vmatpush1.bf16.msra.mxu1 %v4368_v9 }
 0x1a7   :  { %965 = vmatprep.subr.bf16.mxu1 %v4369_v10  ;;  %1031 = vmatpush1.bf16.msra.mxu0 %v2907_v24  ;;  %v4375_v24 = vld [vmem:[#allocation62_spill] sm:$0xff] }
 0x1a8   :  { %1032 = vmatprep.subr.bf16.mxu0 %v2913_v26  ;;  %v4376_v26 = vld [vmem:[#allocation63_spill] sm:$0xff] }
 0x1aa   :  { %966 = vmatpush2.bf16.msra.mxu1 %v4370_v13 }
 0x1ab   :  { %967 = vmatprep.subr.bf16.mxu1 %v4371_v16  ;;  %1033 = vmatpush2.bf16.msra.mxu0 %v2919_v28  ;;  %v4377_v28 = vld [vmem:[#allocation64_spill] sm:$0xff] }
 0x1ac   :  { %1034 = vmatprep.subr.bf16.mxu0 %v2925_v30  ;;  %v4378_v30 = vld [vmem:[#allocation65_spill] sm:$0xff] }
 0x1ae   :  { %968 = vmatpush2.bf16.msra.mxu1 %v4372_v17 }
 0x1af   :  { %969 = vmatprep.subr.bf16.mxu1 %v4373_v20  ;;  %1035 = vmatpush2.bf16.msra.mxu0 %v2931_v32  ;;  %v4379_v32 = vld [vmem:[#allocation14_spill] sm:$0xff] }
 0x1b0   :  { %1036 = vmatprep.subr.bf16.mxu0 %v2937_v34  ;;  %v4380_v34 = vld [vmem:[#allocation15_spill] sm:$0xff] }
 0x1b2   :  { %970 = vmatpush2.bf16.msra.mxu1 %v4374_v22 }
 0x1b3   :  { %971 = vmatprep.subr.bf16.mxu1 %v4375_v24  ;;  %1037 = vmatpush2.bf16.msra.mxu0 %v2943_v36  ;;  %v4381_v36 = vld [vmem:[#allocation16_spill] sm:$0xff] }
 0x1b4   :  { %1038 = vmatprep.subr.bf16.mxu0 %v2949_v38  ;;  %v4383_v38 = vld [vmem:[#allocation18_spill] sm:$0xff] }
 0x1b6   :  { %972 = vmatpush2.bf16.msra.mxu1 %v4376_v26 }
 0x1b7   :  { %973 = vmatprep.subr.bf16.mxu1 %v4377_v28  ;;  %1039 = vmatpush2.bf16.msra.mxu0 %v2955_v40  ;;  %v4384_v40 = vld [vmem:[#allocation19_spill] sm:$0xff] }
 0x1b8   :  { %1040 = vmatprep.subr.bf16.mxu0 %v2961_v42 }
 0x1ba   :  { %974 = vmatpush2.bf16.msra.mxu1 %v4378_v30 }
 0x1bb   :  { %975 = vmatprep.subr.bf16.mxu1 %v3130_v2  ;;  %1041 = vmatpush2.bf16.msra.mxu0 %v2967_v44 }
 0x1bc   :  { %1042 = vmatprep.subr.bf16.mxu0 %v2973_v46 }
 0x1be   :  { %976 = vmatpush2.bf16.msra.mxu1 %v3134_v57 }
 0x1bf   :  { %977 = vmatprep.subr.bf16.mxu1 %v3138_v51  ;;  %1043 = vmatpush2.bf16.msra.mxu0 %v2979_v48 }
 0x1c0   :  { %1044 = vmatprep.subr.bf16.mxu0 %v2985_v50 }
 0x1c2   :  { %978 = vmatpush2.bf16.msra.mxu1 %v3142_v61 }
 0x1c3   :  { %979 = vmatprep.subr.bf16.mxu1 %v3146_v0  ;;  %1045 = vmatpush2.bf16.msra.mxu0 %v2991_v52 }
 0x1c4   :  { %1046 = vmatprep.subr.bf16.mxu0 %v2997_v54 }
 0x1c6   :  { %980 = vmatpush2.bf16.msra.mxu1 %v3150_v55 }
 0x1c7   :  { %1057 = vmatprep.subr.bf16.mxu1 %v2869_v11  ;;  %1047 = vmatpush2.bf16.msra.mxu0 %v3003_v56  ;;  %v4382_v11 = vld [vmem:[#allocation17_spill] sm:$0xff] }
 0x1c8   :  { %1126 = vmatprep.subr.bf16.mxu0 %v3009_v58 }
 0x1c9   :  { %982 = vmatmul.mubr.bf16.vlgmr.msra.gmra.mxu1 %v3218_v60  ;;  %v4399_v60 = vld [vmem:[#allocation34_spill] sm:$0xff] }
 0x1ca   :  { %1058 = vmatpush1.bf16.msra.mxu1 %v2871_v12  ;;  %v4386_v12 = vld [vmem:[#allocation21_spill] sm:$0xff] }
 0x1cb   :  { %1059 = vmatprep.subr.bf16.mxu1 %v2878_v14  ;;  %v4387_v14 = vld [vmem:[#allocation22_spill] sm:$0xff] }
 0x1ce   :  { %1060 = vmatpush1.bf16.msra.mxu1 %v2880_v15  ;;  %v4388_v15 = vld [vmem:[#allocation23_spill] sm:$0xff] }
 0x1cf   :  { %1061 = vmatprep.subr.bf16.mxu1 %v2889_v18  ;;  %v4389_v18 = vld [vmem:[#allocation24_spill] sm:$0xff] }
 0x1d2   :  { %1062 = vmatpush1.bf16.msra.mxu1 %v4379_v32  ;;  %v4401_v32 = vld [vmem:[#allocation38_spill] sm:$0xff] }
 0x1d3   :  { %1063 = vmatprep.subr.bf16.mxu1 %v4380_v34  ;;  %v4402_v34 = vld [vmem:[#allocation40_spill] sm:$0xff] }
 0x1d6   :  { %1064 = vmatpush1.bf16.msra.mxu1 %v4381_v36  ;;  %v4403_v36 = vld [vmem:[#allocation42_spill] sm:$0xff] }
 0x1d7   :  { %1065 = vmatprep.subr.bf16.mxu1 %v4382_v11  ;;  %v4404_v11 = vld [vmem:[#allocation44_spill] sm:$0xff] }
 0x1da   :  { %1066 = vmatpush1.bf16.msra.mxu1 %v4383_v38  ;;  %v4405_v38 = vld [vmem:[#allocation46_spill] sm:$0xff] }
 0x1db   :  { %1067 = vmatprep.subr.bf16.mxu1 %v4384_v40  ;;  %v3318_v40 = vld [vmem:[#allocation6 + $0xe4] ss:$16 sps:$4 sm:$0xff]  }
 0x1dc   :  { %4406 = vst [vmem:[#allocation35_spill] sm:$0xff] %v3318_v40 }
 0x1de   :  { %1068 = vmatpush1.bf16.msra.mxu1 %v4385_v41 }
 0x1df   :  { %1069 = vmatprep.subr.bf16.mxu1 %v4386_v12 }
 0x1e2   :  { %1070 = vmatpush1.bf16.msra.mxu1 %v4387_v14 }
 0x1e3   :  { %1071 = vmatprep.subr.bf16.mxu1 %v4388_v15 }
 0x1e6   :  { %1072 = vmatpush1.bf16.msra.mxu1 %v4389_v18 }
 0x1e7   :  { %1073 = vmatprep.subr.bf16.mxu1 %v4390_v29 }
 0x1ea   :  { %1074 = vmatpush2.bf16.msra.mxu1 %v4391_v43 }
 0x1eb   :  { %1075 = vmatprep.subr.bf16.mxu1 %v4392_v45 }
 0x1ee   :  { %1076 = vmatpush2.bf16.msra.mxu1 %v4393_v25  ;;  %v831_v25 = vld [vmem:[#allocation3 + $0x30] sm:$0xff] }
 0x1ef   :  { %1077 = vmatprep.subr.bf16.mxu1 %v4394_v49  ;;  %v832_v49 = vld [vmem:[#allocation3 + $0x38] sm:$0xff] }
 0x1f2   :  { %1078 = vmatpush2.bf16.msra.mxu1 %v4395_v21 }
 0x1f3   :  { %1079 = vmatprep.subr.bf16.mxu1 %v4396_v23 }
 0x1f6   :  { %1080 = vmatpush2.bf16.msra.mxu1 %v4397_v62 }
 0x1f7   :  { %1081 = vmatprep.subr.bf16.mxu1 %v4398_v53 }
 0x1fa   :  { %1082 = vmatpush2.bf16.msra.mxu1 %v4399_v60 }
 0x1fb   :  { %1083 = vmatprep.subr.bf16.mxu1 %v4400_v63 }
 0x1fe   :  { %1084 = vmatpush2.bf16.msra.mxu1 %v4401_v32  ;;  %v834_v32 = vld [vmem:[#allocation3 + $0x48] sm:$0xff] }
 0x1ff   :  { %1085 = vmatprep.subr.bf16.mxu1 %v4402_v34 }
 0x202   :  { %1086 = vmatpush2.bf16.msra.mxu1 %v4403_v36 }
 0x203   :  { %1087 = vmatprep.subr.bf16.mxu1 %v4404_v11 }
 0x206   :  { %1088 = vmatpush2.bf16.msra.mxu1 %v4405_v38  ;;  %v833_v38 = vld [vmem:[#allocation3 + $0x40] sm:$0xff] }
 0x207   :  { %1193 = vmatprep.subr.bf16.mxu1 %v3318_v40 }
 0x249   :  { %v873_v41 = vpop.f32.mrf.mxu1  ;;  %v914_v12 = vpop.f32.mrf.mxu0 }
 0x24a   :  { %v921_v21 = vadd.f32 %v873_v41, %v831_v25  ;;  %v935_v63 = vadd.f32 %v914_v12, %v833_v38  ;;  %v835_v38 = vld [vmem:[#allocation3 + $0x50] sm:$0xff] }
 0x24b   :  { %v875_v14 = vpop.f32.mrf.mxu1  ;;  %v916_v15 = vpop.f32.mrf.mxu0 }
 0x24c   :  { %v922_v36 = vadd.f32 %v875_v14, %v832_v49  ;;  %v2189_v34 = vmul.f32 -1.442695, %v921_v21  ;;  %v936_v40 = vadd.f32 %v916_v15, %v834_v32  ;;  %v2191_v60 = vmul.f32 -1.442695, %v935_v63 }
 0x24d   :  { %v877_v18 = vpop.f32.mrf.mxu1  ;;  %v918_v29 = vpop.f32.mrf.mxu0 }
 0x24e   :  { %v2190_v11 = vmul.f32 -1.442695, %v922_v36  ;;  %2392 = vpow2.f32 %v2189_v34  ;;  %v2192_v53 = vmul.f32 -1.442695, %v936_v40  ;;  %v4408_v40 = vld [vmem:[#allocation67_spill] sm:$0xff] }
 0x24f   :  { %v878_v43 = vpop.f32.mrf.mxu1  ;;  %v919_v45 = vpop.f32.mrf.mxu0 }
 0x250   :  { %2394 = vpow2.f32 %v2190_v11  ;;  %v4407_v11 = vld [vmem:[#allocation66_spill] sm:$0xff] }
 0x251   :  { %2396 = vpow2.f32 %v2191_v60 }
 0x252   :  { %2398 = vpow2.f32 %v2192_v53 }
 0x25b   :  { %v2393_v62 = vpop.eup %2392 }
 0x25c   :  { %v929_v29 = vadd.f32 1.0, %v2393_v62  ;;  %v836_v62 = vld [vmem:[#allocation3 + $0x58] sm:$0xff] }
 0x25d   :  { %v2395_v18 = vpop.eup %2394 }
 0x25e   :  { %v930_v43 = vadd.f32 1.0, %v2395_v18  ;;  %2400 = vrcp.f32 %v929_v29  ;;  %v2397_v41 = vpop.eup %2396 }
 0x25f   :  { %v2399_v14 = vpop.eup %2398  ;;  %v943_v45 = vadd.f32 1.0, %v2397_v41 }
 0x260   :  { %2402 = vrcp.f32 %v930_v43  ;;  %v944_v34 = vadd.f32 1.0, %v2399_v14 }
 0x261   :  { %2404 = vrcp.f32 %v943_v45 }
 0x262   :  { %2406 = vrcp.f32 %v944_v34 }
 0x26b   :  { %v2401_v49 = vpop.eup %2400 }
 0x26d   :  { %v2403_v12 = vpop.eup %2402 }
 0x26e   :  { %v2405_v43 = vpop.eup %2404 }
 0x26f   :  { %v2407_v41 = vpop.eup %2406  ;;  %v996_v14 = vsub.f32 1.0, %v2405_v43  ;;  %v1000_v45 = vmul.f32 %v2405_v43, %v3208_v37  ;;  %v3341_v37 = vld [vmem:[#allocation6 + $0xe0] ss:$16 sps:$4 sm:$0xff]   ;;  %v4441_v43 = vld [vmem:[#allocation40_spill] sm:$0xff] }
 0x289   :  { %v983_v36 = vpop.f32.mrf.mxu1 }
 0x28a   :  { %v984_v25 = vadd.f32 %v983_v36, %v4407_v11  ;;  %v997_v11 = vsub.f32 1.0, %v2407_v41 }
 0x28b   :  { %v985_v32 = vpop.f32.mrf.mxu1 }
 0x28c   :  { %v990_v63 = vmul.f32 %v2401_v49, %v984_v25  ;;  %v986_v60 = vadd.f32 %v985_v32, %v4408_v40  ;;  %v1001_v32 = vmul.f32 %v2407_v41, %v3210_v39  ;;  %v3344_v39 = vld [vmem:[#allocation6 + $0xc4] ss:$16 sps:$4 sm:$0xff]   ;;  %v4442_v41 = vld [vmem:[#allocation42_spill] sm:$0xff] }
 0x28d   :  { %v987_v53 = vpop.f32.mrf.mxu1 }
 0x28e   :  { %v992_v15 = vadd.f32 %v990_v63, %v835_v38  ;;  %v991_v21 = vmul.f32 %v2403_v12, %v986_v60  ;;  %v3512_v60 = vld [vmem:[#allocation6 + $0x1a8] ss:$16 sps:$4 sm:$0xff]   ;;  %v4435_v12 = vld [vmem:[#allocation31_spill] sm:$0xff] }
 0x28f   :  { %v988_v18 = vpop.f32.mrf.mxu1  ;;  %4434 = vst [vmem:[#allocation14_spill] sm:$0xff] %v3512_v60 }
 0x290   :  { %2408 = vtanh.f32 %v992_v15  ;;  %v993_v29 = vadd.f32 %v991_v21, %v836_v62  ;;  %v4436_v62 = vld [vmem:[#allocation32_spill] sm:$0xff]  ;;  %v4437_v15 = vld [vmem:[#allocation33_spill] sm:$0xff]  ;;  %v4438_v21 = vld [vmem:[#allocation34_spill] sm:$0xff] }
 0x291   :  { %v4439_v18 = vld [vmem:[#allocation36_spill] sm:$0xff] }
 0x292   :  { %2410 = vtanh.f32 %v993_v29  ;;  %v4440_v29 = vld [vmem:[#allocation38_spill] sm:$0xff] }
 0x29d   :  { %v2409_v36 = vpop.eup %2408 }
 0x29e   :  { %v998_v23 = vmul.f32 %v2409_v36, %v996_v14  ;;  %v4443_v14 = vld [vmem:[#allocation44_spill] sm:$0xff]  ;;  %v4444_v36 = vld [vmem:[#allocation46_spill] sm:$0xff] }
 0x29f   :  { %v2411_v25 = vpop.eup %2410 }
 0x2a0   :  { %v999_v49 = vmul.f32 %v2411_v25, %v997_v11  ;;  %v3325_v53 = vadd.f32 %v1000_v45, %v998_v23  ;;  %v3349_v23 = vld [vmem:[#allocation6 + $0xc0] ss:$16 sps:$4 sm:$0xff]   ;;  %v3360_v11 = vld [vmem:[#allocation6 + $0x84] ss:$16 sps:$4 sm:$0xff]  }
 0x2a1   :  { %v4445_v45 = vld [vmem:[#allocation35_spill] sm:$0xff] }
 0x2a2   :  { %v3327_v34 = vadd.f32 %v1001_v32, %v999_v49  ;;  %1005 = vst [vmem:[#allocation9 + $0x10] sm:$0xff] %v3325_v53  ;;  %v3335_v63 = vpack.c.bf16 %v3325_v53, %v3325_v53 }
 0x2a4   :  { %1006 = vst [vmem:[#allocation9 + $0x18] sm:$0xff] %v3327_v34  ;;  %v1015_v38 = vpack.c.bf16 %v3327_v34, %v3327_v34 }
 0x2a6   :  { %1048 = vmatprep.mubr.bf16.mxu0 %v1015_v38  ;;  %1089 = vmatprep.mubr.bf16.mxu1 %v1015_v38 }
 0x2a7   :  { %1049 = vmatmul.mubr.bf16.vlgmr.msra.gmra.mxu0 %v3335_v63  ;;  %1090 = vmatmul.mubr.bf16.vlgmr.msra.gmra.mxu1 %v3335_v63 }
 0x2a8   :  { %1127 = vmatpush1.bf16.msra.mxu0 %v4353_v19  ;;  %1158 = vmatprep.mubr.bf16.mxu0 %v1015_v38  ;;  %v3352_v19 = vld [vmem:[#allocation6 + $0xa4] ss:$16 sps:$4 sm:$0xff]  }
 0x2a9   :  { %1128 = vmatprep.subr.bf16.mxu0 %v4354_v27  ;;  %1194 = vmatpush1.bf16.msra.mxu1 %v3341_v37  ;;  %v3357_v27 = vld [vmem:[#allocation6 + $0xa0] ss:$16 sps:$4 sm:$0xff]  }
 0x2aa   :  { %1195 = vmatprep.subr.bf16.mxu1 %v3344_v39 }
 0x2ac   :  { %1129 = vmatpush1.bf16.msra.mxu0 %v4356_v1  ;;  %v3365_v1 = vld [vmem:[#allocation6 + $0x80] ss:$16 sps:$4 sm:$0xff]  }
 0x2ad   :  { %1130 = vmatprep.subr.bf16.mxu0 %v4357_v59  ;;  %1196 = vmatpush1.bf16.msra.mxu1 %v3349_v23  ;;  %v3368_v59 = vld [vmem:[#allocation6 + $0x64] ss:$16 sps:$4 sm:$0xff]  }
 0x2ae   :  { %1197 = vmatprep.subr.bf16.mxu1 %v3352_v19 }
 0x2b0   :  { %1131 = vmatpush1.bf16.msra.mxu0 %v4358_v35  ;;  %v3373_v35 = vld [vmem:[#allocation6 + $0x60] ss:$16 sps:$4 sm:$0xff]  }
 0x2b1   :  { %1132 = vmatprep.subr.bf16.mxu0 %v4359_v47  ;;  %1198 = vmatpush1.bf16.msra.mxu1 %v3357_v27  ;;  %v3376_v47 = vld [vmem:[#allocation6 + $0x44] ss:$16 sps:$4 sm:$0xff]  }
 0x2b2   :  { %1199 = vmatprep.subr.bf16.mxu1 %v3360_v11 }
 0x2b4   :  { %1133 = vmatpush1.bf16.msra.mxu0 %v4360_v31  ;;  %v3381_v31 = vld [vmem:[#allocation6 + $0x40] ss:$16 sps:$4 sm:$0xff]  }
 0x2b5   :  { %1134 = vmatprep.subr.bf16.mxu0 %v4361_v33  ;;  %1200 = vmatpush1.bf16.msra.mxu1 %v3365_v1  ;;  %v3384_v33 = vld [vmem:[#allocation6 + $0x24] ss:$16 sps:$4 sm:$0xff]  }
 0x2b6   :  { %1201 = vmatprep.subr.bf16.mxu1 %v3368_v59 }
 0x2b8   :  { %1135 = vmatpush1.bf16.msra.mxu0 %v4362_v3  ;;  %v3389_v3 = vld [vmem:[#allocation6 + $0x20] ss:$16 sps:$4 sm:$0xff]  }
 0x2b9   :  { %1136 = vmatprep.subr.bf16.mxu0 %v4363_v4  ;;  %1202 = vmatpush1.bf16.msra.mxu1 %v3373_v35  ;;  %v3392_v4 = vld [vmem:[#allocation6 + $0x4] ss:$16 sps:$4 sm:$0xff]  }
 0x2ba   :  { %1203 = vmatprep.subr.bf16.mxu1 %v3376_v47 }
 0x2bc   :  { %1137 = vmatpush1.bf16.msra.mxu0 %v4364_v5  ;;  %v3397_v5 = vld [vmem:[#allocation6] ss:$16 sps:$4 sm:$0xff]  }
 0x2bd   :  { %1138 = vmatprep.subr.bf16.mxu0 %v4365_v6  ;;  %1204 = vmatpush1.bf16.msra.mxu1 %v3381_v31  ;;  %v3400_v6 = vld [vmem:[#allocation6 + $0x1e4] ss:$16 sps:$4 sm:$0xff]  }
 0x2be   :  { %1205 = vmatprep.subr.bf16.mxu1 %v3384_v33 }
 0x2c0   :  { %1139 = vmatpush1.bf16.msra.mxu0 %v4366_v7  ;;  %v3405_v7 = vld [vmem:[#allocation6 + $0x1e0] ss:$16 sps:$4 sm:$0xff]  }
 0x2c1   :  { %1140 = vmatprep.subr.bf16.mxu0 %v4367_v8  ;;  %1206 = vmatpush1.bf16.msra.mxu1 %v3389_v3  ;;  %v3408_v8 = vld [vmem:[#allocation6 + $0x1c4] ss:$16 sps:$4 sm:$0xff]  }
 0x2c2   :  { %1207 = vmatprep.subr.bf16.mxu1 %v3392_v4 }
 0x2c4   :  { %1141 = vmatpush1.bf16.msra.mxu0 %v4368_v9  ;;  %v3413_v9 = vld [vmem:[#allocation6 + $0x1c0] ss:$16 sps:$4 sm:$0xff]  }
 0x2c5   :  { %1142 = vmatprep.subr.bf16.mxu0 %v4369_v10  ;;  %1208 = vmatpush1.bf16.msra.mxu1 %v3397_v5  ;;  %v3416_v10 = vld [vmem:[#allocation6 + $0x1a4] ss:$16 sps:$4 sm:$0xff]  }
 0x2c6   :  { %1209 = vmatprep.subr.bf16.mxu1 %v3400_v6  ;;  %4409 = vst [vmem:[#allocation37_spill] sm:$0xff] %v3416_v10 }
 0x2c8   :  { %1143 = vmatpush2.bf16.msra.mxu0 %v4370_v13  ;;  %v3421_v13 = vld [vmem:[#allocation6 + $0x1a0] ss:$16 sps:$4 sm:$0xff]  }
 0x2c9   :  { %1144 = vmatprep.subr.bf16.mxu0 %v4371_v16  ;;  %1210 = vmatpush2.bf16.msra.mxu1 %v3405_v7  ;;  %4410 = vst [vmem:[#allocation13_spill] sm:$0xff] %v3421_v13  ;;  %v3424_v16 = vld [vmem:[#allocation6 + $0x184] ss:$16 sps:$4 sm:$0xff]  }
 0x2ca   :  { %1211 = vmatprep.subr.bf16.mxu1 %v3408_v8  ;;  %4411 = vst [vmem:[#allocation39_spill] sm:$0xff] %v3424_v16 }
 0x2cc   :  { %1145 = vmatpush2.bf16.msra.mxu0 %v4372_v17  ;;  %v3429_v17 = vld [vmem:[#allocation6 + $0x180] ss:$16 sps:$4 sm:$0xff]  }
 0x2cd   :  { %1146 = vmatprep.subr.bf16.mxu0 %v4373_v20  ;;  %1212 = vmatpush2.bf16.msra.mxu1 %v3413_v9  ;;  %4412 = vst [vmem:[#allocation41_spill] sm:$0xff] %v3429_v17  ;;  %v3494_v20 = vld [vmem:[#allocation6 + $0x8] ss:$16 sps:$4 sm:$0xff]  }
 0x2ce   :  { %1213 = vmatprep.subr.bf16.mxu1 %v3416_v10  ;;  %4428 = vst [vmem:[#allocation60_spill] sm:$0xff] %v3494_v20 }
 0x2d0   :  { %1147 = vmatpush2.bf16.msra.mxu0 %v4374_v22  ;;  %v3497_v22 = vld [vmem:[#allocation6 + $0x1ec] ss:$16 sps:$4 sm:$0xff]  }
 0x2d1   :  { %1148 = vmatprep.subr.bf16.mxu0 %v4375_v24  ;;  %1214 = vmatpush2.bf16.msra.mxu1 %v3421_v13  ;;  %4429 = vst [vmem:[#allocation61_spill] sm:$0xff] %v3497_v22  ;;  %v3500_v24 = vld [vmem:[#allocation6 + $0x1e8] ss:$16 sps:$4 sm:$0xff]  }
 0x2d2   :  { %1215 = vmatprep.subr.bf16.mxu1 %v3424_v16  ;;  %4430 = vst [vmem:[#allocation62_spill] sm:$0xff] %v3500_v24 }
 0x2d4   :  { %1149 = vmatpush2.bf16.msra.mxu0 %v4376_v26  ;;  %v3503_v26 = vld [vmem:[#allocation6 + $0x1cc] ss:$16 sps:$4 sm:$0xff]  }
 0x2d5   :  { %1150 = vmatprep.subr.bf16.mxu0 %v4377_v28  ;;  %1216 = vmatpush2.bf16.msra.mxu1 %v3429_v17  ;;  %4431 = vst [vmem:[#allocation63_spill] sm:$0xff] %v3503_v26  ;;  %v3506_v28 = vld [vmem:[#allocation6 + $0x1c8] ss:$16 sps:$4 sm:$0xff]  }
 0x2d6   :  { %1217 = vmatprep.subr.bf16.mxu1 %v2961_v42  ;;  %v3452_v42 = vld [vmem:[#allocation6 + $0xe8] ss:$16 sps:$4 sm:$0xff]   ;;  %4432 = vst [vmem:[#allocation64_spill] sm:$0xff] %v3506_v28 }
 0x2d7   :  { %4414 = vst [vmem:[#allocation45_spill] sm:$0xff] %v3452_v42 }
 0x2d8   :  { %1151 = vmatpush2.bf16.msra.mxu0 %v4378_v30  ;;  %v3509_v30 = vld [vmem:[#allocation6 + $0x1ac] ss:$16 sps:$4 sm:$0xff]  }
 0x2d9   :  { %1152 = vmatprep.subr.bf16.mxu0 %v3130_v2  ;;  %1218 = vmatpush2.bf16.msra.mxu1 %v2967_v44  ;;  %v3446_v2 = vld [vmem:[#allocation6 + $0xec] ss:$16 sps:$4 sm:$0xff]   ;;  %v3458_v44 = vld [vmem:[#allocation6 + $0xc8] ss:$16 sps:$4 sm:$0xff]   ;;  %4433 = vst [vmem:[#allocation65_spill] sm:$0xff] %v3509_v30 }
 0x2da   :  { %1219 = vmatprep.subr.bf16.mxu1 %v2973_v46  ;;  %4413 = vst [vmem:[#allocation43_spill] sm:$0xff] %v3446_v2  ;;  %4416 = vst [vmem:[#allocation48_spill] sm:$0xff] %v3458_v44  ;;  %v3461_v46 = vld [vmem:[#allocation6 + $0xac] ss:$16 sps:$4 sm:$0xff]  }
 0x2db   :  { %4417 = vst [vmem:[#allocation49_spill] sm:$0xff] %v3461_v46 }
 0x2dc   :  { %1153 = vmatpush2.bf16.msra.mxu0 %v3134_v57  ;;  %v3485_v57 = vld [vmem:[#allocation6 + $0x2c] ss:$16 sps:$4 sm:$0xff]  }
 0x2dd   :  { %1154 = vmatprep.subr.bf16.mxu0 %v3138_v51  ;;  %1220 = vmatpush2.bf16.msra.mxu1 %v2979_v48  ;;  %v3464_v48 = vld [vmem:[#allocation6 + $0xa8] ss:$16 sps:$4 sm:$0xff]   ;;  %4425 = vst [vmem:[#allocation57_spill] sm:$0xff] %v3485_v57 }
 0x2de   :  { %1221 = vmatprep.subr.bf16.mxu1 %v2985_v50  ;;  %4418 = vst [vmem:[#allocation50_spill] sm:$0xff] %v3464_v48  ;;  %v3467_v50 = vld [vmem:[#allocation6 + $0x8c] ss:$16 sps:$4 sm:$0xff]   ;;  %v3470_v51 = vld [vmem:[#allocation6 + $0x88] ss:$16 sps:$4 sm:$0xff]  }
 0x2df   :  { %4419 = vst [vmem:[#allocation51_spill] sm:$0xff] %v3467_v50  ;;  %4420 = vst [vmem:[#allocation52_spill] sm:$0xff] %v3470_v51 }
 0x2e0   :  { %1155 = vmatpush2.bf16.msra.mxu0 %v3142_v61  ;;  %v3491_v61 = vld [vmem:[#allocation6 + $0xc] ss:$16 sps:$4 sm:$0xff]  }
 0x2e1   :  { %1156 = vmatprep.subr.bf16.mxu0 %v3146_v0  ;;  %1222 = vmatpush2.bf16.msra.mxu1 %v2991_v52  ;;  %v3455_v0 = vld [vmem:[#allocation6 + $0xcc] ss:$16 sps:$4 sm:$0xff]   ;;  %4427 = vst [vmem:[#allocation59_spill] sm:$0xff] %v3491_v61 }
 0x2e2   :  { %1223 = vmatprep.subr.bf16.mxu1 %v2997_v54  ;;  %4415 = vst [vmem:[#allocation47_spill] sm:$0xff] %v3455_v0  ;;  %v3473_v52 = vld [vmem:[#allocation6 + $0x6c] ss:$16 sps:$4 sm:$0xff]   ;;  %v3476_v54 = vld [vmem:[#allocation6 + $0x68] ss:$16 sps:$4 sm:$0xff]  }
 0x2e3   :  { %4421 = vst [vmem:[#allocation53_spill] sm:$0xff] %v3473_v52  ;;  %4422 = vst [vmem:[#allocation54_spill] sm:$0xff] %v3476_v54 }
 0x2e4   :  { %1157 = vmatpush2.bf16.msra.mxu0 %v3150_v55  ;;  %v3479_v55 = vld [vmem:[#allocation6 + $0x4c] ss:$16 sps:$4 sm:$0xff]  }
 0x2e5   :  { %1234 = vmatprep.subr.bf16.mxu0 %v3446_v2  ;;  %1224 = vmatpush2.bf16.msra.mxu1 %v3003_v56  ;;  %4423 = vst [vmem:[#allocation55_spill] sm:$0xff] %v3479_v55  ;;  %v3482_v56 = vld [vmem:[#allocation6 + $0x48] ss:$16 sps:$4 sm:$0xff]  }
 0x2e6   :  { %1303 = vmatprep.subr.bf16.mxu1 %v3009_v58  ;;  %4424 = vst [vmem:[#allocation56_spill] sm:$0xff] %v3482_v56  ;;  %v3488_v58 = vld [vmem:[#allocation6 + $0x28] ss:$16 sps:$4 sm:$0xff]  }
 0x2e7   :  { %1159 = vmatmul.mubr.bf16.vlgmr.msra.gmra.mxu0 %v3335_v63  ;;  %4426 = vst [vmem:[#allocation58_spill] sm:$0xff] %v3488_v58 }
 0x2e8   :  { %1235 = vmatpush1.bf16.msra.mxu0 %v3452_v42 }
 0x2e9   :  { %1236 = vmatprep.subr.bf16.mxu0 %v3455_v0 }
 0x2ec   :  { %1237 = vmatpush1.bf16.msra.mxu0 %v3458_v44 }
 0x2ed   :  { %1238 = vmatprep.subr.bf16.mxu0 %v3461_v46 }
 0x2f0   :  { %1239 = vmatpush1.bf16.msra.mxu0 %v3464_v48 }
 0x2f1   :  { %1240 = vmatprep.subr.bf16.mxu0 %v3467_v50 }
 0x2f4   :  { %1241 = vmatpush1.bf16.msra.mxu0 %v3470_v51 }
 0x2f5   :  { %1242 = vmatprep.subr.bf16.mxu0 %v3473_v52 }
 0x2f8   :  { %1243 = vmatpush1.bf16.msra.mxu0 %v3476_v54 }
 0x2f9   :  { %1244 = vmatprep.subr.bf16.mxu0 %v3479_v55 }
 0x2fc   :  { %1245 = vmatpush1.bf16.msra.mxu0 %v3482_v56 }
 0x2fd   :  { %1246 = vmatprep.subr.bf16.mxu0 %v3485_v57 }
 0x300   :  { %1247 = vmatpush1.bf16.msra.mxu0 %v3488_v58 }
 0x301   :  { %1248 = vmatprep.subr.bf16.mxu0 %v3491_v61 }
 0x304   :  { %1249 = vmatpush1.bf16.msra.mxu0 %v3494_v20 }
 0x305   :  { %1250 = vmatprep.subr.bf16.mxu0 %v3497_v22 }
 0x308   :  { %1251 = vmatpush2.bf16.msra.mxu0 %v3500_v24 }
 0x309   :  { %1252 = vmatprep.subr.bf16.mxu0 %v3503_v26 }
 0x30c   :  { %1253 = vmatpush2.bf16.msra.mxu0 %v3506_v28 }
 0x30d   :  { %1254 = vmatprep.subr.bf16.mxu0 %v3509_v30 }
 0x310   :  { %1255 = vmatpush2.bf16.msra.mxu0 %v3512_v60 }
 0x311   :  { %1256 = vmatprep.subr.bf16.mxu0 %v4435_v12 }
 0x314   :  { %1257 = vmatpush2.bf16.msra.mxu0 %v4436_v62 }
 0x315   :  { %1258 = vmatprep.subr.bf16.mxu0 %v4437_v15 }
 0x318   :  { %1259 = vmatpush2.bf16.msra.mxu0 %v4438_v21  ;;  %v1008_v21 = vld [vmem:[#allocation3 + $0x60] sm:$0xff] }
 0x319   :  { %1260 = vmatprep.subr.bf16.mxu0 %v4439_v18  ;;  %v1009_v18 = vld [vmem:[#allocation3 + $0x68] sm:$0xff] }
 0x31c   :  { %1261 = vmatpush2.bf16.msra.mxu0 %v4440_v29 }
 0x31d   :  { %1262 = vmatprep.subr.bf16.mxu0 %v4441_v43 }
 0x320   :  { %1263 = vmatpush2.bf16.msra.mxu0 %v4442_v41 }
 0x321   :  { %1264 = vmatprep.subr.bf16.mxu0 %v4443_v14  ;;  %v1010_v14 = vld [vmem:[#allocation3 + $0x70] sm:$0xff] }
 0x324   :  { %1265 = vmatpush2.bf16.msra.mxu0 %v4444_v36  ;;  %v1011_v36 = vld [vmem:[#allocation3 + $0x78] sm:$0xff] }
 0x325   :  { %1370 = vmatprep.subr.bf16.mxu0 %v4445_v45 }
 0x367   :  { %v1050_v25 = vpop.f32.mrf.mxu0  ;;  %v1091_v49 = vpop.f32.mrf.mxu1 }
 0x368   :  { %v1098_v29 = vadd.f32 %v1050_v25, %v1008_v21  ;;  %v1112_v30 = vadd.f32 %v1091_v49, %v1010_v14  ;;  %v1012_v49 = vld [vmem:[#allocation3 + $0x80] sm:$0xff] }
 0x369   :  { %v1052_v32 = vpop.f32.mrf.mxu0  ;;  %v1093_v38 = vpop.f32.mrf.mxu1 }
 0x36a   :  { %v1099_v43 = vadd.f32 %v1052_v32, %v1009_v18  ;;  %v2193_v60 = vmul.f32 -1.442695, %v1098_v29  ;;  %v1113_v45 = vadd.f32 %v1093_v38, %v1011_v36  ;;  %v2195_v28 = vmul.f32 -1.442695, %v1112_v30  ;;  %v4446_v18 = vld [vmem:[#allocation66_spill] sm:$0xff] }
 0x36b   :  { %v1054_v63 = vpop.f32.mrf.mxu0  ;;  %v1095_v12 = vpop.f32.mrf.mxu1 }
 0x36c   :  { %v2194_v41 = vmul.f32 -1.442695, %v1099_v43  ;;  %2412 = vpow2.f32 %v2193_v60  ;;  %v2196_v26 = vmul.f32 -1.442695, %v1113_v45 }
 0x36d   :  { %v1055_v62 = vpop.f32.mrf.mxu0  ;;  %v1096_v15 = vpop.f32.mrf.mxu1 }
 0x36e   :  { %2414 = vpow2.f32 %v2194_v41 }
 0x36f   :  { %2416 = vpow2.f32 %v2195_v28 }
 0x370   :  { %2418 = vpow2.f32 %v2196_v26 }
 0x379   :  { %v2413_v24 = vpop.eup %2412 }
 0x37a   :  { %v1106_v12 = vadd.f32 1.0, %v2413_v24  ;;  %v1013_v24 = vld [vmem:[#allocation3 + $0x88] sm:$0xff] }
 0x37b   :  { %v2415_v63 = vpop.eup %2414 }
 0x37c   :  { %v1107_v62 = vadd.f32 1.0, %v2415_v63  ;;  %2420 = vrcp.f32 %v1106_v12  ;;  %v2417_v25 = vpop.eup %2416 }
 0x37d   :  { %v2419_v32 = vpop.eup %2418  ;;  %v1120_v15 = vadd.f32 1.0, %v2417_v25 }
 0x37e   :  { %2422 = vrcp.f32 %v1107_v62  ;;  %v1121_v60 = vadd.f32 1.0, %v2419_v32 }
 0x37f   :  { %2424 = vrcp.f32 %v1120_v15 }
 0x380   :  { %2426 = vrcp.f32 %v1121_v60 }
 0x389   :  { %v2421_v43 = vpop.eup %2420 }
 0x38b   :  { %v2423_v45 = vpop.eup %2422 }
 0x38c   :  { %v2425_v12 = vpop.eup %2424 }
 0x38d   :  { %v2427_v62 = vpop.eup %2426  ;;  %v1173_v25 = vsub.f32 1.0, %v2425_v12  ;;  %v1177_v15 = vmul.f32 %v2425_v12, %v3325_v53  ;;  %v3544_v53 = vld [vmem:[#allocation8 + $0x70] ss:$8 sps:$4 sm:$0xff]   ;;  %v3584_v12 = vld [vmem:[#allocation8 + $0x20] ss:$8 sps:$4 sm:$0xff]  }
 0x3a7   :  { %v1160_v21 = vpop.f32.mrf.mxu0 }
 0x3a8   :  { %v1161_v29 = vadd.f32 %v1160_v21, %v4446_v18  ;;  %v1174_v21 = vsub.f32 1.0, %v2427_v62 }
 0x3a9   :  { %v1162_v38 = vpop.f32.mrf.mxu0 }
 0x3aa   :  { %v1167_v30 = vmul.f32 %v2421_v43, %v1161_v29  ;;  %v1163_v28 = vadd.f32 %v1162_v38, %v4408_v40  ;;  %v1178_v38 = vmul.f32 %v2427_v62, %v3327_v34  ;;  %v3547_v34 = vld [vmem:[#allocation8 + $0x64] ss:$8 sps:$4 sm:$0xff]   ;;  %v3587_v62 = vld [vmem:[#allocation8 + $0x14] ss:$8 sps:$4 sm:$0xff]  }
 0x3ab   :  { %v1164_v26 = vpop.f32.mrf.mxu0 }
 0x3ac   :  { %v1169_v41 = vadd.f32 %v1167_v30, %v1012_v49  ;;  %v1168_v14 = vmul.f32 %v2423_v45, %v1163_v28  ;;  %v3555_v28 = vld [vmem:[#allocation8 + $0x54] ss:$8 sps:$4 sm:$0xff]   ;;  %v3560_v45 = vld [vmem:[#allocation8 + $0x50] ss:$8 sps:$4 sm:$0xff]  }
 0x3ad   :  { %v1165_v36 = vpop.f32.mrf.mxu0 }
 0x3ae   :  { %2428 = vtanh.f32 %v1169_v41  ;;  %v1170_v63 = vadd.f32 %v1168_v14, %v1013_v24  ;;  %v3563_v24 = vld [vmem:[#allocation8 + $0x44] ss:$8 sps:$4 sm:$0xff]   ;;  %v3568_v41 = vld [vmem:[#allocation8 + $0x40] ss:$8 sps:$4 sm:$0xff]   ;;  %v3571_v14 = vld [vmem:[#allocation8 + $0x34] ss:$8 sps:$4 sm:$0xff]  }
 0x3af   :  { %v3576_v36 = vld [vmem:[#allocation8 + $0x30] ss:$8 sps:$4 sm:$0xff]  }
 0x3b0   :  { %2430 = vtanh.f32 %v1170_v63  ;;  %v3579_v63 = vld [vmem:[#allocation8 + $0x24] ss:$8 sps:$4 sm:$0xff]  }
 0x3bb   :  { %v2429_v32 = vpop.eup %2428 }
 0x3bc   :  { %v1175_v18 = vmul.f32 %v2429_v32, %v1173_v25  ;;  %v3592_v25 = vld [vmem:[#allocation8 + $0x10] ss:$8 sps:$4 sm:$0xff]   ;;  %v3595_v32 = vld [vmem:[#allocation8 + $0x4] ss:$8 sps:$4 sm:$0xff]  }
 0x3bd   :  { %v2431_v29 = vpop.eup %2430 }
 0x3be   :  { %v1176_v43 = vmul.f32 %v2431_v29, %v1174_v21  ;;  %v3530_v26 = vadd.f32 %v1177_v15, %v1175_v18  ;;  %v3552_v18 = vld [vmem:[#allocation8 + $0x60] ss:$8 sps:$4 sm:$0xff]   ;;  %v3603_v15 = vld [vmem:[#allocation8 + $0xf4] ss:$8 sps:$4 sm:$0xff]   ;;  %v3608_v29 = vld [vmem:[#allocation8 + $0xf0] ss:$8 sps:$4 sm:$0xff]  }
 0x3bf   :  { %v3600_v21 = vld [vmem:[#allocation8] ss:$8 sps:$4 sm:$0xff]   ;;  %4447 = vst [vmem:[#allocation15_spill] sm:$0xff] %v3608_v29 }
 0x3c0   :  { %v3532_v60 = vadd.f32 %v1178_v38, %v1176_v43  ;;  %1182 = vst [vmem:[#allocation9 + $0x20] sm:$0xff] %v3530_v26  ;;  %v3540_v30 = vpack.c.bf16 %v3530_v26, %v3530_v26  ;;  %v3611_v43 = vld [vmem:[#allocation8 + $0xe4] ss:$8 sps:$4 sm:$0xff]   ;;  %v3616_v38 = vld [vmem:[#allocation8 + $0xe0] ss:$8 sps:$4 sm:$0xff]  }
 0x3c1   :  { %4448 = vst [vmem:[#allocation16_spill] sm:$0xff] %v3611_v43  ;;  %4449 = vst [vmem:[#allocation17_spill] sm:$0xff] %v3616_v38 }
 0x3c2   :  { %1183 = vst [vmem:[#allocation9 + $0x28] sm:$0xff] %v3532_v60  ;;  %v1192_v49 = vpack.c.bf16 %v3532_v60, %v3532_v60 }
 0x3c4   :  { %1225 = vmatprep.mubr.bf16.mxu1 %v1192_v49  ;;  %1266 = vmatprep.mubr.bf16.mxu0 %v1192_v49 }
 0x3c5   :  { %1226 = vmatmul.mubr.bf16.vlgmr.msra.gmra.mxu1 %v3540_v30  ;;  %1267 = vmatmul.mubr.bf16.vlgmr.msra.gmra.mxu0 %v3540_v30 }
 0x3c6   :  { %1304 = vmatpush1.bf16.msra.mxu1 %v3544_v53  ;;  %1335 = vmatprep.mubr.bf16.mxu1 %v1192_v49  ;;  %v3619_v49 = vld [vmem:[#allocation8 + $0xd4] ss:$8 sps:$4 sm:$0xff]  }
 0x3c7   :  { %1305 = vmatprep.subr.bf16.mxu1 %v3547_v34  ;;  %1371 = vmatpush1.bf16.msra.mxu0 %v3341_v37  ;;  %4450 = vst [vmem:[#allocation18_spill] sm:$0xff] %v3619_v49 }
 0x3c8   :  { %1372 = vmatprep.subr.bf16.mxu0 %v3344_v39 }
 0x3ca   :  { %1306 = vmatpush1.bf16.msra.mxu1 %v3552_v18 }
 0x3cb   :  { %1307 = vmatprep.subr.bf16.mxu1 %v3555_v28  ;;  %1373 = vmatpush1.bf16.msra.mxu0 %v3349_v23 }
 0x3cc   :  { %1374 = vmatprep.subr.bf16.mxu0 %v3352_v19 }
 0x3ce   :  { %1308 = vmatpush1.bf16.msra.mxu1 %v3560_v45 }
 0x3cf   :  { %1309 = vmatprep.subr.bf16.mxu1 %v3563_v24  ;;  %1375 = vmatpush1.bf16.msra.mxu0 %v3357_v27 }
 0x3d0   :  { %1376 = vmatprep.subr.bf16.mxu0 %v3360_v11 }
 0x3d2   :  { %1310 = vmatpush1.bf16.msra.mxu1 %v3568_v41 }
 0x3d3   :  { %1311 = vmatprep.subr.bf16.mxu1 %v3571_v14  ;;  %1377 = vmatpush1.bf16.msra.mxu0 %v3365_v1 }
 0x3d4   :  { %1378 = vmatprep.subr.bf16.mxu0 %v3368_v59 }
 0x3d6   :  { %1312 = vmatpush1.bf16.msra.mxu1 %v3576_v36 }
 0x3d7   :  { %1313 = vmatprep.subr.bf16.mxu1 %v3579_v63  ;;  %1379 = vmatpush1.bf16.msra.mxu0 %v3373_v35 }
 0x3d8   :  { %1380 = vmatprep.subr.bf16.mxu0 %v3376_v47 }
 0x3da   :  { %1314 = vmatpush1.bf16.msra.mxu1 %v3584_v12 }
 0x3db   :  { %1315 = vmatprep.subr.bf16.mxu1 %v3587_v62  ;;  %1381 = vmatpush1.bf16.msra.mxu0 %v3381_v31 }
 0x3dc   :  { %1382 = vmatprep.subr.bf16.mxu0 %v3384_v33 }
 0x3de   :  { %1316 = vmatpush1.bf16.msra.mxu1 %v3592_v25 }
 0x3df   :  { %1317 = vmatprep.subr.bf16.mxu1 %v3595_v32  ;;  %1383 = vmatpush1.bf16.msra.mxu0 %v3389_v3 }
 0x3e0   :  { %1384 = vmatprep.subr.bf16.mxu0 %v3392_v4 }
 0x3e2   :  { %1318 = vmatpush1.bf16.msra.mxu1 %v3600_v21 }
 0x3e3   :  { %1319 = vmatprep.subr.bf16.mxu1 %v3603_v15  ;;  %1385 = vmatpush1.bf16.msra.mxu0 %v3397_v5 }
 0x3e4   :  { %1386 = vmatprep.subr.bf16.mxu0 %v3400_v6 }
 0x3e6   :  { %1320 = vmatpush2.bf16.msra.mxu1 %v3608_v29  ;;  %v3624_v29 = vld [vmem:[#allocation8 + $0xd0] ss:$8 sps:$4 sm:$0xff]  }
 0x3e7   :  { %1321 = vmatprep.subr.bf16.mxu1 %v3611_v43  ;;  %1387 = vmatpush2.bf16.msra.mxu0 %v3405_v7  ;;  %4451 = vst [vmem:[#allocation19_spill] sm:$0xff] %v3624_v29  ;;  %v3627_v43 = vld [vmem:[#allocation8 + $0xc4] ss:$8 sps:$4 sm:$0xff]  }
 0x3e8   :  { %1388 = vmatprep.subr.bf16.mxu0 %v3408_v8  ;;  %4452 = vst [vmem:[#allocation20_spill] sm:$0xff] %v3627_v43 }
 0x3ea   :  { %1322 = vmatpush2.bf16.msra.mxu1 %v3616_v38  ;;  %v3632_v38 = vld [vmem:[#allocation8 + $0xc0] ss:$8 sps:$4 sm:$0xff]  }
 0x3eb   :  { %1323 = vmatprep.subr.bf16.mxu1 %v3619_v49  ;;  %1389 = vmatpush2.bf16.msra.mxu0 %v3413_v9  ;;  %4453 = vst [vmem:[#allocation21_spill] sm:$0xff] %v3632_v38  ;;  %v3635_v49 = vld [vmem:[#allocation8 + $0xb4] ss:$8 sps:$4 sm:$0xff]  }
 0x3ec   :  { %1390 = vmatprep.subr.bf16.mxu0 %v3416_v10  ;;  %4454 = vst [vmem:[#allocation22_spill] sm:$0xff] %v3635_v49  ;;  %v3639_v10 = vld [vmem:[#allocation6 + $0x164] ss:$16 sps:$4 sm:$0xff]  }
 0x3ed   :  { %4455 = vst [vmem:[#allocation23_spill] sm:$0xff] %v3639_v10 }
 0x3ee   :  { %1324 = vmatpush2.bf16.msra.mxu1 %v3624_v29  ;;  %v3642_v29 = vld [vmem:[#allocation8 + $0xb0] ss:$8 sps:$4 sm:$0xff]  }
 0x3ef   :  { %1325 = vmatprep.subr.bf16.mxu1 %v3627_v43  ;;  %1391 = vmatpush2.bf16.msra.mxu0 %v3421_v13  ;;  %4456 = vst [vmem:[#allocation24_spill] sm:$0xff] %v3642_v29  ;;  %v3645_v13 = vld [vmem:[#allocation8 + $0xa4] ss:$8 sps:$4 sm:$0xff]  }
 0x3f0   :  { %1392 = vmatprep.subr.bf16.mxu0 %v3424_v16  ;;  %4457 = vst [vmem:[#allocation25_spill] sm:$0xff] %v3645_v13  ;;  %v3648_v16 = vld [vmem:[#allocation6 + $0x160] ss:$16 sps:$4 sm:$0xff]  }
 0x3f1   :  { %4458 = vst [vmem:[#allocation26_spill] sm:$0xff] %v3648_v16 }
 0x3f2   :  { %1326 = vmatpush2.bf16.msra.mxu1 %v3632_v38  ;;  %v3651_v38 = vld [vmem:[#allocation6 + $0x144] ss:$16 sps:$4 sm:$0xff]  }
 0x3f3   :  { %1327 = vmatprep.subr.bf16.mxu1 %v3635_v49  ;;  %1393 = vmatpush2.bf16.msra.mxu0 %v3429_v17  ;;  %4459 = vst [vmem:[#allocation27_spill] sm:$0xff] %v3651_v38  ;;  %v3654_v17 = vld [vmem:[#allocation8 + $0xa0] ss:$8 sps:$4 sm:$0xff]  }
 0x3f4   :  { %1394 = vmatprep.subr.bf16.mxu0 %v3639_v10  ;;  %4460 = vst [vmem:[#allocation28_spill] sm:$0xff] %v3654_v17  ;;  %v3657_v10 = vld [vmem:[#allocation8 + $0x94] ss:$8 sps:$4 sm:$0xff]  }
 0x3f5   :  { %4461 = vst [vmem:[#allocation29_spill] sm:$0xff] %v3657_v10 }
 0x3f6   :  { %1328 = vmatpush2.bf16.msra.mxu1 %v3642_v29  ;;  %v3660_v29 = vld [vmem:[#allocation6 + $0x140] ss:$16 sps:$4 sm:$0xff]  }
 0x3f7   :  { %1329 = vmatprep.subr.bf16.mxu1 %v3645_v13  ;;  %1395 = vmatpush2.bf16.msra.mxu0 %v3648_v16  ;;  %4462 = vst [vmem:[#allocation30_spill] sm:$0xff] %v3660_v29  ;;  %v3663_v13 = vld [vmem:[#allocation6 + $0x124] ss:$16 sps:$4 sm:$0xff]   ;;  %v3666_v16 = vld [vmem:[#allocation8 + $0x90] ss:$8 sps:$4 sm:$0xff]  }
 0x3f8   :  { %1396 = vmatprep.subr.bf16.mxu0 %v3651_v38  ;;  %4463 = vst [vmem:[#allocation67_spill] sm:$0xff] %v3663_v13  ;;  %4464 = vst [vmem:[#allocation31_spill] sm:$0xff] %v3666_v16  ;;  %v3669_v38 = vld [vmem:[#allocation8 + $0x84] ss:$8 sps:$4 sm:$0xff]  }
 0x3f9   :  { %4465 = vst [vmem:[#allocation32_spill] sm:$0xff] %v3669_v38 }
 0x3fa   :  { %1330 = vmatpush2.bf16.msra.mxu1 %v3654_v17  ;;  %v3672_v17 = vld [vmem:[#allocation6 + $0x120] ss:$16 sps:$4 sm:$0xff]  }
 0x3fb   :  { %1331 = vmatprep.subr.bf16.mxu1 %v3657_v10  ;;  %1397 = vmatpush2.bf16.msra.mxu0 %v3660_v29  ;;  %4466 = vst [vmem:[#allocation33_spill] sm:$0xff] %v3672_v17  ;;  %v3675_v10 = vld [vmem:[#allocation6 + $0x104] ss:$16 sps:$4 sm:$0xff]   ;;  %v3678_v29 = vld [vmem:[#allocation8 + $0x80] ss:$8 sps:$4 sm:$0xff]  }
 0x3fc   :  { %1398 = vmatprep.subr.bf16.mxu0 %v3663_v13  ;;  %4467 = vst [vmem:[#allocation34_spill] sm:$0xff] %v3675_v10  ;;  %4468 = vst [vmem:[#allocation36_spill] sm:$0xff] %v3678_v29  ;;  %v3682_v13 = vld [vmem:[#allocation6 + $0x100] ss:$16 sps:$4 sm:$0xff]  }
 0x3fd   :  { %4469 = vst [vmem:[#allocation38_spill] sm:$0xff] %v3682_v13 }
 0x3fe   :  { %1332 = vmatpush2.bf16.msra.mxu1 %v3666_v16  ;;  %v3685_v16 = vld [vmem:[#allocation8 + $0x74] ss:$8 sps:$4 sm:$0xff]  }
 0x3ff   :  { %1333 = vmatprep.subr.bf16.mxu1 %v3669_v38  ;;  %1399 = vmatpush2.bf16.msra.mxu0 %v3672_v17  ;;  %4470 = vst [vmem:[#allocation40_spill] sm:$0xff] %v3685_v16 }
 0x400   :  { %1400 = vmatprep.subr.bf16.mxu0 %v3675_v10 }
 0x402   :  { %1334 = vmatpush2.bf16.msra.mxu1 %v3678_v29 }
 0x403   :  { %1411 = vmatprep.subr.bf16.mxu1 %v3446_v2  ;;  %1401 = vmatpush2.bf16.msra.mxu0 %v3682_v13 }
 0x404   :  { %1480 = vmatprep.subr.bf16.mxu0 %v3685_v16 }
 0x405   :  { %1336 = vmatmul.mubr.bf16.vlgmr.msra.gmra.mxu1 %v3540_v30  ;;  %v4471_v30 = vld [vmem:[#allocation62_spill] sm:$0xff] }
 0x406   :  { %1412 = vmatpush1.bf16.msra.mxu1 %v3452_v42  ;;  %v1187_v42 = vld [vmem:[#allocation3 + $0xa0] sm:$0xff] }
 0x407   :  { %1413 = vmatprep.subr.bf16.mxu1 %v3455_v0 }
 0x40a   :  { %1414 = vmatpush1.bf16.msra.mxu1 %v3458_v44 }
 0x40b   :  { %1415 = vmatprep.subr.bf16.mxu1 %v3461_v46 }
 0x40e   :  { %1416 = vmatpush1.bf16.msra.mxu1 %v3464_v48  ;;  %v1185_v48 = vld [vmem:[#allocation3 + $0x90] sm:$0xff] }
 0x40f   :  { %1417 = vmatprep.subr.bf16.mxu1 %v3467_v50 }
 0x412   :  { %1418 = vmatpush1.bf16.msra.mxu1 %v3470_v51  ;;  %v4472_v51 = vld [vmem:[#allocation63_spill] sm:$0xff] }
 0x413   :  { %1419 = vmatprep.subr.bf16.mxu1 %v3473_v52  ;;  %v4473_v52 = vld [vmem:[#allocation64_spill] sm:$0xff] }
 0x416   :  { %1420 = vmatpush1.bf16.msra.mxu1 %v3476_v54  ;;  %v4474_v54 = vld [vmem:[#allocation65_spill] sm:$0xff] }
 0x417   :  { %1421 = vmatprep.subr.bf16.mxu1 %v3479_v55  ;;  %v4475_v55 = vld [vmem:[#allocation14_spill] sm:$0xff] }
 0x41a   :  { %1422 = vmatpush1.bf16.msra.mxu1 %v3482_v56  ;;  %v3710_v56 = vld [vmem:[#allocation6 + $0x18c] ss:$16 sps:$4 sm:$0xff]  }
 0x41b   :  { %1423 = vmatprep.subr.bf16.mxu1 %v3485_v57  ;;  %4476 = vst [vmem:[#allocation42_spill] sm:$0xff] %v3710_v56 }
 0x41e   :  { %1424 = vmatpush1.bf16.msra.mxu1 %v3488_v58  ;;  %v3713_v58 = vld [vmem:[#allocation6 + $0x188] ss:$16 sps:$4 sm:$0xff]  }
 0x41f   :  { %1425 = vmatprep.subr.bf16.mxu1 %v3491_v61  ;;  %4477 = vst [vmem:[#allocation44_spill] sm:$0xff] %v3713_v58 }
 0x422   :  { %1426 = vmatpush1.bf16.msra.mxu1 %v3494_v20  ;;  %v3716_v20 = vld [vmem:[#allocation6 + $0x16c] ss:$16 sps:$4 sm:$0xff]  }
 0x423   :  { %1427 = vmatprep.subr.bf16.mxu1 %v3497_v22  ;;  %4478 = vst [vmem:[#allocation46_spill] sm:$0xff] %v3716_v20 }
 0x426   :  { %1428 = vmatpush2.bf16.msra.mxu1 %v4471_v30  ;;  %v3719_v30 = vld [vmem:[#allocation6 + $0x168] ss:$16 sps:$4 sm:$0xff]  }
 0x427   :  { %1429 = vmatprep.subr.bf16.mxu1 %v4472_v51  ;;  %4479 = vst [vmem:[#allocation68_spill] sm:$0xff] %v3719_v30 }
 0x42a   :  { %1430 = vmatpush2.bf16.msra.mxu1 %v4473_v52  ;;  %v3722_v52 = vld [vmem:[#allocation6 + $0x14c] ss:$16 sps:$4 sm:$0xff]  }
 0x42b   :  { %1431 = vmatprep.subr.bf16.mxu1 %v4474_v54  ;;  %4480 = vst [vmem:[#allocation69_spill] sm:$0xff] %v3722_v52 }
 0x42e   :  { %1432 = vmatpush2.bf16.msra.mxu1 %v4475_v55  ;;  %v3725_v55 = vld [vmem:[#allocation6 + $0x148] ss:$16 sps:$4 sm:$0xff]  }
 0x42f   :  { %1433 = vmatprep.subr.bf16.mxu1 %v3710_v56  ;;  %4481 = vst [vmem:[#allocation70_spill] sm:$0xff] %v3725_v55  ;;  %v3728_v56 = vld [vmem:[#allocation6 + $0x12c] ss:$16 sps:$4 sm:$0xff]  }
 0x430   :  { %4482 = vst [vmem:[#allocation71_spill] sm:$0xff] %v3728_v56 }
 0x432   :  { %1434 = vmatpush2.bf16.msra.mxu1 %v3713_v58  ;;  %v3731_v58 = vld [vmem:[#allocation6 + $0x128] ss:$16 sps:$4 sm:$0xff]  }
 0x433   :  { %1435 = vmatprep.subr.bf16.mxu1 %v3716_v20  ;;  %4483 = vst [vmem:[#allocation72_spill] sm:$0xff] %v3731_v58  ;;  %v3734_v20 = vld [vmem:[#allocation6 + $0x10c] ss:$16 sps:$4 sm:$0xff]  }
 0x434   :  { %4484 = vst [vmem:[#allocation73_spill] sm:$0xff] %v3734_v20 }
 0x436   :  { %1436 = vmatpush2.bf16.msra.mxu1 %v3719_v30  ;;  %v3737_v30 = vld [vmem:[#allocation6 + $0x108] ss:$16 sps:$4 sm:$0xff]  }
 0x437   :  { %1437 = vmatprep.subr.bf16.mxu1 %v3722_v52  ;;  %4485 = vst [vmem:[#allocation74_spill] sm:$0xff] %v3737_v30  ;;  %v4486_v52 = vld [vmem:[#allocation35_spill] sm:$0xff] }
 0x43a   :  { %1438 = vmatpush2.bf16.msra.mxu1 %v3725_v55 }
 0x43b   :  { %1439 = vmatprep.subr.bf16.mxu1 %v3728_v56 }
 0x43e   :  { %1440 = vmatpush2.bf16.msra.mxu1 %v3731_v58  ;;  %v1186_v58 = vld [vmem:[#allocation3 + $0x98] sm:$0xff] }
 0x43f   :  { %1441 = vmatprep.subr.bf16.mxu1 %v3734_v20 }
 0x442   :  { %1442 = vmatpush2.bf16.msra.mxu1 %v3737_v30  ;;  %v1188_v30 = vld [vmem:[#allocation3 + $0xa8] sm:$0xff] }
 0x443   :  { %1547 = vmatprep.subr.bf16.mxu1 %v4486_v52 }
 0x485   :  { %v1227_v54 = vpop.f32.mrf.mxu1  ;;  %v1268_v55 = vpop.f32.mrf.mxu0 }
 0x486   :  { %v1275_v46 = vadd.f32 %v1227_v54, %v1185_v48  ;;  %v1289_v16 = vadd.f32 %v1268_v55, %v1187_v42  ;;  %v4487_v54 = vld [vmem:[#allocation66_spill] sm:$0xff]  ;;  %v1189_v42 = vld [vmem:[#allocation3 + $0xb0] sm:$0xff] }
 0x487   :  { %v1229_v51 = vpop.f32.mrf.mxu1  ;;  %v1270_v22 = vpop.f32.mrf.mxu0 }
 0x488   :  { %v1276_v44 = vadd.f32 %v1229_v51, %v1186_v58  ;;  %v2197_v0 = vmul.f32 -1.442695, %v1275_v46  ;;  %v1290_v52 = vadd.f32 %v1270_v22, %v1188_v30  ;;  %v2199_v13 = vmul.f32 -1.442695, %v1289_v16 }
 0x489   :  { %v1231_v61 = vpop.f32.mrf.mxu1  ;;  %v1272_v56 = vpop.f32.mrf.mxu0 }
 0x48a   :  { %v2198_v20 = vmul.f32 -1.442695, %v1276_v44  ;;  %2432 = vpow2.f32 %v2197_v0  ;;  %v2200_v2 = vmul.f32 -1.442695, %v1290_v52 }
 0x48b   :  { %v1232_v57 = vpop.f32.mrf.mxu1  ;;  %v1273_v50 = vpop.f32.mrf.mxu0 }
 0x48c   :  { %2434 = vpow2.f32 %v2198_v20  ;;  %v1190_v20 = vld [vmem:[#allocation3 + $0xb8] sm:$0xff] }
 0x48d   :  { %2436 = vpow2.f32 %v2199_v13 }
 0x48e   :  { %2438 = vpow2.f32 %v2200_v2 }
 0x497   :  { %v2433_v29 = vpop.eup %2432 }
 0x498   :  { %v1283_v56 = vadd.f32 1.0, %v2433_v29 }
 0x499   :  { %v2435_v61 = vpop.eup %2434 }
 0x49a   :  { %v1284_v50 = vadd.f32 1.0, %v2435_v61  ;;  %2440 = vrcp.f32 %v1283_v56  ;;  %v2437_v48 = vpop.eup %2436 }
 0x49b   :  { %v2439_v51 = vpop.eup %2438  ;;  %v1297_v46 = vadd.f32 1.0, %v2437_v48 }
 0x49c   :  { %2442 = vrcp.f32 %v1284_v50  ;;  %v1298_v0 = vadd.f32 1.0, %v2439_v51 }
 0x49d   :  { %2444 = vrcp.f32 %v1297_v46 }
 0x49e   :  { %2446 = vrcp.f32 %v1298_v0 }
 0x4a7   :  { %v2441_v58 = vpop.eup %2440 }
 0x4a9   :  { %v2443_v52 = vpop.eup %2442 }
 0x4aa   :  { %v2445_v56 = vpop.eup %2444 }
 0x4ab   :  { %v2447_v50 = vpop.eup %2446  ;;  %v1350_v48 = vsub.f32 1.0, %v2445_v56  ;;  %v1354_v46 = vmul.f32 %v2445_v56, %v3530_v26  ;;  %v4488_v26 = vld [vmem:[#allocation15_spill] sm:$0xff] }
 0x4ac   :  { %v4498_v56 = vld [vmem:[#allocation23_spill] sm:$0xff] }
 0x4c5   :  { %v1337_v44 = vpop.f32.mrf.mxu1 }
 0x4c6   :  { %v1338_v57 = vadd.f32 %v1337_v44, %v4487_v54  ;;  %v1351_v44 = vsub.f32 1.0, %v2447_v50 }
 0x4c7   :  { %v1339_v55 = vpop.f32.mrf.mxu1 }
 0x4c8   :  { %v1344_v16 = vmul.f32 %v2441_v58, %v1338_v57  ;;  %v1340_v13 = vadd.f32 %v1339_v55, %v4408_v40  ;;  %v1355_v55 = vmul.f32 %v2447_v50, %v3532_v60  ;;  %v4489_v60 = vld [vmem:[#allocation16_spill] sm:$0xff] }
 0x4c9   :  { %v1341_v2 = vpop.f32.mrf.mxu1  ;;  %v4499_v50 = vld [vmem:[#allocation24_spill] sm:$0xff] }
 0x4ca   :  { %v1346_v22 = vadd.f32 %v1344_v16, %v1189_v42  ;;  %v1345_v29 = vmul.f32 %v2443_v52, %v1340_v13  ;;  %v4491_v13 = vld [vmem:[#allocation18_spill] sm:$0xff]  ;;  %v4492_v52 = vld [vmem:[#allocation37_spill] sm:$0xff] }
 0x4cb   :  { %v1342_v30 = vpop.f32.mrf.mxu1 }
 0x4cc   :  { %2448 = vtanh.f32 %v1346_v22  ;;  %v1347_v61 = vadd.f32 %v1345_v29, %v1190_v20  ;;  %v4493_v20 = vld [vmem:[#allocation19_spill] sm:$0xff]  ;;  %v4494_v22 = vld [vmem:[#allocation13_spill] sm:$0xff] }
 0x4cd   :  { %v4495_v29 = vld [vmem:[#allocation39_spill] sm:$0xff]  ;;  %v4496_v30 = vld [vmem:[#allocation21_spill] sm:$0xff] }
 0x4ce   :  { %2450 = vtanh.f32 %v1347_v61  ;;  %v4497_v61 = vld [vmem:[#allocation41_spill] sm:$0xff] }
 0x4d9   :  { %v2449_v51 = vpop.eup %2448 }
 0x4da   :  { %v1352_v54 = vmul.f32 %v2449_v51, %v1350_v48  ;;  %v4500_v48 = vld [vmem:[#allocation25_spill] sm:$0xff]  ;;  %v4501_v51 = vld [vmem:[#allocation26_spill] sm:$0xff] }
 0x4db   :  { %v2451_v57 = vpop.eup %2450 }
 0x4dc   :  { %v1353_v58 = vmul.f32 %v2451_v57, %v1351_v44  ;;  %v3745_v2 = vadd.f32 %v1354_v46, %v1352_v54  ;;  %v4490_v54 = vld [vmem:[#allocation17_spill] sm:$0xff]  ;;  %v4502_v44 = vld [vmem:[#allocation27_spill] sm:$0xff]  ;;  %v4503_v46 = vld [vmem:[#allocation28_spill] sm:$0xff] }
 0x4dd   :  { %v4504_v57 = vld [vmem:[#allocation29_spill] sm:$0xff] }
 0x4de   :  { %v3747_v0 = vadd.f32 %v1355_v55, %v1353_v58  ;;  %1359 = vst [vmem:[#allocation9 + $0x30] sm:$0xff] %v3745_v2  ;;  %v3755_v16 = vpack.c.bf16 %v3745_v2, %v3745_v2  ;;  %v4505_v58 = vld [vmem:[#allocation30_spill] sm:$0xff]  ;;  %v4506_v55 = vld [vmem:[#allocation67_spill] sm:$0xff] }
 0x4e0   :  { %1360 = vst [vmem:[#allocation9 + $0x38] sm:$0xff] %v3747_v0  ;;  %v1369_v42 = vpack.c.bf16 %v3747_v0, %v3747_v0 }
 0x4e2   :  { %1402 = vmatprep.mubr.bf16.mxu0 %v1369_v42  ;;  %1443 = vmatprep.mubr.bf16.mxu1 %v1369_v42 }
 0x4e3   :  { %1403 = vmatmul.mubr.bf16.vlgmr.msra.gmra.mxu0 %v3755_v16  ;;  %1444 = vmatmul.mubr.bf16.vlgmr.msra.gmra.mxu1 %v3755_v16 }
 0x4e4   :  { %1481 = vmatpush1.bf16.msra.mxu0 %v3544_v53  ;;  %1512 = vmatprep.mubr.bf16.mxu0 %v1369_v42  ;;  %v4507_v42 = vld [vmem:[#allocation31_spill] sm:$0xff] }
 0x4e5   :  { %1482 = vmatprep.subr.bf16.mxu0 %v3547_v34  ;;  %1548 = vmatpush1.bf16.msra.mxu1 %v3341_v37 }
 0x4e6   :  { %1549 = vmatprep.subr.bf16.mxu1 %v3344_v39 }
 0x4e8   :  { %1483 = vmatpush1.bf16.msra.mxu0 %v3552_v18 }
 0x4e9   :  { %1484 = vmatprep.subr.bf16.mxu0 %v3555_v28  ;;  %1550 = vmatpush1.bf16.msra.mxu1 %v3349_v23 }
 0x4ea   :  { %1551 = vmatprep.subr.bf16.mxu1 %v3352_v19 }
 0x4ec   :  { %1485 = vmatpush1.bf16.msra.mxu0 %v3560_v45 }
 0x4ed   :  { %1486 = vmatprep.subr.bf16.mxu0 %v3563_v24  ;;  %1552 = vmatpush1.bf16.msra.mxu1 %v3357_v27 }
 0x4ee   :  { %1553 = vmatprep.subr.bf16.mxu1 %v3360_v11 }
 0x4f0   :  { %1487 = vmatpush1.bf16.msra.mxu0 %v3568_v41 }
 0x4f1   :  { %1488 = vmatprep.subr.bf16.mxu0 %v3571_v14  ;;  %1554 = vmatpush1.bf16.msra.mxu1 %v3365_v1 }
 0x4f2   :  { %1555 = vmatprep.subr.bf16.mxu1 %v3368_v59 }
 0x4f4   :  { %1489 = vmatpush1.bf16.msra.mxu0 %v3576_v36 }
 0x4f5   :  { %1490 = vmatprep.subr.bf16.mxu0 %v3579_v63  ;;  %1556 = vmatpush1.bf16.msra.mxu1 %v3373_v35 }
 0x4f6   :  { %1557 = vmatprep.subr.bf16.mxu1 %v3376_v47 }
 0x4f8   :  { %1491 = vmatpush1.bf16.msra.mxu0 %v3584_v12 }
 0x4f9   :  { %1492 = vmatprep.subr.bf16.mxu0 %v3587_v62  ;;  %1558 = vmatpush1.bf16.msra.mxu1 %v3381_v31 }
 0x4fa   :  { %1559 = vmatprep.subr.bf16.mxu1 %v3384_v33 }
 0x4fc   :  { %1493 = vmatpush1.bf16.msra.mxu0 %v3592_v25 }
 0x4fd   :  { %1494 = vmatprep.subr.bf16.mxu0 %v3595_v32  ;;  %1560 = vmatpush1.bf16.msra.mxu1 %v3389_v3 }
 0x4fe   :  { %1561 = vmatprep.subr.bf16.mxu1 %v3392_v4 }
 0x500   :  { %1495 = vmatpush1.bf16.msra.mxu0 %v3600_v21 }
 0x501   :  { %1496 = vmatprep.subr.bf16.mxu0 %v3603_v15  ;;  %1562 = vmatpush1.bf16.msra.mxu1 %v3397_v5 }
 0x502   :  { %1563 = vmatprep.subr.bf16.mxu1 %v3400_v6 }
 0x504   :  { %1497 = vmatpush2.bf16.msra.mxu0 %v4488_v26 }
 0x505   :  { %1498 = vmatprep.subr.bf16.mxu0 %v4489_v60  ;;  %1564 = vmatpush2.bf16.msra.mxu1 %v3405_v7 }
 0x506   :  { %1565 = vmatprep.subr.bf16.mxu1 %v3408_v8 }
 0x508   :  { %1499 = vmatpush2.bf16.msra.mxu0 %v4490_v54 }
 0x509   :  { %1500 = vmatprep.subr.bf16.mxu0 %v4491_v13  ;;  %1566 = vmatpush2.bf16.msra.mxu1 %v3413_v9 }
 0x50a   :  { %1567 = vmatprep.subr.bf16.mxu1 %v4492_v52 }
 0x50c   :  { %1501 = vmatpush2.bf16.msra.mxu0 %v4493_v20 }
 0x50d   :  { %1502 = vmatprep.subr.bf16.mxu0 %v3627_v43  ;;  %1568 = vmatpush2.bf16.msra.mxu1 %v4494_v22 }
 0x50e   :  { %1569 = vmatprep.subr.bf16.mxu1 %v4495_v29 }
 0x510   :  { %1503 = vmatpush2.bf16.msra.mxu0 %v4496_v30 }
 0x511   :  { %1504 = vmatprep.subr.bf16.mxu0 %v3635_v49  ;;  %1570 = vmatpush2.bf16.msra.mxu1 %v4497_v61  ;;  %v1362_v61 = vld [vmem:[#allocation3 + $0xc0] sm:$0xff] }
 0x512   :  { %1571 = vmatprep.subr.bf16.mxu1 %v4498_v56 }
 0x514   :  { %1505 = vmatpush2.bf16.msra.mxu0 %v4499_v50 }
 0x515   :  { %1506 = vmatprep.subr.bf16.mxu0 %v4500_v48  ;;  %1572 = vmatpush2.bf16.msra.mxu1 %v4501_v51  ;;  %v4508_v48 = vld [vmem:[#allocation36_spill] sm:$0xff]  ;;  %v4509_v51 = vld [vmem:[#allocation43_spill] sm:$0xff] }
 0x516   :  { %1573 = vmatprep.subr.bf16.mxu1 %v4502_v44  ;;  %v4510_v44 = vld [vmem:[#allocation38_spill] sm:$0xff] }
 0x518   :  { %1507 = vmatpush2.bf16.msra.mxu0 %v4503_v46  ;;  %v4511_v46 = vld [vmem:[#allocation40_spill] sm:$0xff] }
 0x519   :  { %1508 = vmatprep.subr.bf16.mxu0 %v4504_v57  ;;  %1574 = vmatpush2.bf16.msra.mxu1 %v4505_v58  ;;  %v4512_v58 = vld [vmem:[#allocation45_spill] sm:$0xff] }
 0x51a   :  { %1575 = vmatprep.subr.bf16.mxu1 %v4506_v55  ;;  %v4513_v55 = vld [vmem:[#allocation47_spill] sm:$0xff] }
 0x51c   :  { %1509 = vmatpush2.bf16.msra.mxu0 %v4507_v42  ;;  %v4514_v42 = vld [vmem:[#allocation48_spill] sm:$0xff] }
 0x51d   :  { %1510 = vmatprep.subr.bf16.mxu0 %v3669_v38  ;;  %1576 = vmatpush2.bf16.msra.mxu1 %v3672_v17  ;;  %v4515_v38 = vld [vmem:[#allocation49_spill] sm:$0xff]  ;;  %v4516_v17 = vld [vmem:[#allocation50_spill] sm:$0xff] }
 0x51e   :  { %1577 = vmatprep.subr.bf16.mxu1 %v3675_v10  ;;  %v4517_v10 = vld [vmem:[#allocation51_spill] sm:$0xff] }
 0x520   :  { %1511 = vmatpush2.bf16.msra.mxu0 %v4508_v48  ;;  %v4518_v48 = vld [vmem:[#allocation52_spill] sm:$0xff] }
 0x521   :  { %1588 = vmatprep.subr.bf16.mxu0 %v4509_v51  ;;  %1578 = vmatpush2.bf16.msra.mxu1 %v4510_v44  ;;  %v4519_v51 = vld [vmem:[#allocation53_spill] sm:$0xff]  ;;  %v4520_v44 = vld [vmem:[#allocation54_spill] sm:$0xff] }
 0x522   :  { %1657 = vmatprep.subr.bf16.mxu1 %v4511_v46  ;;  %v4521_v46 = vld [vmem:[#allocation55_spill] sm:$0xff] }
 0x523   :  { %1513 = vmatmul.mubr.bf16.vlgmr.msra.gmra.mxu0 %v3755_v16  ;;  %v4522_v16 = vld [vmem:[#allocation56_spill] sm:$0xff] }
 0x524   :  { %1589 = vmatpush1.bf16.msra.mxu0 %v4512_v58  ;;  %v4523_v58 = vld [vmem:[#allocation57_spill] sm:$0xff] }
 0x525   :  { %1590 = vmatprep.subr.bf16.mxu0 %v4513_v55  ;;  %v4524_v55 = vld [vmem:[#allocation58_spill] sm:$0xff] }
 0x528   :  { %1591 = vmatpush1.bf16.msra.mxu0 %v4514_v42  ;;  %v4525_v42 = vld [vmem:[#allocation59_spill] sm:$0xff] }
 0x529   :  { %1592 = vmatprep.subr.bf16.mxu0 %v4515_v38  ;;  %v4526_v38 = vld [vmem:[#allocation60_spill] sm:$0xff] }
 0x52c   :  { %1593 = vmatpush1.bf16.msra.mxu0 %v4516_v17  ;;  %v4527_v17 = vld [vmem:[#allocation61_spill] sm:$0xff] }
 0x52d   :  { %1594 = vmatprep.subr.bf16.mxu0 %v4517_v10  ;;  %v4528_v10 = vld [vmem:[#allocation62_spill] sm:$0xff] }
 0x530   :  { %1595 = vmatpush1.bf16.msra.mxu0 %v4518_v48  ;;  %v4529_v48 = vld [vmem:[#allocation63_spill] sm:$0xff] }
 0x531   :  { %1596 = vmatprep.subr.bf16.mxu0 %v4519_v51  ;;  %v4530_v51 = vld [vmem:[#allocation64_spill] sm:$0xff] }
 0x534   :  { %1597 = vmatpush1.bf16.msra.mxu0 %v4520_v44  ;;  %v4531_v44 = vld [vmem:[#allocation65_spill] sm:$0xff] }
 0x535   :  { %1598 = vmatprep.subr.bf16.mxu0 %v4521_v46  ;;  %v4532_v46 = vld [vmem:[#allocation14_spill] sm:$0xff] }
 0x538   :  { %1599 = vmatpush1.bf16.msra.mxu0 %v4522_v16  ;;  %v4533_v16 = vld [vmem:[#allocation42_spill] sm:$0xff] }
 0x539   :  { %1600 = vmatprep.subr.bf16.mxu0 %v4523_v58  ;;  %v4534_v58 = vld [vmem:[#allocation44_spill] sm:$0xff] }
 0x53c   :  { %1601 = vmatpush1.bf16.msra.mxu0 %v4524_v55  ;;  %v4535_v55 = vld [vmem:[#allocation46_spill] sm:$0xff] }
 0x53d   :  { %1602 = vmatprep.subr.bf16.mxu0 %v4525_v42  ;;  %v4536_v42 = vld [vmem:[#allocation68_spill] sm:$0xff] }
 0x540   :  { %1603 = vmatpush1.bf16.msra.mxu0 %v4526_v38  ;;  %v4537_v38 = vld [vmem:[#allocation69_spill] sm:$0xff] }
 0x541   :  { %1604 = vmatprep.subr.bf16.mxu0 %v4527_v17  ;;  %v4538_v17 = vld [vmem:[#allocation70_spill] sm:$0xff] }
 0x544   :  { %1605 = vmatpush2.bf16.msra.mxu0 %v4528_v10  ;;  %v4539_v10 = vld [vmem:[#allocation71_spill] sm:$0xff] }
 0x545   :  { %1606 = vmatprep.subr.bf16.mxu0 %v4529_v48  ;;  %v4540_v48 = vld [vmem:[#allocation72_spill] sm:$0xff] }
 0x548   :  { %1607 = vmatpush2.bf16.msra.mxu0 %v4530_v51  ;;  %v4541_v51 = vld [vmem:[#allocation73_spill] sm:$0xff] }
 0x549   :  { %1608 = vmatprep.subr.bf16.mxu0 %v4531_v44  ;;  %v4542_v44 = vld [vmem:[#allocation74_spill] sm:$0xff] }
 0x54c   :  { %1609 = vmatpush2.bf16.msra.mxu0 %v4532_v46  ;;  %v4543_v46 = vld [vmem:[#allocation35_spill] sm:$0xff] }
 0x54d   :  { %1610 = vmatprep.subr.bf16.mxu0 %v4533_v16 }
 0x550   :  { %1611 = vmatpush2.bf16.msra.mxu0 %v4534_v58 }
 0x551   :  { %1612 = vmatprep.subr.bf16.mxu0 %v4535_v55 }
 0x554   :  { %1613 = vmatpush2.bf16.msra.mxu0 %v4536_v42 }
 0x555   :  { %1614 = vmatprep.subr.bf16.mxu0 %v4537_v38 }
 0x558   :  { %1615 = vmatpush2.bf16.msra.mxu0 %v4538_v17  ;;  %v1363_v17 = vld [vmem:[#allocation3 + $0xc8] sm:$0xff] }
 0x559   :  { %1616 = vmatprep.subr.bf16.mxu0 %v4539_v10 }
 0x55c   :  { %1617 = vmatpush2.bf16.msra.mxu0 %v4540_v48 }
 0x55d   :  { %1618 = vmatprep.subr.bf16.mxu0 %v4541_v51  ;;  %v1364_v51 = vld [vmem:[#allocation3 + $0xd0] sm:$0xff] }
 0x560   :  { %1619 = vmatpush2.bf16.msra.mxu0 %v4542_v44  ;;  %v1365_v44 = vld [vmem:[#allocation3 + $0xd8] sm:$0xff] }
 0x561   :  { %1724 = vmatprep.subr.bf16.mxu0 %v4543_v46 }
 0x5a3   :  { %v1404_v16 = vpop.f32.mrf.mxu0  ;;  %v1445_v58 = vpop.f32.mrf.mxu1 }
 0x5a4   :  { %v1452_v49 = vadd.f32 %v1404_v16, %v1362_v61  ;;  %v1466_v29 = vadd.f32 %v1445_v58, %v1364_v51  ;;  %v1366_v51 = vld [vmem:[#allocation3 + $0xe0] sm:$0xff] }
 0x5a5   :  { %v1406_v57 = vpop.f32.mrf.mxu0  ;;  %v1447_v55 = vpop.f32.mrf.mxu1 }
 0x5a6   :  { %v1453_v10 = vadd.f32 %v1406_v57, %v1363_v17  ;;  %v2201_v30 = vmul.f32 -1.442695, %v1452_v49  ;;  %v1467_v46 = vadd.f32 %v1447_v55, %v1365_v44  ;;  %v2203_v22 = vmul.f32 -1.442695, %v1466_v29 }
 0x5a7   :  { %v1408_v50 = vpop.f32.mrf.mxu0  ;;  %v1449_v42 = vpop.f32.mrf.mxu1 }
 0x5a8   :  { %v2202_v48 = vmul.f32 -1.442695, %v1453_v10  ;;  %2452 = vpow2.f32 %v2201_v30  ;;  %v2204_v43 = vmul.f32 -1.442695, %v1467_v46 }
 0x5a9   :  { %v1409_v56 = vpop.f32.mrf.mxu0  ;;  %v1450_v38 = vpop.f32.mrf.mxu1 }
 0x5aa   :  { %2454 = vpow2.f32 %v2202_v48  ;;  %v4544_v56 = vld [vmem:[#allocation66_spill] sm:$0xff] }
 0x5ab   :  { %2456 = vpow2.f32 %v2203_v22 }
 0x5ac   :  { %2458 = vpow2.f32 %v2204_v43 }
 0x5b5   :  { %v2453_v20 = vpop.eup %2452 }
 0x5b6   :  { %v1460_v42 = vadd.f32 1.0, %v2453_v20  ;;  %v1367_v20 = vld [vmem:[#allocation3 + $0xe8] sm:$0xff] }
 0x5b7   :  { %v2455_v50 = vpop.eup %2454 }
 0x5b8   :  { %v1461_v38 = vadd.f32 1.0, %v2455_v50  ;;  %2460 = vrcp.f32 %v1460_v42  ;;  %v2457_v61 = vpop.eup %2456 }
 0x5b9   :  { %v2459_v17 = vpop.eup %2458  ;;  %v1474_v49 = vadd.f32 1.0, %v2457_v61 }
 0x5ba   :  { %2462 = vrcp.f32 %v1461_v38  ;;  %v1475_v30 = vadd.f32 1.0, %v2459_v17 }
 0x5bb   :  { %2464 = vrcp.f32 %v1474_v49 }
 0x5bc   :  { %2466 = vrcp.f32 %v1475_v30 }
 0x5c5   :  { %v2461_v57 = vpop.eup %2460 }
 0x5c7   :  { %v2463_v58 = vpop.eup %2462 }
 0x5c8   :  { %v2465_v42 = vpop.eup %2464 }
 0x5c9   :  { %v2467_v38 = vpop.eup %2466  ;;  %v1527_v61 = vsub.f32 1.0, %v2465_v42  ;;  %v1531_v49 = vmul.f32 %v2465_v42, %v3745_v2  ;;  %v4564_v2 = vld [vmem:[#allocation34_spill] sm:$0xff]  ;;  %v4575_v42 = vld [vmem:[#allocation52_spill] sm:$0xff] }
 0x5e3   :  { %v1514_v10 = vpop.f32.mrf.mxu0 }
 0x5e4   :  { %v1515_v48 = vadd.f32 %v1514_v10, %v4544_v56  ;;  %v1528_v10 = vsub.f32 1.0, %v2467_v38 }
 0x5e5   :  { %v1516_v44 = vpop.f32.mrf.mxu0 }
 0x5e6   :  { %v1521_v29 = vmul.f32 %v2461_v57, %v1515_v48  ;;  %v1517_v22 = vadd.f32 %v1516_v44, %v4408_v40  ;;  %v1532_v44 = vmul.f32 %v2467_v38, %v3747_v0  ;;  %v4565_v0 = vld [vmem:[#allocation36_spill] sm:$0xff]  ;;  %v4576_v38 = vld [vmem:[#allocation53_spill] sm:$0xff] }
 0x5e7   :  { %v1518_v43 = vpop.f32.mrf.mxu0 }
 0x5e8   :  { %v1523_v55 = vadd.f32 %v1521_v29, %v1366_v51  ;;  %v1522_v16 = vmul.f32 %v2463_v58, %v1517_v22  ;;  %v4568_v22 = vld [vmem:[#allocation40_spill] sm:$0xff]  ;;  %v4569_v58 = vld [vmem:[#allocation45_spill] sm:$0xff] }
 0x5e9   :  { %v1519_v46 = vpop.f32.mrf.mxu0 }
 0x5ea   :  { %2468 = vtanh.f32 %v1523_v55  ;;  %v1524_v50 = vadd.f32 %v1522_v16, %v1367_v20  ;;  %v4570_v20 = vld [vmem:[#allocation47_spill] sm:$0xff]  ;;  %v4571_v55 = vld [vmem:[#allocation48_spill] sm:$0xff]  ;;  %v4572_v16 = vld [vmem:[#allocation49_spill] sm:$0xff] }
 0x5eb   :  { %v4573_v46 = vld [vmem:[#allocation50_spill] sm:$0xff] }
 0x5ec   :  { %2470 = vtanh.f32 %v1524_v50  ;;  %v4574_v50 = vld [vmem:[#allocation51_spill] sm:$0xff] }
 0x5f7   :  { %v2469_v17 = vpop.eup %2468 }
 0x5f8   :  { %v1529_v56 = vmul.f32 %v2469_v17, %v1527_v61  ;;  %v4577_v61 = vld [vmem:[#allocation54_spill] sm:$0xff]  ;;  %v4578_v17 = vld [vmem:[#allocation55_spill] sm:$0xff] }
 0x5f9   :  { %v2471_v48 = vpop.eup %2470 }
 0x5fa   :  { %v1530_v57 = vmul.f32 %v2471_v48, %v1528_v10  ;;  %v3860_v43 = vadd.f32 %v1531_v49, %v1529_v56  ;;  %v4567_v56 = vld [vmem:[#allocation38_spill] sm:$0xff]  ;;  %v4579_v10 = vld [vmem:[#allocation56_spill] sm:$0xff]  ;;  %v4580_v49 = vld [vmem:[#allocation57_spill] sm:$0xff] }
 0x5fb   :  { %v4581_v48 = vld [vmem:[#allocation58_spill] sm:$0xff] }
 0x5fc   :  { %v3862_v30 = vadd.f32 %v1532_v44, %v1530_v57  ;;  %1536 = vst [vmem:[#allocation9 + $0x40] sm:$0xff] %v3860_v43  ;;  %v3870_v29 = vpack.c.bf16 %v3860_v43, %v3860_v43  ;;  %v4582_v57 = vld [vmem:[#allocation59_spill] sm:$0xff]  ;;  %v4583_v44 = vld [vmem:[#allocation60_spill] sm:$0xff] }
 0x5fe   :  { %1537 = vst [vmem:[#allocation9 + $0x48] sm:$0xff] %v3862_v30  ;;  %v1546_v51 = vpack.c.bf16 %v3862_v30, %v3862_v30 }
 0x600   :  { %1579 = vmatprep.mubr.bf16.mxu1 %v1546_v51  ;;  %1620 = vmatprep.mubr.bf16.mxu0 %v1546_v51 }
 0x601   :  { %1580 = vmatmul.mubr.bf16.vlgmr.msra.gmra.mxu1 %v3870_v29  ;;  %1621 = vmatmul.mubr.bf16.vlgmr.msra.gmra.mxu0 %v3870_v29 }
 0x602   :  { %1658 = vmatpush1.bf16.msra.mxu1 %v3544_v53  ;;  %1689 = vmatprep.mubr.bf16.mxu1 %v1546_v51  ;;  %v4584_v51 = vld [vmem:[#allocation61_spill] sm:$0xff] }
 0x603   :  { %1659 = vmatprep.subr.bf16.mxu1 %v3547_v34  ;;  %1725 = vmatpush1.bf16.msra.mxu0 %v3341_v37  ;;  %v4545_v37 = vld [vmem:[#allocation19_spill] sm:$0xff] }
 0x604   :  { %1726 = vmatprep.subr.bf16.mxu0 %v3344_v39  ;;  %v4546_v39 = vld [vmem:[#allocation20_spill] sm:$0xff] }
 0x606   :  { %1660 = vmatpush1.bf16.msra.mxu1 %v3552_v18 }
 0x607   :  { %1661 = vmatprep.subr.bf16.mxu1 %v3555_v28  ;;  %1727 = vmatpush1.bf16.msra.mxu0 %v3349_v23  ;;  %v4547_v23 = vld [vmem:[#allocation13_spill] sm:$0xff] }
 0x608   :  { %1728 = vmatprep.subr.bf16.mxu0 %v3352_v19  ;;  %v4548_v19 = vld [vmem:[#allocation39_spill] sm:$0xff] }
 0x60a   :  { %1662 = vmatpush1.bf16.msra.mxu1 %v3560_v45 }
 0x60b   :  { %1663 = vmatprep.subr.bf16.mxu1 %v3563_v24  ;;  %1729 = vmatpush1.bf16.msra.mxu0 %v3357_v27  ;;  %v4549_v27 = vld [vmem:[#allocation21_spill] sm:$0xff] }
 0x60c   :  { %1730 = vmatprep.subr.bf16.mxu0 %v3360_v11  ;;  %v4550_v11 = vld [vmem:[#allocation22_spill] sm:$0xff] }
 0x60e   :  { %1664 = vmatpush1.bf16.msra.mxu1 %v3568_v41 }
 0x60f   :  { %1665 = vmatprep.subr.bf16.mxu1 %v3571_v14  ;;  %1731 = vmatpush1.bf16.msra.mxu0 %v3365_v1  ;;  %v4551_v1 = vld [vmem:[#allocation41_spill] sm:$0xff] }
 0x610   :  { %1732 = vmatprep.subr.bf16.mxu0 %v3368_v59  ;;  %v4552_v59 = vld [vmem:[#allocation23_spill] sm:$0xff] }
 0x612   :  { %1666 = vmatpush1.bf16.msra.mxu1 %v3576_v36 }
 0x613   :  { %1667 = vmatprep.subr.bf16.mxu1 %v3579_v63  ;;  %1733 = vmatpush1.bf16.msra.mxu0 %v3373_v35  ;;  %v4553_v35 = vld [vmem:[#allocation24_spill] sm:$0xff] }
 0x614   :  { %1734 = vmatprep.subr.bf16.mxu0 %v3376_v47  ;;  %v4554_v47 = vld [vmem:[#allocation25_spill] sm:$0xff] }
 0x616   :  { %1668 = vmatpush1.bf16.msra.mxu1 %v3584_v12 }
 0x617   :  { %1669 = vmatprep.subr.bf16.mxu1 %v3587_v62  ;;  %1735 = vmatpush1.bf16.msra.mxu0 %v3381_v31  ;;  %v4555_v31 = vld [vmem:[#allocation26_spill] sm:$0xff] }
 0x618   :  { %1736 = vmatprep.subr.bf16.mxu0 %v3384_v33  ;;  %v4556_v33 = vld [vmem:[#allocation27_spill] sm:$0xff] }
 0x61a   :  { %1670 = vmatpush1.bf16.msra.mxu1 %v3592_v25 }
 0x61b   :  { %1671 = vmatprep.subr.bf16.mxu1 %v3595_v32  ;;  %1737 = vmatpush1.bf16.msra.mxu0 %v3389_v3  ;;  %v4557_v3 = vld [vmem:[#allocation28_spill] sm:$0xff] }
 0x61c   :  { %1738 = vmatprep.subr.bf16.mxu0 %v3392_v4  ;;  %v4558_v4 = vld [vmem:[#allocation29_spill] sm:$0xff] }
 0x61e   :  { %1672 = vmatpush1.bf16.msra.mxu1 %v3600_v21 }
 0x61f   :  { %1673 = vmatprep.subr.bf16.mxu1 %v3603_v15  ;;  %1739 = vmatpush1.bf16.msra.mxu0 %v3397_v5  ;;  %v4559_v5 = vld [vmem:[#allocation30_spill] sm:$0xff] }
 0x620   :  { %1740 = vmatprep.subr.bf16.mxu0 %v3400_v6  ;;  %v4560_v6 = vld [vmem:[#allocation67_spill] sm:$0xff] }
 0x622   :  { %1674 = vmatpush2.bf16.msra.mxu1 %v4488_v26 }
 0x623   :  { %1675 = vmatprep.subr.bf16.mxu1 %v4489_v60  ;;  %1741 = vmatpush2.bf16.msra.mxu0 %v3405_v7  ;;  %v4561_v7 = vld [vmem:[#allocation31_spill] sm:$0xff] }
 0x624   :  { %1742 = vmatprep.subr.bf16.mxu0 %v3408_v8  ;;  %v4562_v8 = vld [vmem:[#allocation32_spill] sm:$0xff] }
 0x626   :  { %1676 = vmatpush2.bf16.msra.mxu1 %v4490_v54 }
 0x627   :  { %1677 = vmatprep.subr.bf16.mxu1 %v4491_v13  ;;  %1743 = vmatpush2.bf16.msra.mxu0 %v3413_v9  ;;  %v4563_v9 = vld [vmem:[#allocation33_spill] sm:$0xff] }
 0x628   :  { %1744 = vmatprep.subr.bf16.mxu0 %v4492_v52  ;;  %v4566_v52 = vld [vmem:[#allocation43_spill] sm:$0xff] }
 0x62a   :  { %1678 = vmatpush2.bf16.msra.mxu1 %v4545_v37 }
 0x62b   :  { %1679 = vmatprep.subr.bf16.mxu1 %v4546_v39  ;;  %1745 = vmatpush2.bf16.msra.mxu0 %v4547_v23  ;;  %v4586_v23 = vld [vmem:[#allocation63_spill] sm:$0xff] }
 0x62c   :  { %1746 = vmatprep.subr.bf16.mxu0 %v4548_v19  ;;  %v4587_v19 = vld [vmem:[#allocation64_spill] sm:$0xff] }
 0x62e   :  { %1680 = vmatpush2.bf16.msra.mxu1 %v4549_v27 }
 0x62f   :  { %1681 = vmatprep.subr.bf16.mxu1 %v4550_v11  ;;  %1747 = vmatpush2.bf16.msra.mxu0 %v4551_v1  ;;  %v4588_v1 = vld [vmem:[#allocation65_spill] sm:$0xff] }
 0x630   :  { %1748 = vmatprep.subr.bf16.mxu0 %v4552_v59 }
 0x632   :  { %1682 = vmatpush2.bf16.msra.mxu1 %v4553_v35 }
 0x633   :  { %1683 = vmatprep.subr.bf16.mxu1 %v4554_v47  ;;  %1749 = vmatpush2.bf16.msra.mxu0 %v4555_v31 }
 0x634   :  { %1750 = vmatprep.subr.bf16.mxu0 %v4556_v33 }
 0x636   :  { %1684 = vmatpush2.bf16.msra.mxu1 %v4557_v3 }
 0x637   :  { %1685 = vmatprep.subr.bf16.mxu1 %v4558_v4  ;;  %1751 = vmatpush2.bf16.msra.mxu0 %v4559_v5 }
 0x638   :  { %1752 = vmatprep.subr.bf16.mxu0 %v4560_v6 }
 0x63a   :  { %1686 = vmatpush2.bf16.msra.mxu1 %v4561_v7 }
 0x63b   :  { %1687 = vmatprep.subr.bf16.mxu1 %v4562_v8  ;;  %1753 = vmatpush2.bf16.msra.mxu0 %v4563_v9 }
 0x63c   :  { %1754 = vmatprep.subr.bf16.mxu0 %v4564_v2 }
 0x63e   :  { %1688 = vmatpush2.bf16.msra.mxu1 %v4565_v0 }
 0x63f   :  { %1765 = vmatprep.subr.bf16.mxu1 %v4566_v52  ;;  %1755 = vmatpush2.bf16.msra.mxu0 %v4567_v56  ;;  %v4589_v52 = vld [vmem:[#allocation14_spill] sm:$0xff] }
 0x640   :  { %1834 = vmatprep.subr.bf16.mxu0 %v4568_v22 }
 0x641   :  { %1690 = vmatmul.mubr.bf16.vlgmr.msra.gmra.mxu1 %v3870_v29  ;;  %v4585_v29 = vld [vmem:[#allocation62_spill] sm:$0xff] }
 0x642   :  { %1766 = vmatpush1.bf16.msra.mxu1 %v4569_v58  ;;  %v4590_v58 = vld [vmem:[#allocation42_spill] sm:$0xff] }
 0x643   :  { %1767 = vmatprep.subr.bf16.mxu1 %v4570_v20  ;;  %v4591_v20 = vld [vmem:[#allocation44_spill] sm:$0xff] }
 0x646   :  { %1768 = vmatpush1.bf16.msra.mxu1 %v4571_v55  ;;  %v4592_v55 = vld [vmem:[#allocation46_spill] sm:$0xff] }
 0x647   :  { %1769 = vmatprep.subr.bf16.mxu1 %v4572_v16  ;;  %v4593_v16 = vld [vmem:[#allocation68_spill] sm:$0xff] }
 0x64a   :  { %1770 = vmatpush1.bf16.msra.mxu1 %v4573_v46  ;;  %v4594_v46 = vld [vmem:[#allocation69_spill] sm:$0xff] }
 0x64b   :  { %1771 = vmatprep.subr.bf16.mxu1 %v4574_v50  ;;  %v4595_v50 = vld [vmem:[#allocation70_spill] sm:$0xff] }
 0x64e   :  { %1772 = vmatpush1.bf16.msra.mxu1 %v4575_v42  ;;  %v4596_v42 = vld [vmem:[#allocation71_spill] sm:$0xff] }
 0x64f   :  { %1773 = vmatprep.subr.bf16.mxu1 %v4576_v38  ;;  %v4597_v38 = vld [vmem:[#allocation72_spill] sm:$0xff] }
 0x652   :  { %1774 = vmatpush1.bf16.msra.mxu1 %v4577_v61  ;;  %v4598_v61 = vld [vmem:[#allocation73_spill] sm:$0xff] }
 0x653   :  { %1775 = vmatprep.subr.bf16.mxu1 %v4578_v17  ;;  %v4599_v17 = vld [vmem:[#allocation74_spill] sm:$0xff] }
 0x656   :  { %1776 = vmatpush1.bf16.msra.mxu1 %v4579_v10  ;;  %v2628_v10 = vld [vmem:[#allocation6 + $0xe4] ss:$16 sps:$4 sm:$0xff]  }
 0x657   :  { %1777 = vmatprep.subr.bf16.mxu1 %v4580_v49 }
 0x65a   :  { %1778 = vmatpush1.bf16.msra.mxu1 %v4581_v48 }
 0x65b   :  { %1779 = vmatprep.subr.bf16.mxu1 %v4582_v57 }
 0x65e   :  { %1780 = vmatpush1.bf16.msra.mxu1 %v4583_v44 }
 0x65f   :  { %1781 = vmatprep.subr.bf16.mxu1 %v4584_v51 }
 0x662   :  { %1782 = vmatpush2.bf16.msra.mxu1 %v4585_v29 }
 0x663   :  { %1783 = vmatprep.subr.bf16.mxu1 %v4586_v23 }
 0x666   :  { %1784 = vmatpush2.bf16.msra.mxu1 %v4587_v19 }
 0x667   :  { %1785 = vmatprep.subr.bf16.mxu1 %v4588_v1  ;;  %v1539_v1 = vld [vmem:[#allocation3 + $0xf0] sm:$0xff] }
 0x66a   :  { %1786 = vmatpush2.bf16.msra.mxu1 %v4589_v52  ;;  %v1540_v52 = vld [vmem:[#allocation3 + $0xf8] sm:$0xff] }
 0x66b   :  { %1787 = vmatprep.subr.bf16.mxu1 %v4590_v58 }
 0x66e   :  { %1788 = vmatpush2.bf16.msra.mxu1 %v4591_v20 }
 0x66f   :  { %1789 = vmatprep.subr.bf16.mxu1 %v4592_v55 }
 0x672   :  { %1790 = vmatpush2.bf16.msra.mxu1 %v4593_v16 }
 0x673   :  { %1791 = vmatprep.subr.bf16.mxu1 %v4594_v46 }
 0x676   :  { %1792 = vmatpush2.bf16.msra.mxu1 %v4595_v50 }
 0x677   :  { %1793 = vmatprep.subr.bf16.mxu1 %v4596_v42 }
 0x67a   :  { %1794 = vmatpush2.bf16.msra.mxu1 %v4597_v38 }
 0x67b   :  { %1795 = vmatprep.subr.bf16.mxu1 %v4598_v61  ;;  %v1541_v61 = vld [vmem:[#allocation3 + $0x100] sm:$0xff] }
 0x67e   :  { %1796 = vmatpush2.bf16.msra.mxu1 %v4599_v17  ;;  %v1542_v17 = vld [vmem:[#allocation3 + $0x108] sm:$0xff] }
 0x67f   :  { %1901 = vmatprep.subr.bf16.mxu1 %v2628_v10 }
 0x6c1   :  { %v1581_v49 = vpop.f32.mrf.mxu1  ;;  %v1622_v48 = vpop.f32.mrf.mxu0 }
 0x6c2   :  { %v1629_v50 = vadd.f32 %v1581_v49, %v1539_v1  ;;  %v1643_v16 = vadd.f32 %v1622_v48, %v1541_v61  ;;  %v1543_v61 = vld [vmem:[#allocation3 + $0x110] sm:$0xff] }
 0x6c3   :  { %v1583_v57 = vpop.f32.mrf.mxu1  ;;  %v1624_v44 = vpop.f32.mrf.mxu0 }
 0x6c4   :  { %v1630_v42 = vadd.f32 %v1583_v57, %v1540_v52  ;;  %v2205_v46 = vmul.f32 -1.442695, %v1629_v50  ;;  %v1644_v10 = vadd.f32 %v1624_v44, %v1542_v17  ;;  %v2207_v55 = vmul.f32 -1.442695, %v1643_v16 }
 0x6c5   :  { %v1585_v51 = vpop.f32.mrf.mxu1  ;;  %v1626_v29 = vpop.f32.mrf.mxu0 }
 0x6c6   :  { %v2206_v38 = vmul.f32 -1.442695, %v1630_v42  ;;  %2472 = vpow2.f32 %v2205_v46  ;;  %v2208_v20 = vmul.f32 -1.442695, %v1644_v10 }
 0x6c7   :  { %v1586_v23 = vpop.f32.mrf.mxu1  ;;  %v1627_v19 = vpop.f32.mrf.mxu0 }
 0x6c8   :  { %2474 = vpow2.f32 %v2206_v38  ;;  %v4600_v38 = vld [vmem:[#allocation66_spill] sm:$0xff] }
 0x6c9   :  { %2476 = vpow2.f32 %v2207_v55 }
 0x6ca   :  { %2478 = vpow2.f32 %v2208_v20 }
 0x6d3   :  { %v2473_v58 = vpop.eup %2472 }
 0x6d4   :  { %v1637_v29 = vadd.f32 1.0, %v2473_v58  ;;  %v1544_v58 = vld [vmem:[#allocation3 + $0x118] sm:$0xff] }
 0x6d5   :  { %v2475_v51 = vpop.eup %2474 }
 0x6d6   :  { %v1638_v23 = vadd.f32 1.0, %v2475_v51  ;;  %2480 = vrcp.f32 %v1637_v29  ;;  %v2477_v49 = vpop.eup %2476 }
 0x6d7   :  { %v2479_v57 = vpop.eup %2478  ;;  %v1651_v50 = vadd.f32 1.0, %v2477_v49 }
 0x6d8   :  { %2482 = vrcp.f32 %v1638_v23  ;;  %v1652_v46 = vadd.f32 1.0, %v2479_v57 }
 0x6d9   :  { %2484 = vrcp.f32 %v1651_v50 }
 0x6da   :  { %2486 = vrcp.f32 %v1652_v46 }
 0x6e3   :  { %v2481_v1 = vpop.eup %2480 }
 0x6e5   :  { %v2483_v48 = vpop.eup %2482 }
 0x6e6   :  { %v2485_v29 = vpop.eup %2484 }
 0x6e7   :  { %v2487_v23 = vpop.eup %2486  ;;  %v1704_v49 = vsub.f32 1.0, %v2485_v29  ;;  %v1708_v50 = vmul.f32 %v2485_v29, %v3860_v43  ;;  %v2629_v43 = vld [vmem:[#allocation6 + $0xe0] ss:$16 sps:$4 sm:$0xff]   ;;  %v4606_v29 = vld [vmem:[#allocation70_spill] sm:$0xff] }
 0x701   :  { %v1691_v42 = vpop.f32.mrf.mxu1 }
 0x702   :  { %v1692_v19 = vadd.f32 %v1691_v42, %v4600_v38  ;;  %v1705_v42 = vsub.f32 1.0, %v2487_v23 }
 0x703   :  { %v1693_v17 = vpop.f32.mrf.mxu1 }
 0x704   :  { %v1698_v16 = vmul.f32 %v2481_v1, %v1692_v19  ;;  %v1694_v55 = vadd.f32 %v1693_v17, %v4408_v40  ;;  %v1709_v17 = vmul.f32 %v2487_v23, %v3862_v30  ;;  %v2630_v30 = vld [vmem:[#allocation6 + $0xc4] ss:$16 sps:$4 sm:$0xff]  }
 0x705   :  { %v1695_v20 = vpop.f32.mrf.mxu1  ;;  %v4607_v23 = vld [vmem:[#allocation71_spill] sm:$0xff] }
 0x706   :  { %v1700_v44 = vadd.f32 %v1698_v16, %v1543_v61  ;;  %v1699_v52 = vmul.f32 %v2483_v48, %v1694_v55  ;;  %v2632_v55 = vld [vmem:[#allocation6 + $0xa4] ss:$16 sps:$4 sm:$0xff]  }
 0x707   :  { %v1696_v10 = vpop.f32.mrf.mxu1  ;;  %v2634_v48 = vld [vmem:[#allocation6 + $0x84] ss:$16 sps:$4 sm:$0xff]  }
 0x708   :  { %2488 = vtanh.f32 %v1700_v44  ;;  %v1701_v51 = vadd.f32 %v1699_v52, %v1544_v58  ;;  %v4601_v58 = vld [vmem:[#allocation42_spill] sm:$0xff]  ;;  %v4602_v44 = vld [vmem:[#allocation44_spill] sm:$0xff] }
 0x709   :  { %v4603_v52 = vld [vmem:[#allocation46_spill] sm:$0xff]  ;;  %v4604_v10 = vld [vmem:[#allocation68_spill] sm:$0xff] }
 0x70a   :  { %2490 = vtanh.f32 %v1701_v51  ;;  %v4605_v51 = vld [vmem:[#allocation69_spill] sm:$0xff] }
 0x715   :  { %v2489_v57 = vpop.eup %2488 }
 0x716   :  { %v1706_v38 = vmul.f32 %v2489_v57, %v1704_v49  ;;  %v4608_v49 = vld [vmem:[#allocation72_spill] sm:$0xff]  ;;  %v4609_v57 = vld [vmem:[#allocation73_spill] sm:$0xff] }
 0x717   :  { %v2491_v19 = vpop.eup %2490 }
 0x718   :  { %v1707_v1 = vmul.f32 %v2491_v19, %v1705_v42  ;;  %v3974_v20 = vadd.f32 %v1708_v50, %v1706_v38  ;;  %v2631_v38 = vld [vmem:[#allocation6 + $0xc0] ss:$16 sps:$4 sm:$0xff]   ;;  %v4610_v42 = vld [vmem:[#allocation74_spill] sm:$0xff] }
 0x71a   :  { %v3976_v46 = vadd.f32 %v1709_v17, %v1707_v1  ;;  %1713 = vst [vmem:[#allocation9 + $0x50] sm:$0xff] %v3974_v20  ;;  %v3984_v16 = vpack.c.bf16 %v3974_v20, %v3974_v20 }
 0x71c   :  { %1714 = vst [vmem:[#allocation9 + $0x58] sm:$0xff] %v3976_v46  ;;  %v1723_v61 = vpack.c.bf16 %v3976_v46, %v3976_v46 }
 0x71e   :  { %1756 = vmatprep.mubr.bf16.mxu0 %v1723_v61  ;;  %1797 = vmatprep.mubr.bf16.mxu1 %v1723_v61 }
 0x71f   :  { %1757 = vmatmul.mubr.bf16.vlgmr.msra.gmra.mxu0 %v3984_v16  ;;  %1798 = vmatmul.mubr.bf16.vlgmr.msra.gmra.mxu1 %v3984_v16 }
 0x720   :  { %1835 = vmatpush1.bf16.msra.mxu0 %v3544_v53  ;;  %1866 = vmatprep.mubr.bf16.mxu0 %v1723_v61  ;;  %v2633_v53 = vld [vmem:[#allocation6 + $0xa0] ss:$16 sps:$4 sm:$0xff]  }
 0x721   :  { %1836 = vmatprep.subr.bf16.mxu0 %v3547_v34  ;;  %1902 = vmatpush1.bf16.msra.mxu1 %v2629_v43  ;;  %v2635_v34 = vld [vmem:[#allocation6 + $0x80] ss:$16 sps:$4 sm:$0xff]  }
 0x722   :  { %1903 = vmatprep.subr.bf16.mxu1 %v2630_v30 }
 0x724   :  { %1837 = vmatpush1.bf16.msra.mxu0 %v3552_v18  ;;  %v2636_v18 = vld [vmem:[#allocation6 + $0x64] ss:$16 sps:$4 sm:$0xff]  }
 0x725   :  { %1838 = vmatprep.subr.bf16.mxu0 %v3555_v28  ;;  %1904 = vmatpush1.bf16.msra.mxu1 %v2631_v38  ;;  %v2637_v28 = vld [vmem:[#allocation6 + $0x60] ss:$16 sps:$4 sm:$0xff]  }
 0x726   :  { %1905 = vmatprep.subr.bf16.mxu1 %v2632_v55  ;;  %v1716_v38 = vld [vmem:[#allocation3 + $0x120] sm:$0xff]  ;;  %v1717_v55 = vld [vmem:[#allocation3 + $0x128] sm:$0xff] }
 0x728   :  { %1839 = vmatpush1.bf16.msra.mxu0 %v3560_v45  ;;  %v2638_v45 = vld [vmem:[#allocation6 + $0x44] ss:$16 sps:$4 sm:$0xff]  }
 0x729   :  { %1840 = vmatprep.subr.bf16.mxu0 %v3563_v24  ;;  %1906 = vmatpush1.bf16.msra.mxu1 %v2633_v53  ;;  %v2639_v24 = vld [vmem:[#allocation6 + $0x40] ss:$16 sps:$4 sm:$0xff]  }
 0x72a   :  { %1907 = vmatprep.subr.bf16.mxu1 %v2634_v48 }
 0x72c   :  { %1841 = vmatpush1.bf16.msra.mxu0 %v3568_v41  ;;  %v2640_v41 = vld [vmem:[#allocation6 + $0x24] ss:$16 sps:$4 sm:$0xff]  }
 0x72d   :  { %1842 = vmatprep.subr.bf16.mxu0 %v3571_v14  ;;  %1908 = vmatpush1.bf16.msra.mxu1 %v2635_v34  ;;  %v2641_v14 = vld [vmem:[#allocation6 + $0x20] ss:$16 sps:$4 sm:$0xff]  }
 0x72e   :  { %1909 = vmatprep.subr.bf16.mxu1 %v2636_v18 }
 0x730   :  { %1843 = vmatpush1.bf16.msra.mxu0 %v3576_v36  ;;  %v2642_v36 = vld [vmem:[#allocation6 + $0x4] ss:$16 sps:$4 sm:$0xff]  }
 0x731   :  { %1844 = vmatprep.subr.bf16.mxu0 %v3579_v63  ;;  %1910 = vmatpush1.bf16.msra.mxu1 %v2637_v28  ;;  %v2643_v63 = vld [vmem:[#allocation6] ss:$16 sps:$4 sm:$0xff]  }
 0x732   :  { %1911 = vmatprep.subr.bf16.mxu1 %v2638_v45  ;;  %v1718_v28 = vld [vmem:[#allocation3 + $0x130] sm:$0xff]  ;;  %v1719_v45 = vld [vmem:[#allocation3 + $0x138] sm:$0xff] }
 0x734   :  { %1845 = vmatpush1.bf16.msra.mxu0 %v3584_v12  ;;  %v2644_v12 = vld [vmem:[#allocation6 + $0x1e4] ss:$16 sps:$4 sm:$0xff]  }
 0x735   :  { %1846 = vmatprep.subr.bf16.mxu0 %v3587_v62  ;;  %1912 = vmatpush1.bf16.msra.mxu1 %v2639_v24  ;;  %v2645_v62 = vld [vmem:[#allocation6 + $0x1e0] ss:$16 sps:$4 sm:$0xff]  }
 0x736   :  { %1913 = vmatprep.subr.bf16.mxu1 %v2640_v41 }
 0x738   :  { %1847 = vmatpush1.bf16.msra.mxu0 %v3592_v25  ;;  %v2646_v25 = vld [vmem:[#allocation6 + $0x1c4] ss:$16 sps:$4 sm:$0xff]  }
 0x739   :  { %1848 = vmatprep.subr.bf16.mxu0 %v3595_v32  ;;  %1914 = vmatpush1.bf16.msra.mxu1 %v2641_v14  ;;  %v2647_v32 = vld [vmem:[#allocation6 + $0x1c0] ss:$16 sps:$4 sm:$0xff]  }
 0x73a   :  { %1915 = vmatprep.subr.bf16.mxu1 %v2642_v36 }
 0x73c   :  { %1849 = vmatpush1.bf16.msra.mxu0 %v3600_v21  ;;  %v2648_v21 = vld [vmem:[#allocation6 + $0x1a4] ss:$16 sps:$4 sm:$0xff]  }
 0x73d   :  { %1850 = vmatprep.subr.bf16.mxu0 %v3603_v15  ;;  %1916 = vmatpush1.bf16.msra.mxu1 %v2643_v63  ;;  %v2649_v15 = vld [vmem:[#allocation6 + $0x1a0] ss:$16 sps:$4 sm:$0xff]  }
 0x73e   :  { %1917 = vmatprep.subr.bf16.mxu1 %v2644_v12 }
 0x740   :  { %1851 = vmatpush2.bf16.msra.mxu0 %v4488_v26  ;;  %v2650_v26 = vld [vmem:[#allocation6 + $0x184] ss:$16 sps:$4 sm:$0xff]  }
 0x741   :  { %1852 = vmatprep.subr.bf16.mxu0 %v4489_v60  ;;  %1918 = vmatpush2.bf16.msra.mxu1 %v2645_v62  ;;  %v2651_v60 = vld [vmem:[#allocation6 + $0x180] ss:$16 sps:$4 sm:$0xff]  }
 0x742   :  { %1919 = vmatprep.subr.bf16.mxu1 %v2646_v25 }
 0x744   :  { %1853 = vmatpush2.bf16.msra.mxu0 %v4490_v54  ;;  %v2652_v54 = vld [vmem:[#allocation6 + $0xec] ss:$16 sps:$4 sm:$0xff]  }
 0x745   :  { %1854 = vmatprep.subr.bf16.mxu0 %v4491_v13  ;;  %1920 = vmatpush2.bf16.msra.mxu1 %v2647_v32  ;;  %v2653_v13 = vld [vmem:[#allocation6 + $0xe8] ss:$16 sps:$4 sm:$0xff]  }
 0x746   :  { %1921 = vmatprep.subr.bf16.mxu1 %v2648_v21 }
 0x748   :  { %1855 = vmatpush2.bf16.msra.mxu0 %v4545_v37  ;;  %v2654_v37 = vld [vmem:[#allocation6 + $0xcc] ss:$16 sps:$4 sm:$0xff]  }
 0x749   :  { %1856 = vmatprep.subr.bf16.mxu0 %v4546_v39  ;;  %1922 = vmatpush2.bf16.msra.mxu1 %v2649_v15  ;;  %v2655_v39 = vld [vmem:[#allocation6 + $0xc8] ss:$16 sps:$4 sm:$0xff]  }
 0x74a   :  { %1923 = vmatprep.subr.bf16.mxu1 %v2650_v26 }
 0x74c   :  { %1857 = vmatpush2.bf16.msra.mxu0 %v4549_v27  ;;  %v2656_v27 = vld [vmem:[#allocation6 + $0xac] ss:$16 sps:$4 sm:$0xff]  }
 0x74d   :  { %1858 = vmatprep.subr.bf16.mxu0 %v4550_v11  ;;  %1924 = vmatpush2.bf16.msra.mxu1 %v2651_v60  ;;  %v2657_v11 = vld [vmem:[#allocation6 + $0xa8] ss:$16 sps:$4 sm:$0xff]  }
 0x74e   :  { %1925 = vmatprep.subr.bf16.mxu1 %v4552_v59  ;;  %v2658_v59 = vld [vmem:[#allocation6 + $0x8c] ss:$16 sps:$4 sm:$0xff]  }
 0x750   :  { %1859 = vmatpush2.bf16.msra.mxu0 %v4553_v35  ;;  %v2659_v35 = vld [vmem:[#allocation6 + $0x88] ss:$16 sps:$4 sm:$0xff]  }
 0x751   :  { %1860 = vmatprep.subr.bf16.mxu0 %v4554_v47  ;;  %1926 = vmatpush2.bf16.msra.mxu1 %v4555_v31  ;;  %v2660_v47 = vld [vmem:[#allocation6 + $0x6c] ss:$16 sps:$4 sm:$0xff]   ;;  %v2661_v31 = vld [vmem:[#allocation6 + $0x68] ss:$16 sps:$4 sm:$0xff]  }
 0x752   :  { %1927 = vmatprep.subr.bf16.mxu1 %v4556_v33  ;;  %v2662_v33 = vld [vmem:[#allocation6 + $0x4c] ss:$16 sps:$4 sm:$0xff]  }
 0x754   :  { %1861 = vmatpush2.bf16.msra.mxu0 %v4557_v3  ;;  %v2663_v3 = vld [vmem:[#allocation6 + $0x48] ss:$16 sps:$4 sm:$0xff]  }
 0x755   :  { %1862 = vmatprep.subr.bf16.mxu0 %v4558_v4  ;;  %1928 = vmatpush2.bf16.msra.mxu1 %v4559_v5  ;;  %v2664_v4 = vld [vmem:[#allocation6 + $0x2c] ss:$16 sps:$4 sm:$0xff]   ;;  %v2665_v5 = vld [vmem:[#allocation6 + $0x28] ss:$16 sps:$4 sm:$0xff]  }
 0x756   :  { %1929 = vmatprep.subr.bf16.mxu1 %v4560_v6  ;;  %v2666_v6 = vld [vmem:[#allocation6 + $0xc] ss:$16 sps:$4 sm:$0xff]  }
 0x758   :  { %1863 = vmatpush2.bf16.msra.mxu0 %v4561_v7  ;;  %v2667_v7 = vld [vmem:[#allocation6 + $0x8] ss:$16 sps:$4 sm:$0xff]  }
 0x759   :  { %1864 = vmatprep.subr.bf16.mxu0 %v4562_v8  ;;  %1930 = vmatpush2.bf16.msra.mxu1 %v4563_v9  ;;  %v2668_v8 = vld [vmem:[#allocation6 + $0x1ec] ss:$16 sps:$4 sm:$0xff]   ;;  %v2669_v9 = vld [vmem:[#allocation6 + $0x1e8] ss:$16 sps:$4 sm:$0xff]  }
 0x75a   :  { %1931 = vmatprep.subr.bf16.mxu1 %v4564_v2  ;;  %v2670_v2 = vld [vmem:[#allocation6 + $0x1cc] ss:$16 sps:$4 sm:$0xff]  }
 0x75c   :  { %1865 = vmatpush2.bf16.msra.mxu0 %v4565_v0  ;;  %v2671_v0 = vld [vmem:[#allocation6 + $0x1c8] ss:$16 sps:$4 sm:$0xff]  }
 0x75d   :  { %1942 = vmatprep.subr.bf16.mxu0 %v2652_v54  ;;  %1932 = vmatpush2.bf16.msra.mxu1 %v4567_v56  ;;  %v2672_v56 = vld [vmem:[#allocation6 + $0x1ac] ss:$16 sps:$4 sm:$0xff]  }
 0x75e   :  { %2011 = vmatprep.subr.bf16.mxu1 %v4568_v22  ;;  %v2673_v22 = vld [vmem:[#allocation6 + $0x1a8] ss:$16 sps:$4 sm:$0xff]  }
 0x75f   :  { %1867 = vmatmul.mubr.bf16.vlgmr.msra.gmra.mxu0 %v3984_v16  ;;  %v4611_v54 = vld [vmem:[#allocation66_spill] sm:$0xff] }
 0x760   :  { %1943 = vmatpush1.bf16.msra.mxu0 %v2653_v13 }
 0x761   :  { %1944 = vmatprep.subr.bf16.mxu0 %v2654_v37 }
 0x764   :  { %1945 = vmatpush1.bf16.msra.mxu0 %v2655_v39  ;;  %v1720_v39 = vld [vmem:[#allocation3 + $0x140] sm:$0xff] }
 0x765   :  { %1946 = vmatprep.subr.bf16.mxu0 %v2656_v27 }
 0x768   :  { %1947 = vmatpush1.bf16.msra.mxu0 %v2657_v11 }
 0x769   :  { %1948 = vmatprep.subr.bf16.mxu0 %v2658_v59 }
 0x76c   :  { %1949 = vmatpush1.bf16.msra.mxu0 %v2659_v35 }
 0x76d   :  { %1950 = vmatprep.subr.bf16.mxu0 %v2660_v47  ;;  %v1721_v47 = vld [vmem:[#allocation3 + $0x148] sm:$0xff] }
 0x770   :  { %1951 = vmatpush1.bf16.msra.mxu0 %v2661_v31 }
 0x771   :  { %1952 = vmatprep.subr.bf16.mxu0 %v2662_v33 }
 0x774   :  { %1953 = vmatpush1.bf16.msra.mxu0 %v2663_v3 }
 0x775   :  { %1954 = vmatprep.subr.bf16.mxu0 %v2664_v4 }
 0x778   :  { %1955 = vmatpush1.bf16.msra.mxu0 %v2665_v5 }
 0x779   :  { %1956 = vmatprep.subr.bf16.mxu0 %v2666_v6 }
 0x77c   :  { %1957 = vmatpush1.bf16.msra.mxu0 %v2667_v7 }
 0x77d   :  { %1958 = vmatprep.subr.bf16.mxu0 %v2668_v8 }
 0x780   :  { %1959 = vmatpush2.bf16.msra.mxu0 %v2669_v9 }
 0x781   :  { %1960 = vmatprep.subr.bf16.mxu0 %v2670_v2 }
 0x784   :  { %1961 = vmatpush2.bf16.msra.mxu0 %v2671_v0 }
 0x785   :  { %1962 = vmatprep.subr.bf16.mxu0 %v2672_v56 }
 0x788   :  { %1963 = vmatpush2.bf16.msra.mxu0 %v2673_v22 }
 0x789   :  { %1964 = vmatprep.subr.bf16.mxu0 %v4601_v58 }
 0x78c   :  { %1965 = vmatpush2.bf16.msra.mxu0 %v4602_v44 }
 0x78d   :  { %1966 = vmatprep.subr.bf16.mxu0 %v4603_v52 }
 0x790   :  { %1967 = vmatpush2.bf16.msra.mxu0 %v4604_v10 }
 0x791   :  { %1968 = vmatprep.subr.bf16.mxu0 %v4605_v51 }
 0x794   :  { %1969 = vmatpush2.bf16.msra.mxu0 %v4606_v29 }
 0x795   :  { %1970 = vmatprep.subr.bf16.mxu0 %v4607_v23  ;;  %v2676_v23 = vld [vmem:[#allocation8 + $0x60] ss:$8 sps:$4 sm:$0xff]  }
 0x798   :  { %1971 = vmatpush2.bf16.msra.mxu0 %v4608_v49  ;;  %v2677_v49 = vld [vmem:[#allocation8 + $0x54] ss:$8 sps:$4 sm:$0xff]  }
 0x799   :  { %1972 = vmatprep.subr.bf16.mxu0 %v4609_v57  ;;  %v2678_v57 = vld [vmem:[#allocation8 + $0x50] ss:$8 sps:$4 sm:$0xff]  }
 0x79c   :  { %1973 = vmatpush2.bf16.msra.mxu0 %v4610_v42  ;;  %v2679_v42 = vld [vmem:[#allocation8 + $0x44] ss:$8 sps:$4 sm:$0xff]  }
 0x7df   :  { %v1758_v50 = vpop.f32.mrf.mxu0  ;;  %v1799_v19 = vpop.f32.mrf.mxu1 }
 0x7e0   :  { %v1806_v53 = vadd.f32 %v1758_v50, %v1716_v38  ;;  %v1820_v24 = vadd.f32 %v1799_v19, %v1718_v28  ;;  %v2680_v50 = vld [vmem:[#allocation8 + $0x40] ss:$8 sps:$4 sm:$0xff]   ;;  %v2681_v19 = vld [vmem:[#allocation8 + $0x34] ss:$8 sps:$4 sm:$0xff]   ;;  %v2694_v28 = vld [vmem:[#allocation8 + $0xd0] ss:$8 sps:$4 sm:$0xff]  }
 0x7e1   :  { %v1760_v1 = vpop.f32.mrf.mxu0  ;;  %v1801_v17 = vpop.f32.mrf.mxu1  ;;  %v2688_v38 = vld [vmem:[#allocation8] ss:$8 sps:$4 sm:$0xff]  }
 0x7e2   :  { %v1807_v48 = vadd.f32 %v1760_v1, %v1717_v55  ;;  %v2209_v34 = vmul.f32 -1.442695, %v1806_v53  ;;  %v1821_v41 = vadd.f32 %v1801_v17, %v1719_v45  ;;  %v2211_v14 = vmul.f32 -1.442695, %v1820_v24  ;;  %v2682_v1 = vld [vmem:[#allocation8 + $0x30] ss:$8 sps:$4 sm:$0xff]  }
 0x7e3   :  { %v1762_v61 = vpop.f32.mrf.mxu0  ;;  %v1803_v16 = vpop.f32.mrf.mxu1  ;;  %v2683_v17 = vld [vmem:[#allocation8 + $0x24] ss:$8 sps:$4 sm:$0xff]   ;;  %v2689_v55 = vld [vmem:[#allocation8 + $0xf4] ss:$8 sps:$4 sm:$0xff]   ;;  %v2690_v53 = vld [vmem:[#allocation8 + $0xf0] ss:$8 sps:$4 sm:$0xff]  }
 0x7e4   :  { %v2210_v18 = vmul.f32 -1.442695, %v1807_v48  ;;  %2492 = vpow2.f32 %v2209_v34  ;;  %v2212_v36 = vmul.f32 -1.442695, %v1821_v41  ;;  %v2684_v61 = vld [vmem:[#allocation8 + $0x20] ss:$8 sps:$4 sm:$0xff]  }
 0x7e5   :  { %v1763_v43 = vpop.f32.mrf.mxu0  ;;  %v1804_v30 = vpop.f32.mrf.mxu1  ;;  %v2685_v16 = vld [vmem:[#allocation8 + $0x14] ss:$8 sps:$4 sm:$0xff]   ;;  %v2691_v48 = vld [vmem:[#allocation8 + $0xe4] ss:$8 sps:$4 sm:$0xff]   ;;  %v2692_v34 = vld [vmem:[#allocation8 + $0xe0] ss:$8 sps:$4 sm:$0xff]  }
 0x7e6   :  { %2494 = vpow2.f32 %v2210_v18  ;;  %v2686_v43 = vld [vmem:[#allocation8 + $0x10] ss:$8 sps:$4 sm:$0xff]   ;;  %v2687_v30 = vld [vmem:[#allocation8 + $0x4] ss:$8 sps:$4 sm:$0xff]   ;;  %v2693_v18 = vld [vmem:[#allocation8 + $0xd4] ss:$8 sps:$4 sm:$0xff]  }
 0x7e7   :  { %2496 = vpow2.f32 %v2211_v14  ;;  %v2695_v45 = vld [vmem:[#allocation8 + $0xc4] ss:$8 sps:$4 sm:$0xff]   ;;  %v2696_v24 = vld [vmem:[#allocation8 + $0xc0] ss:$8 sps:$4 sm:$0xff]   ;;  %v2697_v41 = vld [vmem:[#allocation8 + $0xb4] ss:$8 sps:$4 sm:$0xff]  }
 0x7e8   :  { %2498 = vpow2.f32 %v2212_v36  ;;  %v2698_v14 = vld [vmem:[#allocation8 + $0xb0] ss:$8 sps:$4 sm:$0xff]   ;;  %v2699_v36 = vld [vmem:[#allocation8 + $0xa4] ss:$8 sps:$4 sm:$0xff]  }
 0x7f1   :  { %v2493_v63 = vpop.eup %2492 }
 0x7f2   :  { %v1814_v62 = vadd.f32 1.0, %v2493_v63  ;;  %v2700_v63 = vld [vmem:[#allocation8 + $0xa0] ss:$8 sps:$4 sm:$0xff]  }
 0x7f3   :  { %v2495_v12 = vpop.eup %2494 }
 0x7f4   :  { %v1815_v25 = vadd.f32 1.0, %v2495_v12  ;;  %2500 = vrcp.f32 %v1814_v62  ;;  %v2497_v32 = vpop.eup %2496  ;;  %v2701_v12 = vld [vmem:[#allocation8 + $0x94] ss:$8 sps:$4 sm:$0xff]   ;;  %v2702_v62 = vld [vmem:[#allocation8 + $0x90] ss:$8 sps:$4 sm:$0xff]  }
 0x7f5   :  { %v2499_v21 = vpop.eup %2498  ;;  %v1828_v15 = vadd.f32 1.0, %v2497_v32  ;;  %v2704_v32 = vld [vmem:[#allocation8 + $0x80] ss:$8 sps:$4 sm:$0xff]  }
 0x7f6   :  { %2502 = vrcp.f32 %v1815_v25  ;;  %v1829_v60 = vadd.f32 1.0, %v2499_v21  ;;  %v2703_v25 = vld [vmem:[#allocation8 + $0x84] ss:$8 sps:$4 sm:$0xff]  }
 0x7f7   :  { %2504 = vrcp.f32 %v1828_v15 }
 0x7f8   :  { %2506 = vrcp.f32 %v1829_v60 }
 0x801   :  { %v2501_v37 = vpop.eup %2500 }
 0x803   :  { %v2503_v35 = vpop.eup %2502 }
 0x804   :  { %v2505_v6 = vpop.eup %2504 }
 0x805   :  { %v2507_v7 = vpop.eup %2506  ;;  %v1881_v8 = vsub.f32 1.0, %v2505_v6  ;;  %v1885_v56 = vmul.f32 %v2505_v6, %v3974_v20  ;;  %v2674_v20 = vld [vmem:[#allocation8 + $0x70] ss:$8 sps:$4 sm:$0xff]  }
 0x806   :  { %v1882_v2 = vsub.f32 1.0, %v2507_v7  ;;  %v1886_v44 = vmul.f32 %v2507_v7, %v3976_v46  ;;  %v2675_v46 = vld [vmem:[#allocation8 + $0x64] ss:$8 sps:$4 sm:$0xff]  }
 0x81f   :  { %v1868_v26 = vpop.f32.mrf.mxu0 }
 0x820   :  { %v1869_v13 = vadd.f32 %v1868_v26, %v4611_v54 }
 0x821   :  { %v1870_v27 = vpop.f32.mrf.mxu0 }
 0x822   :  { %v1875_v11 = vmul.f32 %v2501_v37, %v1869_v13  ;;  %v1871_v59 = vadd.f32 %v1870_v27, %v4408_v40 }
 0x823   :  { %v1872_v31 = vpop.f32.mrf.mxu0 }
 0x824   :  { %v1877_v33 = vadd.f32 %v1875_v11, %v1720_v39  ;;  %v1876_v3 = vmul.f32 %v2503_v35, %v1871_v59  ;;  %v1893_v11 = vld [vmem:[#allocation3 + $0x150] sm:$0xff]  ;;  %v1894_v59 = vld [vmem:[#allocation3 + $0x158] sm:$0xff] }
 0x825   :  { %v1873_v4 = vpop.f32.mrf.mxu0 }
 0x826   :  { %2508 = vtanh.f32 %v1877_v33  ;;  %v1878_v5 = vadd.f32 %v1876_v3, %v1721_v47  ;;  %v1895_v3 = vld [vmem:[#allocation3 + $0x160] sm:$0xff]  ;;  %v1896_v4 = vld [vmem:[#allocation3 + $0x168] sm:$0xff] }
 0x828   :  { %2510 = vtanh.f32 %v1878_v5 }
 0x833   :  { %v2509_v9 = vpop.eup %2508 }
 0x834   :  { %v1883_v0 = vmul.f32 %v2509_v9, %v1881_v8 }
 0x835   :  { %v2511_v22 = vpop.eup %2510 }
 0x836   :  { %v1884_v58 = vmul.f32 %v2511_v22, %v1882_v2  ;;  %v4043_v52 = vadd.f32 %v1885_v56, %v1883_v0 }
 0x838   :  { %v4045_v10 = vadd.f32 %v1886_v44, %v1884_v58  ;;  %1890 = vst [vmem:[#allocation9 + $0x60] sm:$0xff] %v4043_v52  ;;  %v4053_v29 = vpack.c.bf16 %v4043_v52, %v4043_v52 }
 0x83a   :  { %1891 = vst [vmem:[#allocation9 + $0x68] sm:$0xff] %v4045_v10  ;;  %v1900_v51 = vpack.c.bf16 %v4045_v10, %v4045_v10 }
 0x83c   :  { %1933 = vmatprep.mubr.bf16.mxu1 %v1900_v51  ;;  %1974 = vmatprep.mubr.bf16.mxu0 %v1900_v51 }
 0x83d   :  { %1934 = vmatmul.mubr.bf16.vlgmr.msra.gmra.mxu1 %v4053_v29  ;;  %1975 = vmatmul.mubr.bf16.vlgmr.msra.gmra.mxu0 %v4053_v29 }
 0x83e   :  { %2012 = vmatpush1.bf16.msra.mxu1 %v2674_v20  ;;  %2043 = vmatprep.mubr.bf16.mxu1 %v1900_v51 }
 0x83f   :  { %2013 = vmatprep.subr.bf16.mxu1 %v2675_v46 }
 0x842   :  { %2014 = vmatpush1.bf16.msra.mxu1 %v2676_v23  ;;  %v1897_v23 = vld [vmem:[#allocation3 + $0x170] sm:$0xff] }
 0x843   :  { %2015 = vmatprep.subr.bf16.mxu1 %v2677_v49 }
 0x846   :  { %2016 = vmatpush1.bf16.msra.mxu1 %v2678_v57 }
 0x847   :  { %2017 = vmatprep.subr.bf16.mxu1 %v2679_v42 }
 0x84a   :  { %2018 = vmatpush1.bf16.msra.mxu1 %v2680_v50 }
 0x84b   :  { %2019 = vmatprep.subr.bf16.mxu1 %v2681_v19  ;;  %v1898_v19 = vld [vmem:[#allocation3 + $0x178] sm:$0xff] }
 0x84e   :  { %2020 = vmatpush1.bf16.msra.mxu1 %v2682_v1 }
 0x84f   :  { %2021 = vmatprep.subr.bf16.mxu1 %v2683_v17 }
 0x852   :  { %2022 = vmatpush1.bf16.msra.mxu1 %v2684_v61 }
 0x853   :  { %2023 = vmatprep.subr.bf16.mxu1 %v2685_v16 }
 0x856   :  { %2024 = vmatpush1.bf16.msra.mxu1 %v2686_v43 }
 0x857   :  { %2025 = vmatprep.subr.bf16.mxu1 %v2687_v30 }
 0x85a   :  { %2026 = vmatpush1.bf16.msra.mxu1 %v2688_v38 }
 0x85b   :  { %2027 = vmatprep.subr.bf16.mxu1 %v2689_v55 }
 0x85e   :  { %2028 = vmatpush2.bf16.msra.mxu1 %v2690_v53 }
 0x85f   :  { %2029 = vmatprep.subr.bf16.mxu1 %v2691_v48 }
 0x862   :  { %2030 = vmatpush2.bf16.msra.mxu1 %v2692_v34 }
 0x863   :  { %2031 = vmatprep.subr.bf16.mxu1 %v2693_v18 }
 0x866   :  { %2032 = vmatpush2.bf16.msra.mxu1 %v2694_v28 }
 0x867   :  { %2033 = vmatprep.subr.bf16.mxu1 %v2695_v45 }
 0x86a   :  { %2034 = vmatpush2.bf16.msra.mxu1 %v2696_v24 }
 0x86b   :  { %2035 = vmatprep.subr.bf16.mxu1 %v2697_v41 }
 0x86e   :  { %2036 = vmatpush2.bf16.msra.mxu1 %v2698_v14 }
 0x86f   :  { %2037 = vmatprep.subr.bf16.mxu1 %v2699_v36 }
 0x872   :  { %2038 = vmatpush2.bf16.msra.mxu1 %v2700_v63 }
 0x873   :  { %2039 = vmatprep.subr.bf16.mxu1 %v2701_v12 }
 0x876   :  { %2040 = vmatpush2.bf16.msra.mxu1 %v2702_v62 }
 0x877   :  { %2041 = vmatprep.subr.bf16.mxu1 %v2703_v25 }
 0x87a   :  { %2042 = vmatpush2.bf16.msra.mxu1 %v2704_v32 }
 0x87d   :  { %2044 = vmatmul.mubr.bf16.vlgmr.msra.gmra.mxu1 %v4053_v29 }
 0x8fd   :  { %v1935_v21 = vpop.f32.mrf.mxu1  ;;  %v1976_v15 = vpop.f32.mrf.mxu0 }
 0x8fe   :  { %v1983_v35 = vadd.f32 %v1935_v21, %v1893_v11  ;;  %v1997_v5 = vadd.f32 %v1976_v15, %v1895_v3 }
 0x8ff   :  { %v1937_v26 = vpop.f32.mrf.mxu1  ;;  %v1978_v60 = vpop.f32.mrf.mxu0 }
 0x900   :  { %v1984_v47 = vadd.f32 %v1937_v26, %v1894_v59  ;;  %v2213_v31 = vmul.f32 -1.442695, %v1983_v35  ;;  %v1998_v6 = vadd.f32 %v1978_v60, %v1896_v4  ;;  %v2215_v7 = vmul.f32 -1.442695, %v1997_v5 }
 0x901   :  { %v1939_v13 = vpop.f32.mrf.mxu1  ;;  %v1980_v37 = vpop.f32.mrf.mxu0 }
 0x902   :  { %v2214_v33 = vmul.f32 -1.442695, %v1984_v47  ;;  %2512 = vpow2.f32 %v2213_v31  ;;  %v2216_v8 = vmul.f32 -1.442695, %v1998_v6 }
 0x903   :  { %v1940_v39 = vpop.f32.mrf.mxu1  ;;  %v1981_v27 = vpop.f32.mrf.mxu0 }
 0x904   :  { %2514 = vpow2.f32 %v2214_v33 }
 0x905   :  { %2516 = vpow2.f32 %v2215_v7 }
 0x906   :  { %2518 = vpow2.f32 %v2216_v8 }
 0x90f   :  { %v2513_v9 = vpop.eup %2512 }
 0x910   :  { %v1991_v0 = vadd.f32 1.0, %v2513_v9 }
 0x911   :  { %v2515_v2 = vpop.eup %2514 }
 0x912   :  { %v1992_v56 = vadd.f32 1.0, %v2515_v2  ;;  %2520 = vrcp.f32 %v1991_v0  ;;  %v2517_v22 = vpop.eup %2516 }
 0x913   :  { %v2519_v58 = vpop.eup %2518  ;;  %v2005_v44 = vadd.f32 1.0, %v2517_v22 }
 0x914   :  { %2522 = vrcp.f32 %v1992_v56  ;;  %v2006_v29 = vadd.f32 1.0, %v2519_v58 }
 0x915   :  { %2524 = vrcp.f32 %v2005_v44 }
 0x916   :  { %2526 = vrcp.f32 %v2006_v29 }
 0x91f   :  { %v2521_v46 = vpop.eup %2520 }
 0x921   :  { %v2523_v50 = vpop.eup %2522 }
 0x922   :  { %v2525_v30 = vpop.eup %2524 }
 0x923   :  { %v2527_v38 = vpop.eup %2526  ;;  %v2062_v53 = vmul.f32 %v2525_v30, %v4043_v52 }
 0x924   :  { %v2059_v48 = vsub.f32 1.0, %v2527_v38 }
 0x93d   :  { %v2045_v51 = vpop.f32.mrf.mxu1 }
 0x93e   :  { %v2046_v20 = vadd.f32 %v2045_v51, %v4611_v54  ;;  %v2058_v54 = vsub.f32 1.0, %v2525_v30 }
 0x93f   :  { %v2047_v49 = vpop.f32.mrf.mxu1 }
 0x940   :  { %v2052_v57 = vmul.f32 %v2521_v46, %v2046_v20  ;;  %v2048_v42 = vadd.f32 %v2047_v49, %v4408_v40  ;;  %v2063_v40 = vmul.f32 %v2527_v38, %v4045_v10 }
 0x941   :  { %v2049_v1 = vpop.f32.mrf.mxu1 }
 0x942   :  { %v2054_v17 = vadd.f32 %v2052_v57, %v1897_v23  ;;  %v2053_v61 = vmul.f32 %v2523_v50, %v2048_v42 }
 0x943   :  { %v2050_v16 = vpop.f32.mrf.mxu1 }
 0x944   :  { %2528 = vtanh.f32 %v2054_v17  ;;  %v2055_v43 = vadd.f32 %v2053_v61, %v1898_v19 }
 0x946   :  { %2530 = vtanh.f32 %v2055_v43 }
 0x951   :  { %v2529_v55 = vpop.eup %2528 }
 0x952   :  { %v2060_v34 = vmul.f32 %v2529_v55, %v2058_v54 }
 0x953   :  { %v2531_v18 = vpop.eup %2530 }
 0x954   :  { %v2064_v28 = vadd.f32 %v2062_v53, %v2060_v34  ;;  %v2061_v45 = vmul.f32 %v2531_v18, %v2059_v48 }
 0x956   :  { %2067 = vst [vmem:[#allocation9 + $0x70] sm:$0xff] %v2064_v28  ;;  %v2065_v24 = vadd.f32 %v2063_v40, %v2061_v45 }
 0x958   :  { %2068 = vst [vmem:[#allocation9 + $0x78] sm:$0xff] %v2065_v24 }
 0x959   :  { %2776 = shalt.err (!%p2773_p5)
}
 0x95a   :  { %2082 = dma.vmem_to_hbm [thread:$0]  %s2077_s9, 2048, %s4072_s4, [#allocation5], %s2792_s18, %s2792_s18, %s2793_s19  }
 0x95b   :  { %2789 = dma.done.wait [#allocation5], 2048  }
 0x95c   :  { %2790 = vsyncadd [#allocation5], 4294965248 }
 0x95d   :  { %2086 = vsyncpa [#allocation4], 1 }
 0x95e   :  { %2087 = vsyncpa [#allocation7], 1 }
 0x95f   :  { %2088 = vsyncpa [#allocation5], 1 }

</bundles_post_ra>
